<compile_context>
chip_gen: v7x
topology: tpu7x:2x2x1
jax: 0.10.0
libtpu: 0.0.40
codegen_flags: <defaults>
</compile_context>

<pallas_src>
import functools

import jax
import jax.numpy as jnp
from jax.experimental import pallas as pl
from jax.experimental.pallas import tpu as pltpu

EPS = 1e-5  # matches nn.BatchNorm2d default


def _round_up(x, m):
    return ((x + m - 1) // m) * m


def _pad_channels(c):
    # Lane-dense (128) padding only for genuinely wide layers; small-channel layers
    # only pad to the bf16 packing quantum so DMA/writeback isn't mostly zeros.
    return _round_up(c, 128) if c >= 128 else _round_up(c, 16)


def _pick_row_tile(H, W, Cop, budget_bytes=4 << 20):
    """Rows per output tile: as many as fit the f32 output-tile budget, with th*W
    kept a multiple of 8 so the flat (th*W, Cop) block is sublane-aligned."""
    th = max(1, min(H, budget_bytes // max(1, W * Cop * 4)))
    while th > 1 and (th * W) % 8 != 0:
        th -= 1
    if (th * W) % 8 != 0:
        th = H  # single full-height tile: block == full array dim, always legal
    return th


def _conv_bn_relu_kernel(xp_ref, w_ref, shift_ref, o_ref, *, ksize, width, apply_relu):
    # xp_ref   : (Hp, Wp, Cip)  bf16 padded NHWC image (batch squeezed), VMEM-resident
    # w_ref    : (K*K, Cip, Cop) bf16 per-tap weights (BN scale already folded in)
    # shift_ref: (1, Cop) f32    conv-bias + BN shift
    # o_ref    : (th*W, Cop) f32 flat output row tile (also the accumulator)
    thw, _ = o_ref.shape
    th = thw // width
    cin = xp_ref.shape[-1]
    row0 = pl.program_id(1) * th

    for dy in range(ksize):
        for dx in range(ksize):
            # Direct windowed load of the (th, W, Cip) input slab for this tap; no
            # im2col patch / concatenate is ever materialized.
            win = xp_ref[pl.ds(row0 + dy, th), dx:dx + width, :]
            lhs = win.reshape(thw, cin)                              # (th*W, Cip) bf16
            contrib = jnp.dot(lhs, w_ref[dy * ksize + dx],
                              preferred_element_type=jnp.float32)    # (th*W, Cop) f32
            if dy == 0 and dx == 0:
                o_ref[...] = contrib
            else:
                o_ref[...] += contrib

    y = o_ref[...] + shift_ref[...]
    if apply_relu:
        y = jnp.maximum(y, 0.0)
    o_ref[...] = y


def conv_forward(x_nchw, weight_oihw, bias=None, bn=None, relu=True, stride=1):
    """Forward of the PyTorch `Conv` module: conv(k, pad=(k-1)//2) -> [BN] -> [ReLU].

    bn: optional (gamma, beta, running_mean, running_var) — inference mode (folded).
    Accepts/returns NCHW like PyTorch.
    """
    assert stride == 1, "only stride=1 (module default) is implemented"
    N, Ci, H, W = x_nchw.shape
    Co, Ci_w, Kk, Kk2 = weight_oihw.shape
    assert Ci_w == Ci and Kk == Kk2
    assert Kk % 2 == 1, "even kernel sizes unsupported: pad=(k-1)//2 would be asymmetric"
    pad = (Kk - 1) // 2

    Cip = _pad_channels(Ci)
    Cop = _pad_channels(Co)

    b = bias if bias is not None else jnp.zeros((Co,), jnp.float32)
    if bn is not None:
        gamma, beta, mean, var = bn
        scale = gamma * jax.lax.rsqrt(var + EPS)      # per output channel
        shift = (b - mean) * scale + beta
    else:
        scale = jnp.ones((Co,), jnp.float32)
        shift = b
    shift = shift.astype(jnp.float32)

    # OIHW -> HWIO, fold BN scale into output channels, zero-pad channels, one row per tap.
    w = jnp.transpose(weight_oihw, (2, 3, 1, 0)).astype(jnp.float32) * scale
    w = jnp.pad(w, ((0, 0), (0, 0), (0, Cip - Ci), (0, Cop - Co)))
    w = w.reshape(Kk * Kk, Cip, Cop).astype(jnp.bfloat16)            # bf16 MXU operand
    shift_p = jnp.pad(shift, (0, Cop - Co)).reshape(1, Cop)

    th = _pick_row_tile(H, W, Cop)
    Hpad = _round_up(H, th)                                          # no divisor-of-H req.

    # NCHW -> NHWC (bf16); halo pad + bottom row-tile pad + channel pad in one pass.
    x = jnp.transpose(x_nchw.astype(jnp.bfloat16), (0, 2, 3, 1))
    xp = jnp.pad(x, ((0, 0), (pad, pad + (Hpad - H)), (pad, pad), (0, Cip - Ci)))
    Hp, Wp = Hpad + 2 * pad, W + 2 * pad

    grid = (N, Hpad // th)

    # VMEM limit from the actual resident footprint (double-buffered), v7x-safe ceiling.
    img_b = Hp * Wp * Cip * 2
    w_b = Kk * Kk * Cip * Cop * 2
    tile_b = th * W * Cop * 4
    vmem_limit = int(min(max(2 * (img_b + w_b + Cop * 4 + tile_b) + (4 << 20),
                             32 << 20), 64 << 20))

    out = pl.pallas_call(
        functools.partial(_conv_bn_relu_kernel, ksize=Kk, width=W, apply_relu=relu),
        out_shape=jax.ShapeDtypeStruct((N, Hpad * W, Cop), jnp.float32),
        grid=grid,
        in_specs=[
            # Full padded image per batch element; block index constant across row tiles
            # -> stays resident in VMEM, re-DMA'd only when the batch index changes.
            pl.BlockSpec((None, Hp, Wp, Cip), lambda n, r: (n, 0, 0, 0)),
            # Weights / shift: constant index -> fetched once, kept resident.
            pl.BlockSpec((Kk * Kk, Cip, Cop), lambda n, r: (0, 0, 0)),
            pl.BlockSpec((1, Cop), lambda n, r: (0, 0)),
        ],
        # Flat (th*W, Cop) output tile: no in-kernel (th,W,Cop) reshape, lane-dense Cop.
        out_specs=pl.BlockSpec((None, th * W, Cop), lambda n, r: (n, r, 0)),
        compiler_params=pltpu.CompilerParams(
            dimension_semantics=("parallel", "parallel"),
            vmem_limit_bytes=vmem_limit),
    )(xp, w, shift_p)

    out = out.reshape(N, Hpad, W, Cop)[:, :H, :, :Co]   # drop row/channel padding
    return jnp.transpose(out, (0, 3, 1, 2))             # NHWC -> NCHW


# ------------------------- pure-JAX reference -------------------------
def ref_forward(x_nchw, w_oihw, bias=None, bn=None, relu=True):
    k = w_oihw.shape[-1]
    pad = (k - 1) // 2
    y = jax.lax.conv_general_dilated(
        x_nchw, w_oihw, (1, 1), [(pad, pad), (pad, pad)],
        dimension_numbers=("NCHW", "OIHW", "NCHW"))
    if bias is not None:
        y = y + bias.reshape(1, -1, 1, 1)
    if bn is not None:
        g, be, m, v = bn
        y = ((y - m.reshape(1, -1, 1, 1))
             * (g.reshape(1, -1, 1, 1) / jnp.sqrt(v.reshape(1, -1, 1, 1) + EPS))
             + be.reshape(1, -1, 1, 1))
    if relu:
        y = jax.nn.relu(y)
    return y


if __name__ == "__main__":
    key = jax.random.PRNGKey(0)
    N, Ci, H, W = 2, 4, 16, 16
    Co, K = 8, 3
    k1, k2, k3, k4, k5, k6, k7 = jax.random.split(key, 7)

    x = jax.random.normal(k1, (N, Ci, H, W), jnp.float32)
    wgt = jax.random.normal(k2, (Co, Ci, K, K), jnp.float32) * 0.1
    b = jax.random.normal(k3, (Co,), jnp.float32) * 0.05

    # bf16 matmul operands vs f32 reference -> loosened tolerance.
    TOL = 5e-2

    # Config 1: module defaults — Conv(4, 8): conv3x3 + bias + ReLU, no BN.
    out1 = jax.block_until_ready(conv_forward(x, wgt, b, bn=None, relu=True))
    ref1 = ref_forward(x, wgt, b, bn=None, relu=True)
    assert out1.shape == (N, Co, H, W)
    assert jnp.allclose(out1, ref1, atol=TOL, rtol=TOL), "mismatch (relu, no bn)"

    # Config 2: bn=True path (inference-mode folded running stats).
    gamma = 1.0 + 0.1 * jax.random.normal(k4, (Co,), jnp.float32)
    beta = 0.05 * jax.random.normal(k5, (Co,), jnp.float32)
    mean = 0.1 * jax.random.normal(k6, (Co,), jnp.float32)
    var = jax.random.uniform(k7, (Co,), jnp.float32, minval=0.5, maxval=1.5)
    out2 = jax.block_until_ready(
        conv_forward(x, wgt, b, bn=(gamma, beta, mean, var), relu=True))
    ref2 = ref_forward(x, wgt, b, bn=(gamma, beta, mean, var), relu=True)
    assert jnp.allclose(out2, ref2, atol=TOL, rtol=TOL), "mismatch (relu + bn)"

    print("KERNEL_OK")
</pallas_src>

<mosaic_0001>
module attributes {stable_mosaic.version = 11 : i64} {
  func.func @_conv_bn_relu_kernel(%arg0: i32, %arg1: i32, %arg2: memref<1x18x18x16xbf16, #tpu.memory_space<vmem>>, %arg3: memref<9x16x16xbf16, #tpu.memory_space<vmem>>, %arg4: memref<1x16xf32, #tpu.memory_space<vmem>>, %arg5: memref<1x256x16xf32, #tpu.memory_space<vmem>>) attributes {dimension_semantics = [#tpu.dimension_semantics<parallel>, #tpu.dimension_semantics<parallel>], iteration_bounds = array<i64: 2, 1>, scalar_prefetch = 0 : i64, scratch_operands = 0 : i64, tpu.core_type = #tpu.core_type<tc>, window_params = [{transform_indices = @transform_0, window_bounds = array<i64: 1, 18, 18, 16>}, {pipeline_mode = #tpu.pipeline_mode<synchronous>, transform_indices = @transform_1, window_bounds = array<i64: 9, 16, 16>}, {pipeline_mode = #tpu.pipeline_mode<synchronous>, transform_indices = @transform_2, window_bounds = array<i64: 1, 16>}, {transform_indices = @transform_3, window_bounds = array<i64: 1, 256, 16>}]} {
    %c16_i32 = arith.constant 16 : i32
    %0 = arith.muli %arg1, %c16_i32 : i32
    %c0_i32 = arith.constant 0 : i32
    %1 = arith.addi %0, %c0_i32 : i32
    %c0 = arith.constant 0 : index
    %2 = arith.index_cast %1 : i32 to index
    %c0_0 = arith.constant 0 : index
    %c0_1 = arith.constant 0 : index
    %3 = vector.load %arg2[%c0, %2, %c0_0, %c0_1] : memref<1x18x18x16xbf16, #tpu.memory_space<vmem>>, vector<1x16x16x16xbf16>
    %4 = vector.shape_cast %3 : vector<1x16x16x16xbf16> to vector<16x16x16xbf16>
    %5 = vector.shape_cast %4 : vector<16x16x16xbf16> to vector<256x16xbf16>
    %c0_2 = arith.constant 0 : index
    %c0_3 = arith.constant 0 : index
    %c0_4 = arith.constant 0 : index
    %6 = vector.load %arg3[%c0_2, %c0_3, %c0_4] : memref<9x16x16xbf16, #tpu.memory_space<vmem>>, vector<1x16x16xbf16>
    %7 = vector.shape_cast %6 : vector<1x16x16xbf16> to vector<16x16xbf16>
    %cst = arith.constant dense<0.000000e+00> : vector<256x16xf32>
    %8 = tpu.matmul %5, %7, %cst {dimension_numbers = #tpu.dot_dimension_numbers<[1], [0], [0], [1], [0, 0, 1, 1], [], []>} : vector<256x16xbf16>, vector<16x16xbf16>, vector<256x16xf32> -> vector<256x16xf32>
    %c0_5 = arith.constant 0 : index
    %c0_6 = arith.constant 0 : index
    %c0_7 = arith.constant 0 : index
    %9 = vector.load %arg5[%c0_5, %c0_6, %c0_7] : memref<1x256x16xf32, #tpu.memory_space<vmem>>, vector<1x256x16xf32>
    %10 = vector.shape_cast %9 : vector<1x256x16xf32> to vector<256x16xf32>
    %11 = vector.shape_cast %8 : vector<256x16xf32> to vector<1x256x16xf32>
    tpu.vector_store %arg5[%c0_5, %c0_6, %c0_7], %11 {strides = array<i32>} : memref<1x256x16xf32, #tpu.memory_space<vmem>>, vector<1x256x16xf32>,
    %c0_i32_8 = arith.constant 0 : i32
    %12 = arith.addi %0, %c0_i32_8 : i32
    %c0_9 = arith.constant 0 : index
    %13 = arith.index_cast %12 : i32 to index
    %c1 = arith.constant 1 : index
    %c0_10 = arith.constant 0 : index
    %14 = vector.load %arg2[%c0_9, %13, %c1, %c0_10] : memref<1x18x18x16xbf16, #tpu.memory_space<vmem>>, vector<1x16x16x16xbf16>
    %15 = vector.shape_cast %14 : vector<1x16x16x16xbf16> to vector<16x16x16xbf16>
    %16 = vector.shape_cast %15 : vector<16x16x16xbf16> to vector<256x16xbf16>
    %c1_11 = arith.constant 1 : index
    %c0_12 = arith.constant 0 : index
    %c0_13 = arith.constant 0 : index
    %17 = vector.load %arg3[%c1_11, %c0_12, %c0_13] : memref<9x16x16xbf16, #tpu.memory_space<vmem>>, vector<1x16x16xbf16>
    %18 = vector.shape_cast %17 : vector<1x16x16xbf16> to vector<16x16xbf16>
    %cst_14 = arith.constant dense<0.000000e+00> : vector<256x16xf32>
    %19 = tpu.matmul %16, %18, %cst_14 {dimension_numbers = #tpu.dot_dimension_numbers<[1], [0], [0], [1], [0, 0, 1, 1], [], []>} : vector<256x16xbf16>, vector<16x16xbf16>, vector<256x16xf32> -> vector<256x16xf32>
    %c0_15 = arith.constant 0 : index
    %c0_16 = arith.constant 0 : index
    %c0_17 = arith.constant 0 : index
    %20 = vector.load %arg5[%c0_15, %c0_16, %c0_17] : memref<1x256x16xf32, #tpu.memory_space<vmem>>, vector<1x256x16xf32>
    %21 = vector.shape_cast %20 : vector<1x256x16xf32> to vector<256x16xf32>
    %22 = arith.addf %21, %19 : vector<256x16xf32>
    %c0_18 = arith.constant 0 : index
    %c0_19 = arith.constant 0 : index
    %c0_20 = arith.constant 0 : index
    %23 = vector.load %arg5[%c0_18, %c0_19, %c0_20] : memref<1x256x16xf32, #tpu.memory_space<vmem>>, vector<1x256x16xf32>
    %24 = vector.shape_cast %23 : vector<1x256x16xf32> to vector<256x16xf32>
    %25 = vector.shape_cast %22 : vector<256x16xf32> to vector<1x256x16xf32>
    tpu.vector_store %arg5[%c0_18, %c0_19, %c0_20], %25 {strides = array<i32>} : memref<1x256x16xf32, #tpu.memory_space<vmem>>, vector<1x256x16xf32>,
    %c0_i32_21 = arith.constant 0 : i32
    %26 = arith.addi %0, %c0_i32_21 : i32
    %c0_22 = arith.constant 0 : index
    %27 = arith.index_cast %26 : i32 to index
    %c2 = arith.constant 2 : index
    %c0_23 = arith.constant 0 : index
    %28 = vector.load %arg2[%c0_22, %27, %c2, %c0_23] : memref<1x18x18x16xbf16, #tpu.memory_space<vmem>>, vector<1x16x16x16xbf16>
    %29 = vector.shape_cast %28 : vector<1x16x16x16xbf16> to vector<16x16x16xbf16>
    %30 = vector.shape_cast %29 : vector<16x16x16xbf16> to vector<256x16xbf16>
    %c2_24 = arith.constant 2 : index
    %c0_25 = arith.constant 0 : index
    %c0_26 = arith.constant 0 : index
    %31 = vector.load %arg3[%c2_24, %c0_25, %c0_26] : memref<9x16x16xbf16, #tpu.memory_space<vmem>>, vector<1x16x16xbf16>
    %32 = vector.shape_cast %31 : vector<1x16x16xbf16> to vector<16x16xbf16>
    %cst_27 = arith.constant dense<0.000000e+00> : vector<256x16xf32>
    %33 = tpu.matmul %30, %32, %cst_27 {dimension_numbers = #tpu.dot_dimension_numbers<[1], [0], [0], [1], [0, 0, 1, 1], [], []>} : vector<256x16xbf16>, vector<16x16xbf16>, vector<256x16xf32> -> vector<256x16xf32>
    %c0_28 = arith.constant 0 : index
    %c0_29 = arith.constant 0 : index
    %c0_30 = arith.constant 0 : index
    %34 = vector.load %arg5[%c0_28, %c0_29, %c0_30] : memref<1x256x16xf32, #tpu.memory_space<vmem>>, vector<1x256x16xf32>
    %35 = vector.shape_cast %34 : vector<1x256x16xf32> to vector<256x16xf32>
    %36 = arith.addf %35, %33 : vector<256x16xf32>
    %c0_31 = arith.constant 0 : index
    %c0_32 = arith.constant 0 : index
    %c0_33 = arith.constant 0 : index
    %37 = vector.load %arg5[%c0_31, %c0_32, %c0_33] : memref<1x256x16xf32, #tpu.memory_space<vmem>>, vector<1x256x16xf32>
    %38 = vector.shape_cast %37 : vector<1x256x16xf32> to vector<256x16xf32>
    %39 = vector.shape_cast %36 : vector<256x16xf32> to vector<1x256x16xf32>
    tpu.vector_store %arg5[%c0_31, %c0_32, %c0_33], %39 {strides = array<i32>} : memref<1x256x16xf32, #tpu.memory_space<vmem>>, vector<1x256x16xf32>,
    %c1_i32 = arith.constant 1 : i32
    %40 = arith.addi %0, %c1_i32 : i32
    %c0_34 = arith.constant 0 : index
    %41 = arith.index_cast %40 : i32 to index
    %c0_35 = arith.constant 0 : index
    %c0_36 = arith.constant 0 : index
    %42 = vector.load %arg2[%c0_34, %41, %c0_35, %c0_36] : memref<1x18x18x16xbf16, #tpu.memory_space<vmem>>, vector<1x16x16x16xbf16>
    %43 = vector.shape_cast %42 : vector<1x16x16x16xbf16> to vector<16x16x16xbf16>
    %44 = vector.shape_cast %43 : vector<16x16x16xbf16> to vector<256x16xbf16>
    %c3 = arith.constant 3 : index
    %c0_37 = arith.constant 0 : index
    %c0_38 = arith.constant 0 : index
    %45 = vector.load %arg3[%c3, %c0_37, %c0_38] : memref<9x16x16xbf16, #tpu.memory_space<vmem>>, vector<1x16x16xbf16>
    %46 = vector.shape_cast %45 : vector<1x16x16xbf16> to vector<16x16xbf16>
    %cst_39 = arith.constant dense<0.000000e+00> : vector<256x16xf32>
    %47 = tpu.matmul %44, %46, %cst_39 {dimension_numbers = #tpu.dot_dimension_numbers<[1], [0], [0], [1], [0, 0, 1, 1], [], []>} : vector<256x16xbf16>, vector<16x16xbf16>, vector<256x16xf32> -> vector<256x16xf32>
    %c0_40 = arith.constant 0 : index
    %c0_41 = arith.constant 0 : index
    %c0_42 = arith.constant 0 : index
    %48 = vector.load %arg5[%c0_40, %c0_41, %c0_42] : memref<1x256x16xf32, #tpu.memory_space<vmem>>, vector<1x256x16xf32>
    %49 = vector.shape_cast %48 : vector<1x256x16xf32> to vector<256x16xf32>
    %50 = arith.addf %49, %47 : vector<256x16xf32>
    %c0_43 = arith.constant 0 : index
    %c0_44 = arith.constant 0 : index
    %c0_45 = arith.constant 0 : index
    %51 = vector.load %arg5[%c0_43, %c0_44, %c0_45] : memref<1x256x16xf32, #tpu.memory_space<vmem>>, vector<1x256x16xf32>
    %52 = vector.shape_cast %51 : vector<1x256x16xf32> to vector<256x16xf32>
    %53 = vector.shape_cast %50 : vector<256x16xf32> to vector<1x256x16xf32>
    tpu.vector_store %arg5[%c0_43, %c0_44, %c0_45], %53 {strides = array<i32>} : memref<1x256x16xf32, #tpu.memory_space<vmem>>, vector<1x256x16xf32>,
    %c1_i32_46 = arith.constant 1 : i32
    %54 = arith.addi %0, %c1_i32_46 : i32
    %c0_47 = arith.constant 0 : index
    %55 = arith.index_cast %54 : i32 to index
    %c1_48 = arith.constant 1 : index
    %c0_49 = arith.constant 0 : index
    %56 = vector.load %arg2[%c0_47, %55, %c1_48, %c0_49] : memref<1x18x18x16xbf16, #tpu.memory_space<vmem>>, vector<1x16x16x16xbf16>
    %57 = vector.shape_cast %56 : vector<1x16x16x16xbf16> to vector<16x16x16xbf16>
    %58 = vector.shape_cast %57 : vector<16x16x16xbf16> to vector<256x16xbf16>
    %c4 = arith.constant 4 : index
    %c0_50 = arith.constant 0 : index
    %c0_51 = arith.constant 0 : index
    %59 = vector.load %arg3[%c4, %c0_50, %c0_51] : memref<9x16x16xbf16, #tpu.memory_space<vmem>>, vector<1x16x16xbf16>
    %60 = vector.shape_cast %59 : vector<1x16x16xbf16> to vector<16x16xbf16>
    %cst_52 = arith.constant dense<0.000000e+00> : vector<256x16xf32>
    %61 = tpu.matmul %58, %60, %cst_52 {dimension_numbers = #tpu.dot_dimension_numbers<[1], [0], [0], [1], [0, 0, 1, 1], [], []>} : vector<256x16xbf16>, vector<16x16xbf16>, vector<256x16xf32> -> vector<256x16xf32>
    %c0_53 = arith.constant 0 : index
    %c0_54 = arith.constant 0 : index
    %c0_55 = arith.constant 0 : index
    %62 = vector.load %arg5[%c0_53, %c0_54, %c0_55] : memref<1x256x16xf32, #tpu.memory_space<vmem>>, vector<1x256x16xf32>
    %63 = vector.shape_cast %62 : vector<1x256x16xf32> to vector<256x16xf32>
    %64 = arith.addf %63, %61 : vector<256x16xf32>
    %c0_56 = arith.constant 0 : index
    %c0_57 = arith.constant 0 : index
    %c0_58 = arith.constant 0 : index
    %65 = vector.load %arg5[%c0_56, %c0_57, %c0_58] : memref<1x256x16xf32, #tpu.memory_space<vmem>>, vector<1x256x16xf32>
    %66 = vector.shape_cast %65 : vector<1x256x16xf32> to vector<256x16xf32>
    %67 = vector.shape_cast %64 : vector<256x16xf32> to vector<1x256x16xf32>
    tpu.vector_store %arg5[%c0_56, %c0_57, %c0_58], %67 {strides = array<i32>} : memref<1x256x16xf32, #tpu.memory_space<vmem>>, vector<1x256x16xf32>,
    %c1_i32_59 = arith.constant 1 : i32
    %68 = arith.addi %0, %c1_i32_59 : i32
    %c0_60 = arith.constant 0 : index
    %69 = arith.index_cast %68 : i32 to index
    %c2_61 = arith.constant 2 : index
    %c0_62 = arith.constant 0 : index
    %70 = vector.load %arg2[%c0_60, %69, %c2_61, %c0_62] : memref<1x18x18x16xbf16, #tpu.memory_space<vmem>>, vector<1x16x16x16xbf16>
    %71 = vector.shape_cast %70 : vector<1x16x16x16xbf16> to vector<16x16x16xbf16>
    %72 = vector.shape_cast %71 : vector<16x16x16xbf16> to vector<256x16xbf16>
    %c5 = arith.constant 5 : index
    %c0_63 = arith.constant 0 : index
    %c0_64 = arith.constant 0 : index
    %73 = vector.load %arg3[%c5, %c0_63, %c0_64] : memref<9x16x16xbf16, #tpu.memory_space<vmem>>, vector<1x16x16xbf16>
    %74 = vector.shape_cast %73 : vector<1x16x16xbf16> to vector<16x16xbf16>
    %cst_65 = arith.constant dense<0.000000e+00> : vector<256x16xf32>
    %75 = tpu.matmul %72, %74, %cst_65 {dimension_numbers = #tpu.dot_dimension_numbers<[1], [0], [0], [1], [0, 0, 1, 1], [], []>} : vector<256x16xbf16>, vector<16x16xbf16>, vector<256x16xf32> -> vector<256x16xf32>
    %c0_66 = arith.constant 0 : index
    %c0_67 = arith.constant 0 : index
    %c0_68 = arith.constant 0 : index
    %76 = vector.load %arg5[%c0_66, %c0_67, %c0_68] : memref<1x256x16xf32, #tpu.memory_space<vmem>>, vector<1x256x16xf32>
    %77 = vector.shape_cast %76 : vector<1x256x16xf32> to vector<256x16xf32>
    %78 = arith.addf %77, %75 : vector<256x16xf32>
    %c0_69 = arith.constant 0 : index
    %c0_70 = arith.constant 0 : index
    %c0_71 = arith.constant 0 : index
    %79 = vector.load %arg5[%c0_69, %c0_70, %c0_71] : memref<1x256x16xf32, #tpu.memory_space<vmem>>, vector<1x256x16xf32>
    %80 = vector.shape_cast %79 : vector<1x256x16xf32> to vector<256x16xf32>
    %81 = vector.shape_cast %78 : vector<256x16xf32> to vector<1x256x16xf32>
    tpu.vector_store %arg5[%c0_69, %c0_70, %c0_71], %81 {strides = array<i32>} : memref<1x256x16xf32, #tpu.memory_space<vmem>>, vector<1x256x16xf32>,
    %c2_i32 = arith.constant 2 : i32
    %82 = arith.addi %0, %c2_i32 : i32
    %c0_72 = arith.constant 0 : index
    %83 = arith.index_cast %82 : i32 to index
    %c0_73 = arith.constant 0 : index
    %c0_74 = arith.constant 0 : index
    %84 = vector.load %arg2[%c0_72, %83, %c0_73, %c0_74] : memref<1x18x18x16xbf16, #tpu.memory_space<vmem>>, vector<1x16x16x16xbf16>
    %85 = vector.shape_cast %84 : vector<1x16x16x16xbf16> to vector<16x16x16xbf16>
    %86 = vector.shape_cast %85 : vector<16x16x16xbf16> to vector<256x16xbf16>
    %c6 = arith.constant 6 : index
    %c0_75 = arith.constant 0 : index
    %c0_76 = arith.constant 0 : index
    %87 = vector.load %arg3[%c6, %c0_75, %c0_76] : memref<9x16x16xbf16, #tpu.memory_space<vmem>>, vector<1x16x16xbf16>
    %88 = vector.shape_cast %87 : vector<1x16x16xbf16> to vector<16x16xbf16>
    %cst_77 = arith.constant dense<0.000000e+00> : vector<256x16xf32>
    %89 = tpu.matmul %86, %88, %cst_77 {dimension_numbers = #tpu.dot_dimension_numbers<[1], [0], [0], [1], [0, 0, 1, 1], [], []>} : vector<256x16xbf16>, vector<16x16xbf16>, vector<256x16xf32> -> vector<256x16xf32>
    %c0_78 = arith.constant 0 : index
    %c0_79 = arith.constant 0 : index
    %c0_80 = arith.constant 0 : index
    %90 = vector.load %arg5[%c0_78, %c0_79, %c0_80] : memref<1x256x16xf32, #tpu.memory_space<vmem>>, vector<1x256x16xf32>
    %91 = vector.shape_cast %90 : vector<1x256x16xf32> to vector<256x16xf32>
    %92 = arith.addf %91, %89 : vector<256x16xf32>
    %c0_81 = arith.constant 0 : index
    %c0_82 = arith.constant 0 : index
    %c0_83 = arith.constant 0 : index
    %93 = vector.load %arg5[%c0_81, %c0_82, %c0_83] : memref<1x256x16xf32, #tpu.memory_space<vmem>>, vector<1x256x16xf32>
    %94 = vector.shape_cast %93 : vector<1x256x16xf32> to vector<256x16xf32>
    %95 = vector.shape_cast %92 : vector<256x16xf32> to vector<1x256x16xf32>
    tpu.vector_store %arg5[%c0_81, %c0_82, %c0_83], %95 {strides = array<i32>} : memref<1x256x16xf32, #tpu.memory_space<vmem>>, vector<1x256x16xf32>,
    %c2_i32_84 = arith.constant 2 : i32
    %96 = arith.addi %0, %c2_i32_84 : i32
    %c0_85 = arith.constant 0 : index
    %97 = arith.index_cast %96 : i32 to index
    %c1_86 = arith.constant 1 : index
    %c0_87 = arith.constant 0 : index
    %98 = vector.load %arg2[%c0_85, %97, %c1_86, %c0_87] : memref<1x18x18x16xbf16, #tpu.memory_space<vmem>>, vector<1x16x16x16xbf16>
    %99 = vector.shape_cast %98 : vector<1x16x16x16xbf16> to vector<16x16x16xbf16>
    %100 = vector.shape_cast %99 : vector<16x16x16xbf16> to vector<256x16xbf16>
    %c7 = arith.constant 7 : index
    %c0_88 = arith.constant 0 : index
    %c0_89 = arith.constant 0 : index
    %101 = vector.load %arg3[%c7, %c0_88, %c0_89] : memref<9x16x16xbf16, #tpu.memory_space<vmem>>, vector<1x16x16xbf16>
    %102 = vector.shape_cast %101 : vector<1x16x16xbf16> to vector<16x16xbf16>
    %cst_90 = arith.constant dense<0.000000e+00> : vector<256x16xf32>
    %103 = tpu.matmul %100, %102, %cst_90 {dimension_numbers = #tpu.dot_dimension_numbers<[1], [0], [0], [1], [0, 0, 1, 1], [], []>} : vector<256x16xbf16>, vector<16x16xbf16>, vector<256x16xf32> -> vector<256x16xf32>
    %c0_91 = arith.constant 0 : index
    %c0_92 = arith.constant 0 : index
    %c0_93 = arith.constant 0 : index
    %104 = vector.load %arg5[%c0_91, %c0_92, %c0_93] : memref<1x256x16xf32, #tpu.memory_space<vmem>>, vector<1x256x16xf32>
    %105 = vector.shape_cast %104 : vector<1x256x16xf32> to vector<256x16xf32>
    %106 = arith.addf %105, %103 : vector<256x16xf32>
    %c0_94 = arith.constant 0 : index
    %c0_95 = arith.constant 0 : index
    %c0_96 = arith.constant 0 : index
    %107 = vector.load %arg5[%c0_94, %c0_95, %c0_96] : memref<1x256x16xf32, #tpu.memory_space<vmem>>, vector<1x256x16xf32>
    %108 = vector.shape_cast %107 : vector<1x256x16xf32> to vector<256x16xf32>
    %109 = vector.shape_cast %106 : vector<256x16xf32> to vector<1x256x16xf32>
    tpu.vector_store %arg5[%c0_94, %c0_95, %c0_96], %109 {strides = array<i32>} : memref<1x256x16xf32, #tpu.memory_space<vmem>>, vector<1x256x16xf32>,
    %c2_i32_97 = arith.constant 2 : i32
    %110 = arith.addi %0, %c2_i32_97 : i32
    %c0_98 = arith.constant 0 : index
    %111 = arith.index_cast %110 : i32 to index
    %c2_99 = arith.constant 2 : index
    %c0_100 = arith.constant 0 : index
    %112 = vector.load %arg2[%c0_98, %111, %c2_99, %c0_100] : memref<1x18x18x16xbf16, #tpu.memory_space<vmem>>, vector<1x16x16x16xbf16>
    %113 = vector.shape_cast %112 : vector<1x16x16x16xbf16> to vector<16x16x16xbf16>
    %114 = vector.shape_cast %113 : vector<16x16x16xbf16> to vector<256x16xbf16>
    %c8 = arith.constant 8 : index
    %c0_101 = arith.constant 0 : index
    %c0_102 = arith.constant 0 : index
    %115 = vector.load %arg3[%c8, %c0_101, %c0_102] : memref<9x16x16xbf16, #tpu.memory_space<vmem>>, vector<1x16x16xbf16>
    %116 = vector.shape_cast %115 : vector<1x16x16xbf16> to vector<16x16xbf16>
    %cst_103 = arith.constant dense<0.000000e+00> : vector<256x16xf32>
    %117 = tpu.matmul %114, %116, %cst_103 {dimension_numbers = #tpu.dot_dimension_numbers<[1], [0], [0], [1], [0, 0, 1, 1], [], []>} : vector<256x16xbf16>, vector<16x16xbf16>, vector<256x16xf32> -> vector<256x16xf32>
    %c0_104 = arith.constant 0 : index
    %c0_105 = arith.constant 0 : index
    %c0_106 = arith.constant 0 : index
    %118 = vector.load %arg5[%c0_104, %c0_105, %c0_106] : memref<1x256x16xf32, #tpu.memory_space<vmem>>, vector<1x256x16xf32>
    %119 = vector.shape_cast %118 : vector<1x256x16xf32> to vector<256x16xf32>
    %120 = arith.addf %119, %117 : vector<256x16xf32>
    %c0_107 = arith.constant 0 : index
    %c0_108 = arith.constant 0 : index
    %c0_109 = arith.constant 0 : index
    %121 = vector.load %arg5[%c0_107, %c0_108, %c0_109] : memref<1x256x16xf32, #tpu.memory_space<vmem>>, vector<1x256x16xf32>
    %122 = vector.shape_cast %121 : vector<1x256x16xf32> to vector<256x16xf32>
    %123 = vector.shape_cast %120 : vector<256x16xf32> to vector<1x256x16xf32>
    tpu.vector_store %arg5[%c0_107, %c0_108, %c0_109], %123 {strides = array<i32>} : memref<1x256x16xf32, #tpu.memory_space<vmem>>, vector<1x256x16xf32>,
    %c0_110 = arith.constant 0 : index
    %c0_111 = arith.constant 0 : index
    %c0_112 = arith.constant 0 : index
    %124 = vector.load %arg5[%c0_110, %c0_111, %c0_112] : memref<1x256x16xf32, #tpu.memory_space<vmem>>, vector<1x256x16xf32>
    %125 = vector.shape_cast %124 : vector<1x256x16xf32> to vector<256x16xf32>
    %c0_113 = arith.constant 0 : index
    %c0_114 = arith.constant 0 : index
    %126 = vector.load %arg4[%c0_113, %c0_114] : memref<1x16xf32, #tpu.memory_space<vmem>>, vector<1x16xf32>
    %127 = vector.broadcast %126 : vector<1x16xf32> to vector<256x16xf32>
    %128 = arith.addf %125, %127 : vector<256x16xf32>
    %cst_115 = arith.constant 0.000000e+00 : f32
    %129 = vector.broadcast %cst_115 : f32 to vector<256x16xf32>
    %130 = arith.maximumf %128, %129 : vector<256x16xf32>
    %c0_116 = arith.constant 0 : index
    %c0_117 = arith.constant 0 : index
    %c0_118 = arith.constant 0 : index
    %131 = vector.load %arg5[%c0_116, %c0_117, %c0_118] : memref<1x256x16xf32, #tpu.memory_space<vmem>>, vector<1x256x16xf32>
    %132 = vector.shape_cast %131 : vector<1x256x16xf32> to vector<256x16xf32>
    %133 = vector.shape_cast %130 : vector<256x16xf32> to vector<1x256x16xf32>
    tpu.vector_store %arg5[%c0_116, %c0_117, %c0_118], %133 {strides = array<i32>} : memref<1x256x16xf32, #tpu.memory_space<vmem>>, vector<1x256x16xf32>,
    return
  }
  func.func @transform_0(%arg0: i32, %arg1: i32) -> (i32, i32, i32, i32) {
    %c0_i32 = arith.constant 0 : i32
    %c0_i32_0 = arith.constant 0 : i32
    %c0_i32_1 = arith.constant 0 : i32
    %c0_i32_2 = arith.constant 0 : i32
    return %arg0, %c0_i32, %c0_i32_0, %c0_i32_1 : i32, i32, i32, i32
  }
  func.func @transform_1(%arg0: i32, %arg1: i32) -> (i32, i32, i32) {
    %c0_i32 = arith.constant 0 : i32
    %c0_i32_0 = arith.constant 0 : i32
    %c0_i32_1 = arith.constant 0 : i32
    %c0_i32_2 = arith.constant 0 : i32
    return %c0_i32, %c0_i32_0, %c0_i32_1 : i32, i32, i32
  }
  func.func @transform_2(%arg0: i32, %arg1: i32) -> (i32, i32) {
    %c0_i32 = arith.constant 0 : i32
    %c0_i32_0 = arith.constant 0 : i32
    %c0_i32_1 = arith.constant 0 : i32
    return %c0_i32, %c0_i32_0 : i32, i32
  }
  func.func @transform_3(%arg0: i32, %arg1: i32) -> (i32, i32, i32) {
    %c0_i32 = arith.constant 0 : i32
    %c0_i32_0 = arith.constant 0 : i32
    return %arg0, %arg1, %c0_i32 : i32, i32, i32
  }
}

</mosaic_0001>

<bundles_post_ra>
// kernel: tpu_custom_call.1
= control target key start
LH: loop header
LB: loop body
LE: loop exit
PB: predicated region body
PF: predicated region fallthrough
CT: control target
= control target key end

     0   :  { %s6963_s12 = smov 0   ;;  %s6965_s13 = smov 0   ;;  %s9149_s0 = inlined_call_operand.vmem [shape: bf16[2,18,18,16], index: 0, kind: input, shape index: {}]   ;;  %s9150_s1 = inlined_call_operand.vmem [shape: bf16[9,16,16], index: 1, kind: input, shape index: {}]   ;;  %s9151_s2 = inlined_call_operand.vmem [shape: f32[1,16], index: 2, kind: input, shape index: {}]   ;;  %s9152_s3 = inlined_call_operand.vmem [shape: f32[2,256,16], index: 3, kind: output, shape index: {}]  }
   0x1   :  { %s6967_s14 = smov 0  }
   0x2 LB: > { %s25_s15 = sadd.s32 1, %s6937_s13  ;;  %p5749_p0 = scmp.ge.s32.totalorder %s6941_s14, 1  ;;  %s6941_s14 = sphi %s6967_s14, %s13_s14   ;;  %s6937_s13 = sphi %s6965_s13, %s9158_s13   ;;  %s6933_s12 = sphi %s6963_s12, %s9157_s12  }
   0x3   : > { %p27_p1 = scmp.ge.s32.totalorder %s25_s15, 2  ;;  %p151_p2 = scmp.lt.s32.totalorder %s6941_s14, 3 }
   0x5   : > { %s9160_s15 = smov (%p27_p1, %s25_s15), 0  ;;  %p152_p3 = pnand %p5749_p0, %p151_p2 }
   0x6   : > { %v6860_v0 = vld [vmem:[%s9150_s1] sm:$0xff] (!%p152_p3)   ;;  %p179_p4 = scmp.lt.s32.totalorder (!%p152_p3), %s6933_s12, 1  ;;  %v6862_v1 = vld [vmem:[%s9150_s1 + $0x8] sm:$0xff] (!%p152_p3)   ;;  %v6868_v2 = vld [vmem:[%s9150_s1 + $0x10] sm:$0xff] (!%p152_p3)   ;;  %vm319_vm0 = vcmask (!%p152_p3), 130048   ;;  %vm1454_vm3 = vcmask (!%p152_p3), 1042432  }
   0x7   : > { %155 = sbr.rel (%p152_p3) target bundleno = 572 (0x23c), region = 32  ;;  %6833 = vmatprep.subr.bf16.mxu1 (!%p152_p3), %v6860_v0  ;;  %6527 = vmatprep.subr.bf16.mxu0 (!%p152_p3), %v6860_v0  ;;  %v7001_v3 = vld [vmem:[%s9150_s1 + $0x18] sm:$0xff] (!%p152_p3)   ;;  %v7008_v6 = vld [vmem:[%s9150_s1 + $0x20] sm:$0xff] (!%p152_p3)   ;;  %vm609_vm1 = vsmask.f32 (!%p152_p3), 3328  ;;  %vm1455_vm4 = vcmask (!%p152_p3), 1046532  }
   0x8   : > { %6834 = vmatpush3.bf16.msra.mxu1 (!%p152_p3), %v6860_v0  ;;  %6528 = vmatpush3.bf16.msra.mxu0 (!%p152_p3), %v6860_v0  ;;  %vm610_vm2 = vsmask.f32 (!%p152_p3), 7440  ;;  %vm7048_vm5 = vmor (!%p152_p3), %vm1454_vm3, %vm1455_vm4 }
   0x9   : > { %6561 = vmatprep.subr.bf16.mxu1 (!%p152_p3), %v6862_v1  ;;  %6595 = vmatprep.subr.bf16.mxu0 (!%p152_p3), %v6868_v2  ;;  %vm7055_vm6 = vmor (!%p152_p3), %vm609_vm1, %vm610_vm2 }
   0xe   : > { %s9162_s12 = smov (!%p179_p4, %s6933_s12), 1 }
   0xf   : > { %s6835_s22 = smul.u32 216, %s9162_s12  ;;  %s6373_s19 = sshll.u32 %s9162_s12, 8 }
  0x10   : > { %s7711_s21 = scalar_lea.vmem %s9152_s3, %s6373_s19 }
  0x11   : > { %s6996_s25 = scalar_lea.vmem %s9149_s0, %s6835_s22 }
  0x12   : > { %v6861_v4 = vld [vmem:[%s6996_s25 + $0x60] sm:$0xff]   ;;  %v6863_v5 = vld [vmem:[%s6996_s25 + $0x6c] sm:$0xff]   ;;  %v6866_v9 = vld [vmem:[%s6996_s25 + $0x78] sm:$0xff]  }
  0x13   : > { %6545 = vmatprep.mubr.msk.bf16.mxu1 %vm319_vm0, %v6861_v4  ;;  %v6864_v7 = vld [vmem:[%s6996_s25] sm:$0xff]   ;;  %v6865_v8 = vld [vmem:[%s6996_s25 + $0xc] sm:$0xff]   ;;  %v6869_v10 = vld [vmem:[%s6996_s25 + $0x18] sm:$0xff]  }
  0x14   : > { %6546 = vmatmul.mubr.msk.bf16.vlgmr.msra.gmra.mrb[0].mxu1 %vm319_vm0, %v6863_v5  ;;  %6529 = vmatprep.mubr.msk.bf16.mxu0 %vm319_vm0, %v6864_v7  ;;  %v6867_v11 = vld [vmem:[%s6996_s25 + $0x84] sm:$0xff]   ;;  %v6871_v12 = vld [vmem:[%s6996_s25 + $0x90] sm:$0xff]   ;;  %v6872_v15 = vld [vmem:[%s6996_s25 + $0x9c] sm:$0xff]  }
  0x15   : > { %6562 = vmatpush3.bf16.msra.mxu1 %v6862_v1  ;;  %6530 = vmatmul.mubr.msk.bf16.vlgmr.msra.gmra.mrb[0].mxu0 %vm319_vm0, %v6865_v8  ;;  %v6870_v13 = vld [vmem:[%s6996_s25 + $0x24] sm:$0xff]   ;;  %v6873_v14 = vld [vmem:[%s6996_s25 + $0x30] sm:$0xff]   ;;  %v6874_v16 = vld [vmem:[%s6996_s25 + $0x3c] sm:$0xff]  }
  0x16   : > { %6629 = vmatprep.subr.bf16.mxu1 %v7001_v3  ;;  %6549 = vmatprep.mubr.msk.bf16.mxu1 %vm319_vm0, %v6866_v9  ;;  %v6875_v17 = vld [vmem:[%s6996_s25 + $0xa8] sm:$0xff]   ;;  %v561_v19 = vld [vmem:[%s6996_s25] sm:$0xf]  ;;  %v562_v20 = vld [vmem:[%s6996_s25 + $0x4] sm:$0xf] }
  0x17   : > { %6596 = vmatpush3.bf16.msra.mxu0 %v6868_v2  ;;  %6533 = vmatprep.mubr.msk.bf16.mxu0 %vm319_vm0, %v6869_v10  ;;  %v6877_v18 = vld [vmem:[%s6996_s25 + $0x48] sm:$0xff]   ;;  %v613_v22 = vshrl.u32 %v561_v19, 16  ;;  %v616_v23 = vshll.u32 %v561_v19, 16  ;;  %v622_v24 = vshll.u32 %v562_v20, 16  ;;  %v626_v25 = vshrl.u32 %v562_v20, 16  ;;  %v6876_v53 = vld [vmem:[%s6996_s25 + $0xb4] sm:$0xff]  }
  0x18   : > { %6663 = vmatprep.subr.bf16.mxu0 %v7008_v6  ;;  %v563_v21 = vld [vmem:[%s6996_s25 + $0x8] sm:$0x1]  ;;  %v564_v26 = vld [vmem:[%s6996_s25 + $0xc] sm:$0xf]  ;;  %v565_v28 = vld [vmem:[%s6996_s25 + $0x10] sm:$0xf] }
  0x19   : > { %v632_v27 = vshll.u32 %v563_v21, 16  ;;  %v566_v29 = vld [vmem:[%s6996_s25 + $0x14] sm:$0x1]  ;;  %v637_v30 = vshrl.u32 %v564_v26, 16  ;;  %v615_v31 = vrot.slane %v613_v22, 4  ;;  %v618_v32 = vrot.slane %v616_v23, 5 }
  0x1a   : > { %v624_v33 = vrot.slane %v622_v24, 5  ;;  %v628_v34 = vrot.slane %v626_v25, 4  ;;  %v1358_v35 = vld [vmem:[%s6996_s25] sm:$0xe]  ;;  %v640_v38 = vshll.u32 %v564_v26, 16  ;;  %v646_v39 = vshll.u32 %v565_v28, 16 }
  0x1b   : > { %v634_v36 = vrot.slane %v632_v27, 5  ;;  %v639_v37 = vrot.slane %v637_v30, 4  ;;  %v1359_v40 = vld [vmem:[%s6996_s25 + $0x4] sm:$0xf]  ;;  %v619_v41 = vor.u32 %v618_v32, %v615_v31  ;;  %v650_v43 = vshrl.u32 %v565_v28, 16  ;;  %v6878_v63 = vld [vmem:[%s6996_s25 + $0x54] sm:$0xff]  }
  0x1c   : > { %6550 = vmatmul.mubr.msk.bf16.gmra.mrb[4].mxu1 %vm319_vm0, %v6867_v11  ;;  %v629_v42 = vor.u32 %v628_v34, %v624_v33  ;;  %v656_v44 = vshll.u32 %v566_v29, 16  ;;  %v1360_v45 = vld [vmem:[%s6996_s25 + $0x8] sm:$0x1]  ;;  %v642_v48 = vrot.slane %v640_v38, 5  ;;  %v648_v49 = vrot.slane %v646_v39, 5 }
  0x1d   : > { %6553 = vmatprep.mubr.msk.bf16.mxu1 %vm319_vm0, %v6871_v12  ;;  %6534 = vmatmul.mubr.msk.bf16.gmra.mrb[4].mxu0 %vm319_vm0, %v6870_v13  ;;  %v5821_v50 = vrot.slane %v1358_v35, 9  ;;  %v1459_v51 = vrot.slane %v1359_v40, 5  ;;  %v567_v52 = vld [vmem:[%s6996_s25 + $0x18] sm:$0xf]  ;;  %v620_v54 = vrot.slane %v619_v41, 4  ;;  %v652_v56 = vrot.slane %v650_v43, 4 }
  0x1e   : > { %6537 = vmatprep.mubr.msk.bf16.mxu0 %vm319_vm0, %v6873_v14  ;;  %v630_v55 = vrot.slane %v629_v42, 4  ;;  %v658_v57 = vrot.slane %v656_v44, 5  ;;  %v643_v58 = vor.u32 %v642_v48, %v639_v37  ;;  %v1462_v61 = vrot.slane %v1360_v45, 5  ;;  %v568_v62 = vld [vmem:[%s6996_s25 + $0x1c] sm:$0xf] }
  0x1f   : > { %v1460_v59 = vsel %vm7048_vm5, %v5821_v50, %v1459_v51  ;;  %v1461_v60 = vrot.slane %v1459_v51, 4  ;;  %v625_v0 = vsel %vm7055_vm6, %v620_v54, %v624_v33  ;;  %v653_v2 = vor.u32 %v652_v56, %v648_v49  ;;  %v569_v4 = vld [vmem:[%s6996_s25 + $0x20] sm:$0x1]  ;;  %v1361_v11 = vld [vmem:[%s6996_s25 + $0xc] sm:$0xe] }
  0x20   : > { %v635_v1 = vsel %vm7055_vm6, %v630_v55, %v634_v36  ;;  %v661_v5 = vshrl.u32 %v567_v52, 16  ;;  %v644_v8 = vrot.slane %v643_v58, 4  ;;  %v664_v10 = vshll.u32 %v567_v52, 16  ;;  %v1362_v12 = vld [vmem:[%s6996_s25 + $0x10] sm:$0xf]  ;;  %v6882_v50 = vld [vmem:[%s9150_s1 + $0x28] sm:$0xff]  }
  0x21   : > { %v5788_v7 = vcombine.low %v625_v0, %v635_v1  ;;  %v1463_v9 = vsel %vm7048_vm5, %v1461_v60, %v1462_v61  ;;  %v654_v13 = vrot.slane %v653_v2, 4  ;;  %v674_v20 = vshrl.u32 %v568_v62, 16  ;;  %v570_v22 = vld [vmem:[%s6996_s25 + $0x24] sm:$0xf]  ;;  %v571_v27 = vld [vmem:[%s6996_s25 + $0x28] sm:$0xf] }
  0x22   : > { %v5839_v14 = vcombine.low %v1460_v59, %v1463_v9  ;;  %v666_v19 = vrot.slane %v664_v10, 5  ;;  %v680_v21 = vshll.u32 %v569_v4, 16  ;;  %v5822_v25 = vrot.slane %v1361_v11, 9  ;;  %v572_v32 = vld [vmem:[%s6996_s25 + $0x2c] sm:$0x1]  ;;  %v6886_v61 = vld [vmem:[%s9150_s1 + $0x30] sm:$0xff]  }
  0x23   : > { %v659_v23 = vsel %vm7055_vm6, %v654_v13, %v658_v57  ;;  %v1466_v26 = vrot.slane %v1362_v12, 5  ;;  %v676_v30 = vrot.slane %v674_v20, 4  ;;  %v685_v36 = vshrl.u32 %v570_v22, 16  ;;  %v1364_v37 = vld [vmem:[%s6996_s25 + $0x18] sm:$0xe] }
  0x24   : > { %6554 = vmatmul.mubr.msk.bf16.gmra.mrb[8].mxu1 %vm319_vm0, %v6872_v15  ;;  %v663_v15 = vrot.slane %v661_v5, 4  ;;  %v682_v31 = vrot.slane %v680_v21, 5  ;;  %v688_v40 = vshll.u32 %v570_v22, 16  ;;  %v694_v41 = vshll.u32 %v571_v27, 16  ;;  %v1365_v42 = vld [vmem:[%s6996_s25 + $0x1c] sm:$0xf] }
  0x25   : > { %6557 = vmatprep.mubr.msk.bf16.mxu1 %vm319_vm0, %v6875_v17  ;;  %6538 = vmatmul.mubr.msk.bf16.gmra.mrb[8].mxu0 %vm319_vm0, %v6874_v16  ;;  %v670_v16 = vshll.u32 %v568_v62, 16  ;;  %v1363_v17 = vld [vmem:[%s6996_s25 + $0x14] sm:$0x1]  ;;  %v1467_v33 = vsel %vm7048_vm5, %v5822_v25, %v1466_v26  ;;  %v1468_v34 = vrot.slane %v1466_v26, 4  ;;  %v687_v44 = vrot.slane %v685_v36, 4 }
  0x26   : > { %6541 = vmatprep.mubr.msk.bf16.mxu0 %vm319_vm0, %v6877_v18  ;;  %v649_v18 = vsel %vm7055_vm6, %v644_v8, %v648_v49  ;;  %v667_v29 = vor.u32 %v666_v19, %v663_v15  ;;  %v1469_v35 = vrot.slane %v1363_v17, 5  ;;  %v698_v45 = vshrl.u32 %v571_v27, 16  ;;  %v1366_v49 = vld [vmem:[%s6996_s25 + $0x20] sm:$0x1]  ;;  %v573_v55 = vld [vmem:[%s6996_s25 + $0x30] sm:$0xf] }
  0x27   : > { %v672_v24 = vrot.slane %v670_v16, 5  ;;  %v5789_v28 = vcombine.low %v649_v18, %v659_v23  ;;  %v704_v48 = vshll.u32 %v572_v32, 16  ;;  %v690_v54 = vrot.slane %v688_v40, 5  ;;  %v574_v56 = vld [vmem:[%s6996_s25 + $0x34] sm:$0xf] }
  0x28   : > { %v668_v38 = vrot.slane %v667_v29, 4  ;;  %v1470_v43 = vsel %vm7048_vm5, %v1468_v34, %v1469_v35  ;;  %v696_v57 = vrot.slane %v694_v41, 5  ;;  %v700_v58 = vrot.slane %v698_v45, 4  ;;  %v575_v5 = vld [vmem:[%s6996_s25 + $0x38] sm:$0x1] }
  0x29   : > { %v677_v39 = vor.u32 %v676_v30, %v672_v24  ;;  %v706_v59 = vrot.slane %v704_v48, 5  ;;  %v5823_v60 = vrot.slane %v1364_v37, 9  ;;  %v1473_v0 = vrot.slane %v1365_v42, 5  ;;  %v1367_v12 = vld [vmem:[%s6996_s25 + $0x24] sm:$0xe] }
  0x2a   : > { %v673_v51 = vsel %vm7055_vm6, %v668_v38, %v672_v24  ;;  %v1476_v1 = vrot.slane %v1366_v49, 5  ;;  %v701_v4 = vor.u32 %v700_v58, %v696_v57  ;;  %v712_v8 = vshll.u32 %v573_v55, 16  ;;  %v1368_v17 = vld [vmem:[%s6996_s25 + $0x28] sm:$0xf]  ;;  %v1369_v21 = vld [vmem:[%s6996_s25 + $0x2c] sm:$0x1] }
  0x2b   : > { %v678_v52 = vrot.slane %v677_v39, 4  ;;  %v1475_v10 = vrot.slane %v1473_v0, 4  ;;  %v718_v11 = vshll.u32 %v574_v56, 16  ;;  %v722_v16 = vshrl.u32 %v574_v56, 16  ;;  %v576_v22 = vld [vmem:[%s6996_s25 + $0x3c] sm:$0xf] }
  0x2c   : > { %6558 = vmatmul.mubr.msk.bf16.gmra.mrb[12].mxu1 %vm319_vm0, %v6876_v53  ;;  %v5840_v53 = vcombine.low %v1467_v33, %v1470_v43  ;;  %v702_v13 = vrot.slane %v701_v4, 4  ;;  %v714_v15 = vrot.slane %v712_v8, 5  ;;  %v728_v20 = vshll.u32 %v575_v5, 16  ;;  %v577_v27 = vld [vmem:[%s6996_s25 + $0x40] sm:$0xf] }
  0x2d   : > { %6563 = vmatprep.mubr.msk.bf16.mxu1 %vm319_vm0, %v5788_v7  ;;  %6542 = vmatmul.mubr.msk.bf16.gmra.mrb[12].mxu0 %vm319_vm0, %v6878_v63  ;;  %v683_v62 = vsel %vm7055_vm6, %v678_v52, %v682_v31  ;;  %v691_v63 = vor.u32 %v690_v54, %v687_v44  ;;  %v709_v7 = vshrl.u32 %v573_v55, 16  ;;  %v1477_v18 = vsel %vm7048_vm5, %v1475_v10, %v1476_v1  ;;  %v578_v32 = vld [vmem:[%s6996_s25 + $0x44] sm:$0x1]  ;;  %v1370_v37 = vld [vmem:[%s6996_s25 + $0x30] sm:$0xe] }
  0x2e   : > { %6597 = vmatprep.mubr.msk.bf16.mxu0 %vm319_vm0, %v5839_v14  ;;  %v5790_v2 = vcombine.low %v673_v51, %v683_v62  ;;  %v720_v19 = vrot.slane %v718_v11, 5  ;;  %v707_v23 = vsel %vm7055_vm6, %v702_v13, %v706_v59  ;;  %v724_v26 = vrot.slane %v722_v16, 4  ;;  %v1371_v42 = vld [vmem:[%s6996_s25 + $0x34] sm:$0xf]  ;;  %v1372_v49 = vld [vmem:[%s6996_s25 + $0x38] sm:$0x1] }
  0x2f   : > { %v692_v9 = vrot.slane %v691_v63, 4  ;;  %v711_v14 = vrot.slane %v709_v7, 4  ;;  %v730_v29 = vrot.slane %v728_v20, 5  ;;  %v5824_v30 = vrot.slane %v1367_v12, 9  ;;  %v579_v54 = vld [vmem:[%s6996_s25 + $0x48] sm:$0xf] }
  0x30   : > { %v1480_v31 = vrot.slane %v1368_v17, 5  ;;  %v725_v34 = vor.u32 %v724_v26, %v720_v19  ;;  %v1483_v35 = vrot.slane %v1369_v21, 5  ;;  %v733_v36 = vshrl.u32 %v576_v22, 16  ;;  %v580_v59 = vld [vmem:[%s6996_s25 + $0x4c] sm:$0xf] }
  0x31   : > { %v715_v25 = vor.u32 %v714_v15, %v711_v14  ;;  %v736_v40 = vshll.u32 %v576_v22, 16  ;;  %v742_v41 = vshll.u32 %v577_v27, 16  ;;  %v746_v48 = vshrl.u32 %v577_v27, 16  ;;  %v1373_v10 = vld [vmem:[%s6996_s25 + $0x3c] sm:$0xe] }
  0x32   : > { %v1481_v38 = vsel %vm7048_vm5, %v5824_v30, %v1480_v31  ;;  %v1482_v39 = vrot.slane %v1480_v31, 4  ;;  %v726_v44 = vrot.slane %v725_v34, 4  ;;  %v735_v45 = vrot.slane %v733_v36, 4  ;;  %v1374_v15 = vld [vmem:[%s6996_s25 + $0x40] sm:$0xf] }
  0x33   : > { %v716_v33 = vrot.slane %v715_v25, 4  ;;  %v738_v51 = vrot.slane %v736_v40, 5  ;;  %v744_v52 = vrot.slane %v742_v41, 5  ;;  %v5825_v58 = vrot.slane %v1370_v37, 9  ;;  %v582_v20 = vld [vmem:[%s6996_s25 + $0x54] sm:$0xf] }
  0x34   : > { %6564 = vmatmul.mubr.msk.bf16.vlgmr.msra.gmra.mrb[16].mxu1 %vm319_vm0, %v5789_v28  ;;  %v731_v55 = vsel %vm7055_vm6, %v726_v44, %v730_v29  ;;  %v1487_v63 = vrot.slane %v1371_v42, 5  ;;  %v1490_v1 = vrot.slane %v1372_v49, 5  ;;  %v757_v4 = vshrl.u32 %v579_v54, 16  ;;  %v583_v25 = vld [vmem:[%s6996_s25 + $0x58] sm:$0xf] }
  0x35   : > { %6630 = vmatpush3.bf16.msra.mxu1 %v7001_v3  ;;  %6598 = vmatmul.mubr.msk.bf16.vlgmr.msra.gmra.mrb[16].mxu0 %vm319_vm0, %v5840_v53  ;;  %v1474_v3 = vsel %vm7048_vm5, %v5823_v60, %v1473_v0  ;;  %v721_v43 = vsel %vm7055_vm6, %v716_v33, %v720_v19  ;;  %v752_v53 = vshll.u32 %v578_v32, 16  ;;  %v760_v5 = vshll.u32 %v579_v54, 16  ;;  %v1375_v19 = vld [vmem:[%s6996_s25 + $0x44] sm:$0x1]  ;;  %v584_v30 = vld [vmem:[%s6996_s25 + $0x5c] sm:$0x1] }
  0x36   : > { %6697 = vmatprep.subr.bf16.mxu1 %v6882_v50  ;;  %6664 = vmatpush3.bf16.msra.mxu0 %v7008_v6  ;;  %v697_v6 = vsel %vm7055_vm6, %v692_v9, %v696_v57  ;;  %v5841_v24 = vcombine.low %v1474_v3, %v1477_v18  ;;  %v1484_v50 = vsel %vm7048_vm5, %v1482_v39, %v1483_v35  ;;  %v748_v57 = vrot.slane %v746_v48, 4  ;;  %v1376_v35 = vld [vmem:[%s6996_s25 + $0x48] sm:$0xe]  ;;  %v1377_v40 = vld [vmem:[%s6996_s25 + $0x4c] sm:$0xf] }
  0x37   : > { %6567 = vmatprep.mubr.msk.bf16.mxu1 %vm319_vm0, %v5790_v2  ;;  %6731 = vmatprep.subr.bf16.mxu0 %v6886_v61  ;;  %v5791_v28 = vcombine.low %v697_v6, %v707_v23  ;;  %v5842_v56 = vcombine.low %v1481_v38, %v1484_v50  ;;  %v5792_v60 = vcombine.low %v721_v43, %v731_v55  ;;  %v754_v62 = vrot.slane %v752_v53, 5  ;;  %v581_v2 = vld [vmem:[%s6996_s25 + $0x50] sm:$0x1] }
  0x38   : > { %6601 = vmatprep.mubr.msk.bf16.mxu0 %vm319_vm0, %v5841_v24  ;;  %v739_v61 = vor.u32 %v738_v51, %v735_v45  ;;  %v749_v0 = vor.u32 %v748_v57, %v744_v52  ;;  %v1488_v8 = vsel %vm7048_vm5, %v5825_v58, %v1487_v63  ;;  %v1489_v9 = vrot.slane %v1487_v63, 4  ;;  %v1378_v45 = vld [vmem:[%s6996_s25 + $0x50] sm:$0x1]  ;;  %v586_v57 = vld [vmem:[%s6996_s25 + $0x64] sm:$0xf] }
  0x39   : > { %v766_v3 = vshll.u32 %v580_v59, 16  ;;  %v759_v12 = vrot.slane %v757_v4, 4  ;;  %v762_v13 = vrot.slane %v760_v5, 5  ;;  %v770_v14 = vshrl.u32 %v580_v59, 16 }
  0x3a   : > { %v740_v7 = vrot.slane %v739_v61, 4  ;;  %v750_v11 = vrot.slane %v749_v0, 4  ;;  %v1491_v17 = vsel %vm7048_vm5, %v1489_v9, %v1490_v1  ;;  %v776_v18 = vshll.u32 %v581_v2, 16  ;;  %v587_v0 = vld [vmem:[%s6996_s25 + $0x68] sm:$0x1] }
  0x3b   : > { %v768_v6 = vrot.slane %v766_v3, 5  ;;  %v5843_v22 = vcombine.low %v1488_v8, %v1491_v17  ;;  %v763_v23 = vor.u32 %v762_v13, %v759_v12  ;;  %v772_v24 = vrot.slane %v770_v14, 4  ;;  %v1379_v9 = vld [vmem:[%s6996_s25 + $0x54] sm:$0xe]  ;;  %v1380_v13 = vld [vmem:[%s6996_s25 + $0x58] sm:$0xf] }
  0x3c   : > { %6568 = vmatmul.mubr.msk.bf16.gmra.mrb[20].mxu1 %vm319_vm0, %v5791_v28  ;;  %v745_v16 = vsel %vm7055_vm6, %v740_v7, %v744_v52  ;;  %v755_v21 = vsel %vm7055_vm6, %v750_v11, %v754_v62  ;;  %v778_v27 = vrot.slane %v776_v18, 5  ;;  %v5826_v28 = vrot.slane %v1373_v10, 9  ;;  %v585_v52 = vld [vmem:[%s6996_s25 + $0x60] sm:$0xf]  ;;  %v588_v18 = vld [vmem:[%s6996_s25 + $0x6c] sm:$0xf] }
  0x3d   : > { %6602 = vmatmul.mubr.msk.bf16.gmra.mrb[20].mxu0 %vm319_vm0, %v5842_v56  ;;  %6571 = vmatprep.mubr.msk.bf16.mxu1 %vm319_vm0, %v5792_v60  ;;  %v5793_v26 = vcombine.low %v745_v16, %v755_v21  ;;  %v1494_v29 = vrot.slane %v1374_v15, 5  ;;  %v764_v31 = vrot.slane %v763_v23, 4  ;;  %v773_v32 = vor.u32 %v772_v24, %v768_v6  ;;  %v589_v23 = vld [vmem:[%s6996_s25 + $0x70] sm:$0xf] }
  0x3e   : > { %6605 = vmatprep.mubr.msk.bf16.mxu0 %vm319_vm0, %v5843_v22  ;;  %v1497_v33 = vrot.slane %v1375_v19, 5  ;;  %v781_v34 = vshrl.u32 %v582_v20, 16  ;;  %v784_v38 = vshll.u32 %v582_v20, 16  ;;  %v790_v39 = vshll.u32 %v583_v25, 16 }
  0x3f   : > { %v1495_v36 = vsel %vm7048_vm5, %v5826_v28, %v1494_v29  ;;  %v1496_v37 = vrot.slane %v1494_v29, 4  ;;  %v769_v41 = vsel %vm7055_vm6, %v764_v31, %v768_v6  ;;  %v774_v42 = vrot.slane %v773_v32, 4  ;;  %v1381_v6 = vld [vmem:[%s6996_s25 + $0x5c] sm:$0x1]  ;;  %v590_v28 = vld [vmem:[%s6996_s25 + $0x74] sm:$0x1] }
  0x40   : > { %v783_v43 = vrot.slane %v781_v34, 4  ;;  %v794_v44 = vshrl.u32 %v583_v25, 16  ;;  %v786_v49 = vrot.slane %v784_v38, 5  ;;  %v792_v50 = vrot.slane %v790_v39, 5  ;;  %v1383_v38 = vld [vmem:[%s6996_s25 + $0x64] sm:$0xf] }
  0x41   : > { %v1498_v48 = vsel %vm7048_vm5, %v1496_v37, %v1497_v33  ;;  %v800_v51 = vshll.u32 %v584_v30, 16  ;;  %v779_v53 = vsel %vm7055_vm6, %v774_v42, %v778_v27  ;;  %v5827_v56 = vrot.slane %v1376_v35, 9  ;;  %v1382_v33 = vld [vmem:[%s6996_s25 + $0x60] sm:$0xe] }
  0x42   : > { %v5844_v54 = vcombine.low %v1495_v36, %v1498_v48  ;;  %v796_v55 = vrot.slane %v794_v44, 4  ;;  %v5794_v58 = vcombine.low %v769_v41, %v779_v53  ;;  %v787_v59 = vor.u32 %v786_v49, %v783_v43  ;;  %v1384_v43 = vld [vmem:[%s6996_s25 + $0x68] sm:$0x1] }
  0x43   : > { %v802_v60 = vrot.slane %v800_v51, 5  ;;  %v1501_v61 = vrot.slane %v1377_v40, 5  ;;  %v1504_v63 = vrot.slane %v1378_v45, 5  ;;  %v805_v1 = vshrl.u32 %v585_v52, 16 }
  0x44   : > { %6572 = vmatmul.mubr.msk.bf16.gmra.mrb[24].mxu1 %vm319_vm0, %v5793_v26  ;;  %v797_v62 = vor.u32 %v796_v55, %v792_v50  ;;  %v808_v2 = vshll.u32 %v585_v52, 16  ;;  %v788_v4 = vrot.slane %v787_v59, 4  ;;  %v814_v8 = vshll.u32 %v586_v57, 16  ;;  %v592_v55 = vld [vmem:[%s6996_s25 + $0x7c] sm:$0xf] }
  0x45   : > { %6606 = vmatmul.mubr.msk.bf16.gmra.mrb[24].mxu0 %vm319_vm0, %v5844_v54  ;;  %6575 = vmatprep.mubr.msk.bf16.mxu1 %vm319_vm0, %v5794_v58  ;;  %v1502_v5 = vsel %vm7048_vm5, %v5827_v56, %v1501_v61  ;;  %v1503_v7 = vrot.slane %v1501_v61, 4  ;;  %v807_v10 = vrot.slane %v805_v1, 4  ;;  %v818_v12 = vshrl.u32 %v586_v57, 16 }
  0x46   : > { %v798_v3 = vrot.slane %v797_v62, 4  ;;  %v810_v11 = vrot.slane %v808_v2, 5  ;;  %v793_v14 = vsel %vm7055_vm6, %v788_v4, %v792_v50  ;;  %v816_v16 = vrot.slane %v814_v8, 5  ;;  %v591_v50 = vld [vmem:[%s6996_s25 + $0x78] sm:$0xf] }
  0x47   : > { %v1505_v15 = vsel %vm7048_vm5, %v1503_v7, %v1504_v63  ;;  %v824_v17 = vshll.u32 %v587_v0, 16  ;;  %v820_v22 = vrot.slane %v818_v12, 4  ;;  %v5828_v26 = vrot.slane %v1379_v9, 9  ;;  %v593_v62 = vld [vmem:[%s6996_s25 + $0x80] sm:$0x1] }
  0x48   : > { %v803_v19 = vsel %vm7055_vm6, %v798_v3, %v802_v60  ;;  %v5845_v20 = vcombine.low %v1502_v5, %v1505_v15  ;;  %v811_v21 = vor.u32 %v810_v11, %v807_v10  ;;  %v1508_v27 = vrot.slane %v1380_v13, 5  ;;  %v1385_v7 = vld [vmem:[%s6996_s25 + $0x6c] sm:$0xe]  ;;  %v1386_v11 = vld [vmem:[%s6996_s25 + $0x70] sm:$0xf] }
  0x49   : > { %v5795_v24 = vcombine.low %v793_v14, %v803_v19  ;;  %v826_v25 = vrot.slane %v824_v17, 5  ;;  %v821_v30 = vor.u32 %v820_v22, %v816_v16  ;;  %v1511_v31 = vrot.slane %v1381_v6, 5  ;;  %v594_v17 = vld [vmem:[%s6996_s25 + $0x84] sm:$0xf] }
  0x4a   : > { %6609 = vmatprep.mubr.msk.bf16.mxu0 %vm319_vm0, %v5845_v20  ;;  %v812_v29 = vrot.slane %v811_v21, 4  ;;  %v829_v32 = vshrl.u32 %v588_v18, 16  ;;  %v1509_v34 = vsel %vm7048_vm5, %v5828_v26, %v1508_v27  ;;  %v1510_v35 = vrot.slane %v1508_v27, 4  ;;  %v595_v21 = vld [vmem:[%s6996_s25 + $0x88] sm:$0xf] }
  0x4b   : > { %v832_v36 = vshll.u32 %v588_v18, 16  ;;  %v838_v37 = vshll.u32 %v589_v23, 16  ;;  %v822_v40 = vrot.slane %v821_v30, 4  ;;  %v842_v42 = vshrl.u32 %v589_v23, 16  ;;  %v596_v26 = vld [vmem:[%s6996_s25 + $0x8c] sm:$0x1] }
  0x4c   : > { %6576 = vmatmul.mubr.msk.bf16.gmra.mrb[28].mxu1 %vm319_vm0, %v5795_v24  ;;  %v817_v39 = vsel %vm7055_vm6, %v812_v29, %v816_v16  ;;  %v831_v41 = vrot.slane %v829_v32, 4  ;;  %v1512_v44 = vsel %vm7048_vm5, %v1510_v35, %v1511_v31  ;;  %v848_v49 = vshll.u32 %v590_v28, 16  ;;  %v1387_v16 = vld [vmem:[%s6996_s25 + $0x74] sm:$0x1]  ;;  %v1388_v31 = vld [vmem:[%s6996_s25 + $0x78] sm:$0xe] }
  0x4d   : > { %v834_v45 = vrot.slane %v832_v36, 5  ;;  %v840_v48 = vrot.slane %v838_v37, 5  ;;  %v827_v51 = vsel %vm7055_vm6, %v822_v40, %v826_v25  ;;  %v5846_v52 = vcombine.low %v1509_v34, %v1512_v44  ;;  %v1389_v36 = vld [vmem:[%s6996_s25 + $0x7c] sm:$0xf] }
  0x4e   : > { %v844_v53 = vrot.slane %v842_v42, 4  ;;  %v5829_v54 = vrot.slane %v1382_v33, 9  ;;  %v5796_v56 = vcombine.low %v817_v39, %v827_v51  ;;  %v850_v58 = vrot.slane %v848_v49, 5 }
  0x4f   : > { %v835_v57 = vor.u32 %v834_v45, %v831_v41  ;;  %v1515_v59 = vrot.slane %v1383_v38, 5  ;;  %6610 = vmatmul.mubr.msk.bf16.gmra.mrb[28].mxu0 %vm319_vm0, %v5846_v52  ;;  %v1518_v61 = vrot.slane %v1384_v43, 5  ;;  %v853_v63 = vshrl.u32 %v591_v50, 16  ;;  %v1390_v41 = vld [vmem:[%s6996_s25 + $0x80] sm:$0x1] }
  0x50   : > { %v845_v60 = vor.u32 %v844_v53, %v840_v48  ;;  %v856_v0 = vshll.u32 %v591_v50, 16  ;;  %6579 = vmatprep.mubr.msk.bf16.mxu1 %vm319_vm0, %v5796_v56  ;;  %v862_v5 = vshll.u32 %v592_v55, 16  ;;  %v866_v10 = vshrl.u32 %v592_v55, 16  ;;  %v598_v53 = vld [vmem:[%s6996_s25 + $0x94] sm:$0xf] }
  0x51   : > { %v836_v1 = vrot.slane %v835_v57, 4  ;;  %v1516_v2 = vsel %vm7048_vm5, %v5829_v54, %v1515_v59  ;;  %v1517_v4 = vrot.slane %v1515_v59, 4  ;;  %v855_v9 = vrot.slane %v853_v63, 4  ;;  %v1391_v63 = vld [vmem:[%s6996_s25 + $0x84] sm:$0xe] }
  0x52   : > { %v846_v8 = vrot.slane %v845_v60, 4  ;;  %v858_v3 = vrot.slane %v856_v0, 5  ;;  %v864_v14 = vrot.slane %v862_v5, 5  ;;  %v872_v15 = vshll.u32 %v593_v62, 16  ;;  %v1392_v0 = vld [vmem:[%s6996_s25 + $0x88] sm:$0xf] }
  0x53   : > { %v841_v12 = vsel %vm7055_vm6, %v836_v1, %v840_v48  ;;  %v1519_v13 = vsel %vm7048_vm5, %v1517_v4, %v1518_v61  ;;  %v868_v20 = vrot.slane %v866_v10, 4  ;;  %v5830_v24 = vrot.slane %v1385_v7, 9  ;;  %v597_v48 = vld [vmem:[%s6996_s25 + $0x90] sm:$0xf]  ;;  %v1393_v7 = vld [vmem:[%s6996_s25 + $0x8c] sm:$0x1] }
  0x54   : > { %v851_v6 = vsel %vm7055_vm6, %v846_v8, %v850_v58  ;;  %v5847_v18 = vcombine.low %v1516_v2, %v1519_v13  ;;  %v859_v19 = vor.u32 %v858_v3, %v855_v9  ;;  %v874_v23 = vrot.slane %v872_v15, 5  ;;  %v599_v58 = vld [vmem:[%s6996_s25 + $0x98] sm:$0x1]  ;;  %v600_v15 = vld [vmem:[%s6996_s25 + $0x9c] sm:$0xf] }
  0x55   : > { %v5797_v22 = vcombine.low %v841_v12, %v851_v6  ;;  %v1522_v25 = vrot.slane %v1386_v11, 5  ;;  %v869_v28 = vor.u32 %v868_v20, %v864_v14  ;;  %v1525_v29 = vrot.slane %v1387_v16, 5  ;;  %v602_v20 = vld [vmem:[%s6996_s25 + $0xa4] sm:$0x1] }
  0x56   : > { %6613 = vmatprep.mubr.msk.bf16.mxu0 %vm319_vm0, %v5847_v18  ;;  %v860_v27 = vrot.slane %v859_v19, 4  ;;  %v877_v30 = vshrl.u32 %v594_v17, 16  ;;  %v880_v34 = vshll.u32 %v594_v17, 16  ;;  %v886_v35 = vshll.u32 %v595_v21, 16  ;;  %v601_v19 = vld [vmem:[%s6996_s25 + $0xa0] sm:$0xf] }
  0x57   : > { %6580 = vmatmul.mubr.msk.bf16.gmra.mrb[32].mxu1 %vm319_vm0, %v5797_v22  ;;  %v1523_v32 = vsel %vm7048_vm5, %v5830_v24, %v1522_v25  ;;  %v1524_v33 = vrot.slane %v1522_v25, 4  ;;  %v870_v38 = vrot.slane %v869_v28, 4  ;;  %v890_v40 = vshrl.u32 %v595_v21, 16  ;;  %v1394_v25 = vld [vmem:[%s6996_s25 + $0x90] sm:$0xe] }
  0x58   : > { %v865_v37 = vsel %vm7055_vm6, %v860_v27, %v864_v14  ;;  %v879_v39 = vrot.slane %v877_v30, 4  ;;  %v882_v43 = vrot.slane %v880_v34, 5  ;;  %v888_v44 = vrot.slane %v886_v35, 5  ;;  %v1395_v30 = vld [vmem:[%s6996_s25 + $0x94] sm:$0xf] }
  0x59   : > { %v1526_v42 = vsel %vm7048_vm5, %v1524_v33, %v1525_v29  ;;  %v896_v45 = vshll.u32 %v596_v26, 16  ;;  %v875_v49 = vsel %vm7055_vm6, %v870_v38, %v874_v23  ;;  %v892_v51 = vrot.slane %v890_v40, 4  ;;  %v1396_v35 = vld [vmem:[%s6996_s25 + $0x98] sm:$0x1]  ;;  %v603_v40 = vld [vmem:[%s6996_s25 + $0xa8] sm:$0xf] }
  0x5a   : > { %v5848_v50 = vcombine.low %v1523_v32, %v1526_v42  ;;  %v5831_v52 = vrot.slane %v1388_v31, 9  ;;  %v5798_v54 = vcombine.low %v865_v37, %v875_v49  ;;  %v883_v55 = vor.u32 %v882_v43, %v879_v39 }
  0x5b   : > { %v898_v56 = vrot.slane %v896_v45, 5  ;;  %v1529_v57 = vrot.slane %v1389_v36, 5  ;;  %v893_v59 = vor.u32 %v892_v51, %v888_v44  ;;  %v1532_v60 = vrot.slane %v1390_v41, 5  ;;  %v604_v45 = vld [vmem:[%s6996_s25 + $0xac] sm:$0xf] }
  0x5c   : > { %6614 = vmatmul.mubr.msk.bf16.gmra.mrb[32].mxu0 %vm319_vm0, %v5848_v50  ;;  %v901_v61 = vshrl.u32 %v597_v48, 16  ;;  %v904_v62 = vshll.u32 %v597_v48, 16  ;;  %6583 = vmatprep.mubr.msk.bf16.mxu1 %vm319_vm0, %v5798_v54  ;;  %v884_v1 = vrot.slane %v883_v55, 4  ;;  %v910_v5 = vshll.u32 %v598_v53, 16 }
  0x5d   : > { %v1530_v2 = vsel %vm7048_vm5, %v5831_v52, %v1529_v57  ;;  %v1531_v4 = vrot.slane %v1529_v57, 4  ;;  %v894_v8 = vrot.slane %v893_v59, 4  ;;  %v914_v10 = vshrl.u32 %v598_v53, 16  ;;  %v605_v52 = vld [vmem:[%s6996_s25 + $0xb0] sm:$0x1] }
  0x5e   : > { %v903_v9 = vrot.slane %v901_v61, 4  ;;  %v906_v3 = vrot.slane %v904_v62, 5  ;;  %v889_v11 = vsel %vm7055_vm6, %v884_v1, %v888_v44  ;;  %v912_v13 = vrot.slane %v910_v5, 5  ;;  %v1397_v61 = vld [vmem:[%s6996_s25 + $0x9c] sm:$0xe] }
  0x5f   : > { %v1533_v12 = vsel %vm7048_vm5, %v1531_v4, %v1532_v60  ;;  %v920_v14 = vshll.u32 %v599_v58, 16  ;;  %v899_v16 = vsel %vm7055_vm6, %v894_v8, %v898_v56  ;;  %v916_v18 = vrot.slane %v914_v10, 4  ;;  %v1398_v62 = vld [vmem:[%s6996_s25 + $0xa0] sm:$0xf]  ;;  %v1399_v4 = vld [vmem:[%s6996_s25 + $0xa4] sm:$0x1] }
  0x60   : > { %v5849_v17 = vcombine.low %v1530_v2, %v1533_v12  ;;  %v907_v6 = vor.u32 %v906_v3, %v903_v9  ;;  %v5799_v21 = vcombine.low %v889_v11, %v899_v16  ;;  %v5832_v23 = vrot.slane %v1391_v63, 9  ;;  %v606_v3 = vld [vmem:[%s6996_s25 + $0xb4] sm:$0xf] }
  0x61   : > { %v922_v22 = vrot.slane %v920_v14, 5  ;;  %v1536_v24 = vrot.slane %v1392_v0, 5  ;;  %v917_v27 = vor.u32 %v916_v18, %v912_v13  ;;  %v1539_v28 = vrot.slane %v1393_v7, 5  ;;  %v608_v18 = vld [vmem:[%s6996_s25 + $0xbc] sm:$0x1] }
  0x62   : > { %6617 = vmatprep.mubr.msk.bf16.mxu0 %vm319_vm0, %v5849_v17  ;;  %v908_v26 = vrot.slane %v907_v6, 4  ;;  %v925_v29 = vshrl.u32 %v600_v15, 16  ;;  %6584 = vmatmul.mubr.msk.bf16.gmra.mrb[36].mxu1 %vm319_vm0, %v5799_v21  ;;  %v928_v33 = vshll.u32 %v600_v15, 16  ;;  %v934_v34 = vshll.u32 %v601_v19, 16  ;;  %v607_v6 = vld [vmem:[%s6996_s25 + $0xb8] sm:$0xf] }
  0x63   : > { %v1537_v31 = vsel %vm7048_vm5, %v5832_v23, %v1536_v24  ;;  %v1538_v32 = vrot.slane %v1536_v24, 4  ;;  %v918_v37 = vrot.slane %v917_v27, 4  ;;  %v938_v39 = vshrl.u32 %v601_v19, 16  ;;  %v1400_v23 = vld [vmem:[%s6996_s25 + $0xa8] sm:$0xe] }
  0x64   : > { %v913_v36 = vsel %vm7055_vm6, %v908_v26, %v912_v13  ;;  %v927_v38 = vrot.slane %v925_v29, 4  ;;  %v930_v42 = vrot.slane %v928_v33, 5  ;;  %v936_v43 = vrot.slane %v934_v34, 5  ;;  %v1402_v33 = vld [vmem:[%s6996_s25 + $0xb0] sm:$0x1] }
  0x65   : > { %v1540_v41 = vsel %vm7048_vm5, %v1538_v32, %v1539_v28  ;;  %v944_v44 = vshll.u32 %v602_v20, 16  ;;  %v923_v48 = vsel %vm7055_vm6, %v918_v37, %v922_v22  ;;  %v940_v50 = vrot.slane %v938_v39, 4  ;;  %v1401_v28 = vld [vmem:[%s6996_s25 + $0xac] sm:$0xf] }
  0x66   : > { %v5850_v49 = vcombine.low %v1537_v31, %v1540_v41  ;;  %v5833_v51 = vrot.slane %v1394_v25, 9  ;;  %v5800_v53 = vcombine.low %v913_v36, %v923_v48  ;;  %v931_v54 = vor.u32 %v930_v42, %v927_v38  ;;  %v1403_v38 = vld [vmem:[%s6996_s25 + $0xb4] sm:$0xe] }
  0x67   : > { %v946_v55 = vrot.slane %v944_v44, 5  ;;  %v1543_v56 = vrot.slane %v1395_v30, 5  ;;  %v941_v57 = vor.u32 %v940_v50, %v936_v43  ;;  %v1546_v58 = vrot.slane %v1396_v35, 5  ;;  %v1405_v50 = vld [vmem:[%s6996_s25 + $0xbc] sm:$0x1] }
  0x68   : > { %6618 = vmatmul.mubr.msk.bf16.gmra.mrb[36].mxu0 %vm319_vm0, %v5850_v49  ;;  %v949_v59 = vshrl.u32 %v603_v40, 16  ;;  %v952_v60 = vshll.u32 %v603_v40, 16  ;;  %6587 = vmatprep.mubr.msk.bf16.mxu1 %vm319_vm0, %v5800_v53  ;;  %v932_v63 = vrot.slane %v931_v54, 4  ;;  %v958_v2 = vshll.u32 %v604_v45, 16 }
  0x69   : > { %v1544_v0 = vsel %vm7048_vm5, %v5833_v51, %v1543_v56  ;;  %v1545_v1 = vrot.slane %v1543_v56, 4  ;;  %v942_v5 = vrot.slane %v941_v57, 4  ;;  %v962_v9 = vshrl.u32 %v604_v45, 16 }
  0x6a   : > { %v951_v7 = vrot.slane %v949_v59, 4  ;;  %v954_v8 = vrot.slane %v952_v60, 5  ;;  %v937_v10 = vsel %vm7055_vm6, %v932_v63, %v936_v43  ;;  %v960_v12 = vrot.slane %v958_v2, 5  ;;  %v1404_v43 = vld [vmem:[%s6996_s25 + $0xb8] sm:$0xf] }
  0x6b   : > { %v1547_v11 = vsel %vm7048_vm5, %v1545_v1, %v1546_v58  ;;  %v968_v13 = vshll.u32 %v605_v52, 16  ;;  %v947_v14 = vsel %vm7055_vm6, %v942_v5, %v946_v55  ;;  %v964_v17 = vrot.slane %v962_v9, 4  ;;  %v5939_v55 = vld [vmem:[%s6996_s25 + $0xc] sm:$0xf]  ;;  %v5940_v60 = vld [vmem:[%s6996_s25 + $0x10] sm:$0xf] }
  0x6c   : > { %v5851_v15 = vcombine.low %v1544_v0, %v1547_v11  ;;  %v955_v16 = vor.u32 %v954_v8, %v951_v7  ;;  %v5801_v19 = vcombine.low %v937_v10, %v947_v14  ;;  %v5834_v21 = vrot.slane %v1397_v61, 9  ;;  %v5941_v1 = vld [vmem:[%s6996_s25 + $0x14] sm:$0x1]  ;;  %v5942_v11 = vld [vmem:[%s6996_s25 + $0x18] sm:$0xf] }
  0x6d   : > { %v970_v20 = vrot.slane %v968_v13, 5  ;;  %v1550_v22 = vrot.slane %v1398_v62, 5  ;;  %v965_v25 = vor.u32 %v964_v17, %v960_v12  ;;  %v1553_v26 = vrot.slane %v1399_v4, 5  ;;  %v5943_v17 = vld [vmem:[%s6996_s25 + $0x1c] sm:$0xf] }
  0x6e   : > { %6621 = vmatprep.mubr.msk.bf16.mxu0 %vm319_vm0, %v5851_v15  ;;  %v956_v24 = vrot.slane %v955_v16, 4  ;;  %v973_v27 = vshrl.u32 %v606_v3, 16  ;;  %6588 = vmatmul.mubr.msk.bf16.gmra.mrb[40].mxu1 %vm319_vm0, %v5801_v19  ;;  %v976_v31 = vshll.u32 %v606_v3, 16  ;;  %v982_v32 = vshll.u32 %v607_v6, 16  ;;  %v6881_v15 = vld [vmem:[%s6996_s25 + $0xc] sm:$0xff]  }
  0x6f   : > { %v1551_v29 = vsel %vm7048_vm5, %v5834_v21, %v1550_v22  ;;  %v1552_v30 = vrot.slane %v1550_v22, 4  ;;  %v966_v35 = vrot.slane %v965_v25, 4  ;;  %v986_v37 = vshrl.u32 %v607_v6, 16  ;;  %v5944_v6 = vld [vmem:[%s6996_s25 + $0x20] sm:$0x1] }
  0x70   : > { %v961_v34 = vsel %vm7055_vm6, %v956_v24, %v960_v12  ;;  %v975_v36 = vrot.slane %v973_v27, 4  ;;  %v978_v40 = vrot.slane %v976_v31, 5  ;;  %v984_v41 = vrot.slane %v982_v32, 5 }
  0x71   : > { %v1554_v39 = vsel %vm7048_vm5, %v1552_v30, %v1553_v26  ;;  %v992_v42 = vshll.u32 %v608_v18, 16  ;;  %v971_v44 = vsel %vm7055_vm6, %v966_v35, %v970_v20  ;;  %v988_v48 = vrot.slane %v986_v37, 4  ;;  %v5945_v30 = vld [vmem:[%s6996_s25 + $0x24] sm:$0xf]  ;;  %v5946_v35 = vld [vmem:[%s6996_s25 + $0x28] sm:$0xf] }
  0x72   : > { %v5852_v45 = vcombine.low %v1551_v29, %v1554_v39  ;;  %v5835_v49 = vrot.slane %v1400_v23, 9  ;;  %v5802_v51 = vcombine.low %v961_v34, %v971_v44  ;;  %v979_v52 = vor.u32 %v978_v40, %v975_v36  ;;  %v6883_v36 = vld [vmem:[%s6996_s25 + $0x18] sm:$0xff]  }
  0x73   : > { %v994_v53 = vrot.slane %v992_v42, 5  ;;  %v1557_v54 = vrot.slane %v1401_v28, 5  ;;  %v989_v56 = vor.u32 %v988_v48, %v984_v41  ;;  %v1560_v57 = vrot.slane %v1402_v33, 5 }
  0x74   : > { %6622 = vmatmul.mubr.msk.bf16.gmra.mrb[40].mxu0 %vm319_vm0, %v5852_v45  ;;  %v5836_v58 = vrot.slane %v1403_v38, 9  ;;  %v1564_v59 = vrot.slane %v1404_v43, 5  ;;  %6591 = vmatprep.mubr.msk.bf16.mxu1 %vm319_vm0, %v5802_v51  ;;  %v980_v61 = vrot.slane %v979_v52, 4  ;;  %v1567_v0 = vrot.slane %v1405_v50, 5  ;;  %v5947_v43 = vld [vmem:[%s6996_s25 + $0x2c] sm:$0x1] }
  0x75   : > { %v1558_v62 = vsel %vm7048_vm5, %v5835_v49, %v1557_v54  ;;  %v1559_v63 = vrot.slane %v1557_v54, 4  ;;  %v990_v2 = vrot.slane %v989_v56, 4  ;;  %v2410_v7 = vshrl.u32 %v5939_v55, 16  ;;  %v6884_v49 = vld [vmem:[%s6996_s25 + $0x24] sm:$0xff]   ;;  %v7337_v54 = vld [vmem:[%s9150_s1 + $0x38] sm:$0xff]  }
  0x76   : > { %v1565_v4 = vsel %vm7048_vm5, %v5836_v58, %v1564_v59  ;;  %v1566_v5 = vrot.slane %v1564_v59, 4  ;;  %v985_v8 = vsel %vm7055_vm6, %v980_v61, %v984_v41  ;;  %v2413_v3 = vshll.u32 %v5939_v55, 16 }
  0x77   : > { %v1561_v9 = vsel %vm7048_vm5, %v1559_v63, %v1560_v57  ;;  %v2419_v10 = vshll.u32 %v5940_v60, 16  ;;  %v995_v12 = vsel %vm7055_vm6, %v990_v2, %v994_v53  ;;  %v2412_v16 = vrot.slane %v2410_v7, 4  ;;  %v5948_v53 = vld [vmem:[%s6996_s25 + $0x30] sm:$0xf]  ;;  %v5949_v2 = vld [vmem:[%s6996_s25 + $0x34] sm:$0xf] }
  0x78   : > { %v5853_v13 = vcombine.low %v1558_v62, %v1561_v9  ;;  %v1568_v14 = vsel %vm7048_vm5, %v1566_v5, %v1567_v0  ;;  %v5803_v18 = vcombine.low %v985_v8, %v995_v12  ;;  %v2415_v20 = vrot.slane %v2413_v3, 5 }
  0x79   : > { %v5854_v19 = vcombine.low %v1565_v4, %v1568_v14  ;;  %v2421_v21 = vrot.slane %v2419_v10, 5  ;;  %v2423_v22 = vshrl.u32 %v5940_v60, 16  ;;  %v2429_v23 = vshll.u32 %v5941_v1, 16  ;;  %v5950_v4 = vld [vmem:[%s6996_s25 + $0x38] sm:$0x1] }
  0x7a   : > { %6625 = vmatprep.mubr.msk.bf16.mxu0 %vm319_vm0, %v5853_v13  ;;  %v2434_v24 = vshrl.u32 %v5942_v11, 16  ;;  %v2437_v25 = vshll.u32 %v5942_v11, 16  ;;  %6592 = vmatmul.mubr.msk.bf16.gmra.mrb[44].mxu1 %vm319_vm0, %v5803_v18  ;;  %v2416_v26 = vor.u32 %v2415_v20, %v2412_v16  ;;  %v2443_v27 = vshll.u32 %v5943_v17, 16  ;;  %v5951_v10 = vld [vmem:[%s6996_s25 + $0x3c] sm:$0xf]  ;;  %v6917_v11 = vld [vmem:[%s9150_s1 + $0x28] sm:$0xff]  }
  0x7b   : > { %v2447_v28 = vshrl.u32 %v5943_v17, 16  ;;  %v2453_v29 = vshll.u32 %v5944_v6, 16  ;;  %6631 = vmatprep.mubr.msk.bf16.mxu1 %vm319_vm0, %v6881_v15  ;;  %v2425_v31 = vrot.slane %v2423_v22, 4  ;;  %v2431_v32 = vrot.slane %v2429_v23, 5  ;;  %v7356_v16 = vld [vmem:[%s9150_s1 + $0x40] sm:$0xff]  }
  0x7c   : > { %6626 = vmatmul.mubr.msk.bf16.gmra.mrb[44].mxu0 %vm319_vm0, %v5854_v19  ;;  %v2436_v33 = vrot.slane %v2434_v24, 4  ;;  %v2439_v34 = vrot.slane %v2437_v25, 5  ;;  %v2417_v37 = vrot.slane %v2416_v26, 4  ;;  %v2445_v38 = vrot.slane %v2443_v27, 5  ;;  %v5952_v20 = vld [vmem:[%s6996_s25 + $0x40] sm:$0xf] }
  0x7d   : > { %v2449_v39 = vrot.slane %v2447_v28, 4  ;;  %v2455_v40 = vrot.slane %v2453_v29, 5  ;;  %v2426_v41 = vor.u32 %v2425_v31, %v2421_v21  ;;  %v2458_v44 = vshrl.u32 %v5945_v30, 16  ;;  %v5953_v24 = vld [vmem:[%s6996_s25 + $0x44] sm:$0x1]  ;;  %v6918_v27 = vld [vmem:[%s9150_s1 + $0x30] sm:$0xff]  }
  0x7e   : > { %v2440_v42 = vor.u32 %v2439_v34, %v2436_v33  ;;  %v2461_v45 = vshll.u32 %v5945_v30, 16  ;;  %v2422_v48 = vsel %vm7055_vm6, %v2417_v37, %v2421_v21  ;;  %v2467_v51 = vshll.u32 %v5946_v35, 16  ;;  %v6885_v21 = vld [vmem:[%s6996_s25 + $0x30] sm:$0xff]   ;;  %v6887_v29 = vld [vmem:[%s6996_s25 + $0x3c] sm:$0xff]   ;;  %v5954_v33 = vld [vmem:[%s6996_s25 + $0x48] sm:$0xf] }
  0x7f   : > { %v2450_v50 = vor.u32 %v2449_v39, %v2445_v38  ;;  %v2471_v52 = vshrl.u32 %v5946_v35, 16  ;;  %v2427_v55 = vrot.slane %v2426_v41, 4  ;;  %v2460_v57 = vrot.slane %v2458_v44, 4 }
  0x80   : > { %v2441_v56 = vrot.slane %v2440_v42, 4  ;;  %v2463_v58 = vrot.slane %v2461_v45, 5  ;;  %v2469_v60 = vrot.slane %v2467_v51, 5  ;;  %v2477_v62 = vshll.u32 %v5947_v43, 16  ;;  %v5955_v42 = vld [vmem:[%s6996_s25 + $0x4c] sm:$0xf] }
  0x81   : > { %v2451_v59 = vrot.slane %v2450_v50, 4  ;;  %v2473_v61 = vrot.slane %v2471_v52, 4  ;;  %v2432_v63 = vsel %vm7055_vm6, %v2427_v55, %v2431_v32  ;;  %v2482_v5 = vshrl.u32 %v5948_v53, 16  ;;  %v5956_v45 = vld [vmem:[%s6996_s25 + $0x50] sm:$0x1] }
  0x82   : > { %v2446_v0 = vsel %vm7055_vm6, %v2441_v56, %v2445_v38  ;;  %v2464_v1 = vor.u32 %v2463_v58, %v2460_v57  ;;  %6632 = vmatmul.mubr.msk.bf16.vlgmr.msra.gmra.mrb[48].mxu1 %vm319_vm0, %v6883_v36  ;;  %v5989_v7 = vcombine.low %v2422_v48, %v2432_v63  ;;  %v2479_v3 = vrot.slane %v2477_v62, 5  ;;  %v5957_v55 = vld [vmem:[%s6996_s25 + $0x54] sm:$0xf] }
  0x83   : > { %v2456_v8 = vsel %vm7055_vm6, %v2451_v59, %v2455_v40  ;;  %v2474_v9 = vor.u32 %v2473_v61, %v2469_v60  ;;  %6698 = vmatpush3.bf16.msra.mxu1 %v6917_v11  ;;  %6635 = vmatprep.mubr.msk.bf16.mxu1 %vm319_vm0, %v6884_v49  ;;  %v2484_v14 = vrot.slane %v2482_v5, 4  ;;  %v2485_v15 = vshll.u32 %v5948_v53, 16  ;;  %v6888_v61 = vld [vmem:[%s6996_s25 + $0x48] sm:$0xff]   ;;  %v6889_v5 = vld [vmem:[%s6996_s25 + $0x54] sm:$0xff]  }
  0x84   : > { %v5990_v12 = vcombine.low %v2446_v0, %v2456_v8  ;;  %v2465_v13 = vrot.slane %v2464_v1, 4  ;;  %6665 = vmatprep.mubr.msk.bf16.mxu0 %vm319_vm0, %v5989_v7  ;;  %v2491_v6 = vshll.u32 %v5949_v2, 16  ;;  %v2495_v18 = vshrl.u32 %v5949_v2, 16  ;;  %6765 = vmatprep.subr.bf16.mxu1 %v7337_v54  ;;  %v5958_v1 = vld [vmem:[%s6996_s25 + $0x58] sm:$0xf] }
  0x85   : > { %v2475_v17 = vrot.slane %v2474_v9, 4  ;;  %v2501_v19 = vshll.u32 %v5950_v4, 16  ;;  %v2487_v23 = vrot.slane %v2485_v15, 5  ;;  %v2506_v25 = vshrl.u32 %v5951_v10, 16  ;;  %v5959_v9 = vld [vmem:[%s6996_s25 + $0x5c] sm:$0x1] }
  0x86   : > { %6666 = vmatmul.mubr.msk.bf16.vlgmr.msra.gmra.mrb[48].mxu0 %vm319_vm0, %v5990_v12  ;;  %v2470_v22 = vsel %vm7055_vm6, %v2465_v13, %v2469_v60  ;;  %v2509_v26 = vshll.u32 %v5951_v10, 16  ;;  %v2493_v30 = vrot.slane %v2491_v6, 5  ;;  %v2497_v31 = vrot.slane %v2495_v18, 4 }
  0x87   : > { %6732 = vmatpush3.bf16.msra.mxu0 %v6918_v27  ;;  %v2480_v28 = vsel %vm7055_vm6, %v2475_v17, %v2479_v3  ;;  %v2503_v32 = vrot.slane %v2501_v19, 5  ;;  %v2488_v35 = vor.u32 %v2487_v23, %v2484_v14  ;;  %v2508_v36 = vrot.slane %v2506_v25, 4  ;;  %v5960_v3 = vld [vmem:[%s6996_s25 + $0x60] sm:$0xf]  ;;  %v5962_v27 = vld [vmem:[%s6996_s25 + $0x68] sm:$0x1] }
  0x88   : > { %v5991_v34 = vcombine.low %v2470_v22, %v2480_v28  ;;  %v2511_v37 = vrot.slane %v2509_v26, 5  ;;  %6799 = vmatprep.subr.bf16.mxu0 %v7356_v16  ;;  %v2498_v38 = vor.u32 %v2497_v31, %v2493_v30  ;;  %v2515_v39 = vshll.u32 %v5952_v20, 16  ;;  %v5961_v22 = vld [vmem:[%s6996_s25 + $0x64] sm:$0xf] }
  0x89   : > { %v2519_v40 = vshrl.u32 %v5952_v20, 16  ;;  %v2525_v41 = vshll.u32 %v5953_v24, 16  ;;  %v2489_v43 = vrot.slane %v2488_v35, 4  ;;  %v2530_v48 = vshrl.u32 %v5954_v33, 16 }
  0x8a   : > { %6669 = vmatprep.mubr.msk.bf16.mxu0 %vm319_vm0, %v5991_v34  ;;  %v2512_v44 = vor.u32 %v2511_v37, %v2508_v36  ;;  %v2533_v49 = vshll.u32 %v5954_v33, 16  ;;  %6636 = vmatmul.mubr.msk.bf16.gmra.mrb[52].mxu1 %vm319_vm0, %v6885_v21  ;;  %v2499_v50 = vrot.slane %v2498_v38, 4  ;;  %v2517_v51 = vrot.slane %v2515_v39, 5  ;;  %v5963_v36 = vld [vmem:[%s6996_s25 + $0x6c] sm:$0xf] }
  0x8b   : > { %v2521_v52 = vrot.slane %v2519_v40, 4  ;;  %v2527_v53 = vrot.slane %v2525_v41, 5  ;;  %6639 = vmatprep.mubr.msk.bf16.mxu1 %vm319_vm0, %v6887_v29  ;;  %v2494_v56 = vsel %vm7055_vm6, %v2489_v43, %v2493_v30  ;;  %v2532_v58 = vrot.slane %v2530_v48, 4  ;;  %v5964_v41 = vld [vmem:[%s6996_s25 + $0x70] sm:$0xf]  ;;  %v6890_v48 = vld [vmem:[%s6996_s25 + $0x60] sm:$0xff]  }
  0x8c   : > { %v2513_v57 = vrot.slane %v2512_v44, 4  ;;  %v2535_v59 = vrot.slane %v2533_v49, 5  ;;  %v2504_v60 = vsel %vm7055_vm6, %v2499_v50, %v2503_v32  ;;  %v2539_v63 = vshll.u32 %v5955_v42, 16  ;;  %v6891_v50 = vld [vmem:[%s6996_s25 + $0x6c] sm:$0xff]  }
  0x8d   : > { %v2522_v62 = vor.u32 %v2521_v52, %v2517_v51  ;;  %v2543_v0 = vshrl.u32 %v5955_v42, 16  ;;  %v5992_v2 = vcombine.low %v2494_v56, %v2504_v60  ;;  %v2549_v8 = vshll.u32 %v5956_v45, 16  ;;  %v5966_v60 = vld [vmem:[%s6996_s25 + $0x78] sm:$0xf] }
  0x8e   : > { %v2518_v4 = vsel %vm7055_vm6, %v2513_v57, %v2517_v51  ;;  %v2536_v7 = vor.u32 %v2535_v59, %v2532_v58  ;;  %v2541_v11 = vrot.slane %v2539_v63, 5  ;;  %v2554_v13 = vshrl.u32 %v5957_v55, 16  ;;  %v5965_v57 = vld [vmem:[%s6996_s25 + $0x74] sm:$0x1] }
  0x8f   : > { %v2523_v10 = vrot.slane %v2522_v62, 4  ;;  %v2545_v12 = vrot.slane %v2543_v0, 4  ;;  %6670 = vmatmul.mubr.msk.bf16.gmra.mrb[52].mxu0 %vm319_vm0, %v5992_v2  ;;  %v2551_v15 = vrot.slane %v2549_v8, 5  ;;  %v2557_v17 = vshll.u32 %v5957_v55, 16 }
  0x90   : > { %v2537_v14 = vrot.slane %v2536_v7, 4  ;;  %v2563_v6 = vshll.u32 %v5958_v1, 16  ;;  %v2556_v20 = vrot.slane %v2554_v13, 4  ;;  %v2567_v21 = vshrl.u32 %v5958_v1, 16  ;;  %v5967_v1 = vld [vmem:[%s6996_s25 + $0x7c] sm:$0xf] }
  0x91   : > { %v2528_v18 = vsel %vm7055_vm6, %v2523_v10, %v2527_v53  ;;  %v2546_v19 = vor.u32 %v2545_v12, %v2541_v11  ;;  %v2559_v25 = vrot.slane %v2557_v17, 5  ;;  %v2573_v30 = vshll.u32 %v5959_v9, 16  ;;  %v5968_v13 = vld [vmem:[%s6996_s25 + $0x80] sm:$0x1]  ;;  %v5969_v17 = vld [vmem:[%s6996_s25 + $0x84] sm:$0xf] }
  0x92   : > { %v5993_v23 = vcombine.low %v2518_v4, %v2528_v18  ;;  %v2542_v24 = vsel %vm7055_vm6, %v2537_v14, %v2541_v11  ;;  %v2565_v26 = vrot.slane %v2563_v6, 5  ;;  %6640 = vmatmul.mubr.msk.bf16.gmra.mrb[56].mxu1 %vm319_vm0, %v6888_v61  ;;  %v2569_v29 = vrot.slane %v2567_v21, 4  ;;  %v5970_v21 = vld [vmem:[%s6996_s25 + $0x88] sm:$0xf] }
  0x93   : > { %v2547_v28 = vrot.slane %v2546_v19, 4  ;;  %v2578_v31 = vshrl.u32 %v5960_v3, 16  ;;  %6643 = vmatprep.mubr.msk.bf16.mxu1 %vm319_vm0, %v6889_v5  ;;  %v2560_v32 = vor.u32 %v2559_v25, %v2556_v20  ;;  %v2581_v33 = vshll.u32 %v5960_v3, 16 }
  0x94   : > { %6673 = vmatprep.mubr.msk.bf16.mxu0 %vm319_vm0, %v5993_v23  ;;  %v2587_v34 = vshll.u32 %v5961_v22, 16  ;;  %v2591_v35 = vshrl.u32 %v5961_v22, 16  ;;  %v2570_v38 = vor.u32 %v2569_v29, %v2565_v26  ;;  %v2575_v39 = vrot.slane %v2573_v30, 5  ;;  %v6892_v23 = vld [vmem:[%s6996_s25 + $0x78] sm:$0xff]  }
  0x95   : > { %v2552_v37 = vsel %vm7055_vm6, %v2547_v28, %v2551_v15  ;;  %v2580_v40 = vrot.slane %v2578_v31, 4  ;;  %v2561_v43 = vrot.slane %v2560_v32, 4  ;;  %v2583_v44 = vrot.slane %v2581_v33, 5  ;;  %v6893_v28 = vld [vmem:[%s6996_s25 + $0x84] sm:$0xff]  }
  0x96   : > { %v5994_v42 = vcombine.low %v2542_v24, %v2552_v37  ;;  %v2589_v45 = vrot.slane %v2587_v34, 5  ;;  %v2571_v49 = vrot.slane %v2570_v38, 4  ;;  %v2593_v51 = vrot.slane %v2591_v35, 4  ;;  %v5971_v34 = vld [vmem:[%s6996_s25 + $0x8c] sm:$0x1] }
  0x97   : > { %v2597_v52 = vshll.u32 %v5962_v27, 16  ;;  %v2602_v53 = vshrl.u32 %v5963_v36, 16  ;;  %v2566_v55 = vsel %vm7055_vm6, %v2561_v43, %v2565_v26  ;;  %v2584_v56 = vor.u32 %v2583_v44, %v2580_v40  ;;  %v5972_v37 = vld [vmem:[%s6996_s25 + $0x90] sm:$0xf] }
  0x98   : > { %6674 = vmatmul.mubr.msk.bf16.gmra.mrb[56].mxu0 %vm319_vm0, %v5994_v42  ;;  %v2605_v58 = vshll.u32 %v5963_v36, 16  ;;  %v2611_v59 = vshll.u32 %v5964_v41, 16  ;;  %v2576_v61 = vsel %vm7055_vm6, %v2571_v49, %v2575_v39  ;;  %v2594_v62 = vor.u32 %v2593_v51, %v2589_v45  ;;  %v5973_v51 = vld [vmem:[%s6996_s25 + $0x94] sm:$0xf] }
  0x99   : > { %v2599_v63 = vrot.slane %v2597_v52, 5  ;;  %v2604_v0 = vrot.slane %v2602_v53, 4  ;;  %v5995_v2 = vcombine.low %v2566_v55, %v2576_v61  ;;  %v2585_v4 = vrot.slane %v2584_v56, 4 }
  0x9a   : > { %v2607_v5 = vrot.slane %v2605_v58, 5  ;;  %v2613_v7 = vrot.slane %v2611_v59, 5  ;;  %6644 = vmatmul.mubr.msk.bf16.gmra.mrb[60].mxu1 %vm319_vm0, %v6890_v48  ;;  %v2595_v8 = vrot.slane %v2594_v62, 4  ;;  %v2615_v9 = vshrl.u32 %v5964_v41, 16  ;;  %v5974_v58 = vld [vmem:[%s6996_s25 + $0x98] sm:$0x1] }
  0x9b   : > { %v2621_v3 = vshll.u32 %v5965_v57, 16  ;;  %v2626_v10 = vshrl.u32 %v5966_v60, 16  ;;  %6677 = vmatprep.mubr.msk.bf16.mxu0 %vm319_vm0, %v5995_v2  ;;  %6647 = vmatprep.mubr.msk.bf16.mxu1 %vm319_vm0, %v6891_v50  ;;  %v2590_v11 = vsel %vm7055_vm6, %v2585_v4, %v2589_v45  ;;  %v2629_v14 = vshll.u32 %v5966_v60, 16  ;;  %v5975_v59 = vld [vmem:[%s6996_s25 + $0x9c] sm:$0xf] }
  0x9c   : > { %v2608_v12 = vor.u32 %v2607_v5, %v2604_v0  ;;  %v2635_v15 = vshll.u32 %v5967_v1, 16  ;;  %v2600_v6 = vsel %vm7055_vm6, %v2595_v8, %v2599_v63  ;;  %v2617_v18 = vrot.slane %v2615_v9, 4  ;;  %v5976_v0 = vld [vmem:[%s6996_s25 + $0xa0] sm:$0xf] }
  0x9d   : > { %v2623_v19 = vrot.slane %v2621_v3, 5  ;;  %v2628_v20 = vrot.slane %v2626_v10, 4  ;;  %v5996_v22 = vcombine.low %v2590_v11, %v2600_v6  ;;  %v2631_v25 = vrot.slane %v2629_v14, 5  ;;  %v6895_v9 = vld [vmem:[%s6996_s25 + $0x9c] sm:$0xff]  }
  0x9e   : > { %v2609_v24 = vrot.slane %v2608_v12, 4  ;;  %v2637_v26 = vrot.slane %v2635_v15, 5  ;;  %v2618_v27 = vor.u32 %v2617_v18, %v2613_v7  ;;  %v2639_v29 = vshrl.u32 %v5967_v1, 16  ;;  %v6894_v1 = vld [vmem:[%s6996_s25 + $0x90] sm:$0xff]  }
  0x9f   : > { %v2645_v30 = vshll.u32 %v5968_v13, 16  ;;  %v2650_v31 = vshrl.u32 %v5969_v17, 16  ;;  %v2632_v33 = vor.u32 %v2631_v25, %v2628_v20  ;;  %v2653_v35 = vshll.u32 %v5969_v17, 16  ;;  %v5977_v17 = vld [vmem:[%s6996_s25 + $0xa4] sm:$0x1] }
  0xa0   : > { %6678 = vmatmul.mubr.msk.bf16.gmra.mrb[60].mxu0 %vm319_vm0, %v5996_v22  ;;  %v2614_v32 = vsel %vm7055_vm6, %v2609_v24, %v2613_v7  ;;  %v2659_v36 = vshll.u32 %v5970_v21, 16  ;;  %v2619_v38 = vrot.slane %v2618_v27, 4  ;;  %v2641_v39 = vrot.slane %v2639_v29, 4 }
  0xa1   : > { %v2647_v40 = vrot.slane %v2645_v30, 5  ;;  %v2652_v41 = vrot.slane %v2650_v31, 4  ;;  %v2633_v42 = vrot.slane %v2632_v33, 4  ;;  %v2655_v43 = vrot.slane %v2653_v35, 5 }
  0xa2   : > { %v2661_v44 = vrot.slane %v2659_v36, 5  ;;  %v2663_v45 = vshrl.u32 %v5970_v21, 16  ;;  %6648 = vmatmul.mubr.msk.bf16.gmra.mrb[64].mxu1 %vm319_vm0, %v6892_v23  ;;  %v2624_v48 = vsel %vm7055_vm6, %v2619_v38, %v2623_v19  ;;  %v2642_v49 = vor.u32 %v2641_v39, %v2637_v26  ;;  %v5978_v21 = vld [vmem:[%s6996_s25 + $0xa8] sm:$0xf] }
  0xa3   : > { %v2669_v50 = vshll.u32 %v5971_v34, 16  ;;  %v2674_v52 = vshrl.u32 %v5972_v37, 16  ;;  %v5997_v53 = vcombine.low %v2614_v32, %v2624_v48  ;;  %6651 = vmatprep.mubr.msk.bf16.mxu1 %vm319_vm0, %v6893_v28  ;;  %v2638_v55 = vsel %vm7055_vm6, %v2633_v42, %v2637_v26  ;;  %v5979_v26 = vld [vmem:[%s6996_s25 + $0xac] sm:$0xf]  ;;  %v5980_v34 = vld [vmem:[%s6996_s25 + $0xb0] sm:$0x1] }
  0xa4   : > { %v2656_v56 = vor.u32 %v2655_v43, %v2652_v41  ;;  %v2665_v57 = vrot.slane %v2663_v45, 4  ;;  %v2643_v60 = vrot.slane %v2642_v49, 4  ;;  %v2677_v63 = vshll.u32 %v5972_v37, 16  ;;  %v5982_v45 = vld [vmem:[%s6996_s25 + $0xb8] sm:$0xf]  ;;  %v6896_v49 = vld [vmem:[%s6996_s25 + $0xa8] sm:$0xff]  }
  0xa5   : > { %v2671_v61 = vrot.slane %v2669_v50, 5  ;;  %v2676_v62 = vrot.slane %v2674_v52, 4  ;;  %6681 = vmatprep.mubr.msk.bf16.mxu0 %vm319_vm0, %v5997_v53  ;;  %v2683_v5 = vshll.u32 %v5973_v51, 16  ;;  %v2687_v7 = vshrl.u32 %v5973_v51, 16 }
  0xa6   : > { %v2657_v2 = vrot.slane %v2656_v56, 4  ;;  %v2666_v4 = vor.u32 %v2665_v57, %v2661_v44  ;;  %v2648_v8 = vsel %vm7055_vm6, %v2643_v60, %v2647_v40  ;;  %v2679_v3 = vrot.slane %v2677_v63, 5  ;;  %v5981_v40 = vld [vmem:[%s6996_s25 + $0xb4] sm:$0xf] }
  0xa7   : > { %v2693_v10 = vshll.u32 %v5974_v58, 16  ;;  %v2698_v11 = vshrl.u32 %v5975_v59, 16  ;;  %v5998_v12 = vcombine.low %v2638_v55, %v2648_v8  ;;  %v2685_v15 = vrot.slane %v2683_v5, 5  ;;  %v6897_v57 = vld [vmem:[%s6996_s25 + $0xb4] sm:$0xff]   ;;  %v5984_v5 = vld [vmem:[%s6996_s25 + $0xc0] sm:$0xf] }
  0xa8   : > { %v2662_v13 = vsel %vm7055_vm6, %v2657_v2, %v2661_v44  ;;  %v2667_v14 = vrot.slane %v2666_v4, 4  ;;  %v2680_v6 = vor.u32 %v2679_v3, %v2676_v62  ;;  %v2689_v18 = vrot.slane %v2687_v7, 4  ;;  %v5983_v62 = vld [vmem:[%s6996_s25 + $0xbc] sm:$0x1] }
  0xa9   : > { %v2695_v19 = vrot.slane %v2693_v10, 5  ;;  %v2700_v20 = vrot.slane %v2698_v11, 4  ;;  %6682 = vmatmul.mubr.msk.bf16.gmra.mrb[64].mxu0 %vm319_vm0, %v5998_v12  ;;  %v2701_v23 = vshll.u32 %v5975_v59, 16  ;;  %v2707_v24 = vshll.u32 %v5976_v0, 16  ;;  %v5985_v10 = vld [vmem:[%s6996_s25 + $0xc4] sm:$0xf] }
  0xaa   : > { %v2672_v22 = vsel %vm7055_vm6, %v2667_v14, %v2671_v61  ;;  %v2711_v25 = vshrl.u32 %v5976_v0, 16  ;;  %6652 = vmatmul.mubr.msk.bf16.gmra.mrb[68].mxu1 %vm319_vm0, %v6894_v1  ;;  %v2681_v28 = vrot.slane %v2680_v6, 4  ;;  %v2690_v29 = vor.u32 %v2689_v18, %v2685_v15 }
  0xab   : > { %v5999_v27 = vcombine.low %v2662_v13, %v2672_v22  ;;  %v2717_v30 = vshll.u32 %v5977_v17, 16  ;;  %6655 = vmatprep.mubr.msk.bf16.mxu1 %vm319_vm0, %v6895_v9  ;;  %v2703_v31 = vrot.slane %v2701_v23, 5  ;;  %v2709_v32 = vrot.slane %v2707_v24, 5  ;;  %v6022_v17 = vld [vmem:[%s6996_s25 + $0xc] sm:$0xe] }
  0xac   : > { %v2713_v33 = vrot.slane %v2711_v25, 4  ;;  %v2722_v35 = vshrl.u32 %v5978_v21, 16  ;;  %v2686_v36 = vsel %vm7055_vm6, %v2681_v28, %v2685_v15  ;;  %v2691_v37 = vrot.slane %v2690_v29, 4  ;;  %v5986_v15 = vld [vmem:[%s6996_s25 + $0xc8] sm:$0x1]  ;;  %v6898_v29 = vld [vmem:[%s6996_s25 + $0xc0] sm:$0xff]  }
  0xad   : > { %6685 = vmatprep.mubr.msk.bf16.mxu0 %vm319_vm0, %v5999_v27  ;;  %v2719_v38 = vrot.slane %v2717_v30, 5  ;;  %v2725_v39 = vshll.u32 %v5978_v21, 16  ;;  %v2704_v41 = vor.u32 %v2703_v31, %v2700_v20  ;;  %v2731_v44 = vshll.u32 %v5979_v26, 16  ;;  %v6023_v21 = vld [vmem:[%s6996_s25 + $0x10] sm:$0xf] }
  0xae   : > { %v2714_v42 = vor.u32 %v2713_v33, %v2709_v32  ;;  %v2724_v43 = vrot.slane %v2722_v35, 4  ;;  %v2696_v48 = vsel %vm7055_vm6, %v2691_v37, %v2695_v19  ;;  %v2735_v51 = vshrl.u32 %v5979_v26, 16  ;;  %v6024_v22 = vld [vmem:[%s6996_s25 + $0x14] sm:$0x1]  ;;  %v6025_v27 = vld [vmem:[%s6996_s25 + $0x18] sm:$0xe] }
  0xaf   : > { %v2727_v50 = vrot.slane %v2725_v39, 5  ;;  %v2741_v52 = vshll.u32 %v5980_v34, 16  ;;  %v6000_v53 = vcombine.low %v2686_v36, %v2696_v48  ;;  %v2705_v55 = vrot.slane %v2704_v41, 4  ;;  %v6026_v37 = vld [vmem:[%s6996_s25 + $0x1c] sm:$0xf] }
  0xb0   : > { %v2715_v56 = vrot.slane %v2714_v42, 4  ;;  %v2733_v58 = vrot.slane %v2731_v44, 5  ;;  %v2737_v60 = vrot.slane %v2735_v51, 4  ;;  %v2746_v63 = vshrl.u32 %v5981_v40, 16  ;;  %v6030_v51 = vld [vmem:[%s6996_s25 + $0x2c] sm:$0x1] }
  0xb1   : > { %v2728_v59 = vor.u32 %v2727_v50, %v2724_v43  ;;  %v2743_v61 = vrot.slane %v2741_v52, 5  ;;  %6686 = vmatmul.mubr.msk.bf16.gmra.mrb[68].mxu0 %vm319_vm0, %v6000_v53  ;;  %v2710_v0 = vsel %vm7055_vm6, %v2705_v55, %v2709_v32  ;;  %v2749_v2 = vshll.u32 %v5981_v40, 16  ;;  %v6028_v43 = vld [vmem:[%s6996_s25 + $0x24] sm:$0xe]  ;;  %v6029_v50 = vld [vmem:[%s6996_s25 + $0x28] sm:$0xf] }
  0xb2   : > { %v2720_v1 = vsel %vm7055_vm6, %v2715_v56, %v2719_v38  ;;  %v2755_v4 = vshll.u32 %v5982_v45, 16  ;;  %6656 = vmatmul.mubr.msk.bf16.gmra.mrb[72].mxu1 %vm319_vm0, %v6896_v49  ;;  %v2738_v9 = vor.u32 %v2737_v60, %v2733_v58  ;;  %v2748_v3 = vrot.slane %v2746_v63, 4  ;;  %v6027_v38 = vld [vmem:[%s6996_s25 + $0x20] sm:$0x1]  ;;  %v6033_v63 = vld [vmem:[%s6996_s25 + $0x38] sm:$0x1] }
  0xb3   : > { %v6001_v7 = vcombine.low %v2710_v0, %v2720_v1  ;;  %v2729_v8 = vrot.slane %v2728_v59, 4  ;;  %6659 = vmatprep.mubr.msk.bf16.mxu1 %vm319_vm0, %v6897_v57  ;;  %v2751_v11 = vrot.slane %v2749_v2, 5  ;;  %v2759_v13 = vshrl.u32 %v5982_v45, 16  ;;  %v6031_v57 = vld [vmem:[%s6996_s25 + $0x30] sm:$0xe] }
  0xb4   : > { %v2757_v12 = vrot.slane %v2755_v4, 5  ;;  %v2765_v14 = vshll.u32 %v5983_v62, 16  ;;  %v2739_v18 = vrot.slane %v2738_v9, 4  ;;  %v2770_v19 = vshrl.u32 %v5984_v5, 16  ;;  %v6032_v62 = vld [vmem:[%s6996_s25 + $0x34] sm:$0xf] }
  0xb5   : > { %6689 = vmatprep.mubr.msk.bf16.mxu0 %vm319_vm0, %v6001_v7  ;;  %v2734_v6 = vsel %vm7055_vm6, %v2729_v8, %v2733_v58  ;;  %v2773_v20 = vshll.u32 %v5984_v5, 16  ;;  %v2752_v23 = vor.u32 %v2751_v11, %v2748_v3  ;;  %v2761_v24 = vrot.slane %v2759_v13, 4  ;;  %v6900_v5 = vld [vmem:[%s6996_s25 + $0x18] sm:$0xff]   ;;  %v6035_v8 = vld [vmem:[%s6996_s25 + $0x40] sm:$0xf] }
  0xb6   : > { %v2767_v25 = vrot.slane %v2765_v14, 5  ;;  %v2779_v26 = vshll.u32 %v5985_v10, 16  ;;  %v2744_v28 = vsel %vm7055_vm6, %v2739_v18, %v2743_v61  ;;  %v2772_v30 = vrot.slane %v2770_v19, 4  ;;  %v6034_v7 = vld [vmem:[%s6996_s25 + $0x3c] sm:$0xe] }
  0xb7   : > { %v2775_v31 = vrot.slane %v2773_v20, 5  ;;  %v2783_v32 = vshrl.u32 %v5985_v10, 16  ;;  %v6002_v33 = vcombine.low %v2734_v6, %v2744_v28  ;;  %v2753_v34 = vrot.slane %v2752_v23, 4  ;;  %v6037_v6 = vld [vmem:[%s6996_s25 + $0x48] sm:$0xe] }
  0xb8   : > { %v2762_v35 = vor.u32 %v2761_v24, %v2757_v12  ;;  %v2781_v36 = vrot.slane %v2779_v26, 5  ;;  %v2789_v41 = vshll.u32 %v5986_v15, 16  ;;  %v6070_v42 = vrot.slane %v6022_v17, 9  ;;  %v6038_v18 = vld [vmem:[%s6996_s25 + $0x4c] sm:$0xf] }
  0xb9   : > { %v2776_v39 = vor.u32 %v2775_v31, %v2772_v30  ;;  %v2785_v40 = vrot.slane %v2783_v32, 4  ;;  %6690 = vmatmul.mubr.msk.bf16.gmra.mrb[72].mxu0 %vm319_vm0, %v6002_v33  ;;  %v2758_v44 = vsel %vm7055_vm6, %v2753_v34, %v2757_v12  ;;  %v3253_v48 = vrot.slane %v6023_v21, 5  ;;  %v6036_v12 = vld [vmem:[%s6996_s25 + $0x44] sm:$0x1]  ;;  %v6039_v23 = vld [vmem:[%s6996_s25 + $0x50] sm:$0x1] }
  0xba   : > { %v2763_v45 = vrot.slane %v2762_v35, 4  ;;  %v3256_v49 = vrot.slane %v6024_v22, 5  ;;  %6660 = vmatmul.mubr.msk.bf16.gmra.mrb[76].mxu1 %vm319_vm0, %v6898_v29  ;;  %v2791_v55 = vrot.slane %v2789_v41, 5  ;;  %v6071_v56 = vrot.slane %v6025_v27, 9  ;;  %v6040_v28 = vld [vmem:[%s6996_s25 + $0x54] sm:$0xe] }
  0xbb   : > { %v2777_v52 = vrot.slane %v2776_v39, 4  ;;  %v2786_v53 = vor.u32 %v2785_v40, %v2781_v36  ;;  %v3254_v59 = vsel %vm7048_vm5, %v6070_v42, %v3253_v48  ;;  %v3255_v60 = vrot.slane %v3253_v48, 4  ;;  %v6041_v29 = vld [vmem:[%s6996_s25 + $0x58] sm:$0xf]  ;;  %v6042_v30 = vld [vmem:[%s6996_s25 + $0x5c] sm:$0x1] }
  0xbc   : > { %v2768_v58 = vsel %vm7055_vm6, %v2763_v45, %v2767_v25  ;;  %v3260_v61 = vrot.slane %v6026_v37, 5  ;;  %v3263_v4 = vrot.slane %v6027_v38, 5  ;;  %v6072_v11 = vrot.slane %v6028_v43, 9  ;;  %v6043_v35 = vld [vmem:[%s6996_s25 + $0x60] sm:$0xe]  ;;  %v6901_v43 = vld [vmem:[%s6996_s25 + $0x24] sm:$0xff]  }
  0xbd   : > { %v6003_v0 = vcombine.low %v2758_v44, %v2768_v58  ;;  %v2782_v1 = vsel %vm7055_vm6, %v2777_v52, %v2781_v36  ;;  %v2787_v2 = vrot.slane %v2786_v53, 4  ;;  %v3257_v9 = vsel %vm7048_vm5, %v3255_v60, %v3256_v49  ;;  %v6044_v36 = vld [vmem:[%s6996_s25 + $0x64] sm:$0xf]  ;;  %v6045_v41 = vld [vmem:[%s6996_s25 + $0x68] sm:$0x1]  ;;  %v6903_v58 = vld [vmem:[%s6996_s25 + $0x30] sm:$0xff]  }
  0xbe   : > { %v3261_v3 = vsel %vm7048_vm5, %v6071_v56, %v3260_v61  ;;  %v3262_v10 = vrot.slane %v3260_v61, 4  ;;  %v6088_v14 = vcombine.low %v3254_v59, %v3257_v9  ;;  %v3267_v15 = vrot.slane %v6029_v50, 5  ;;  %v6046_v49 = vld [vmem:[%s6996_s25 + $0x6c] sm:$0xe]  ;;  %v6047_v50 = vld [vmem:[%s6996_s25 + $0x70] sm:$0xf] }
  0xbf   : > { %6693 = vmatprep.mubr.msk.bf16.mxu0 %vm319_vm0, %v6003_v0  ;;  %v2792_v13 = vsel %vm7055_vm6, %v2787_v2, %v2791_v55  ;;  %v3270_v17 = vrot.slane %v6030_v51, 5  ;;  %v6073_v21 = vrot.slane %v6031_v57, 9  ;;  %v3274_v22 = vrot.slane %v6032_v62, 5  ;;  %v6048_v55 = vld [vmem:[%s6996_s25 + $0x74] sm:$0x1] }
  0xc0   : > { %v6004_v19 = vcombine.low %v2782_v1, %v2792_v13  ;;  %v3264_v20 = vsel %vm7048_vm5, %v3262_v10, %v3263_v4  ;;  %6699 = vmatprep.mubr.msk.bf16.mxu1 %vm319_vm0, %v6088_v14  ;;  %v3268_v25 = vsel %vm7048_vm5, %v6072_v11, %v3267_v15  ;;  %v3269_v26 = vrot.slane %v3267_v15, 4  ;;  %v6049_v56 = vld [vmem:[%s6996_s25 + $0x78] sm:$0xe]  ;;  %v6050_v57 = vld [vmem:[%s6996_s25 + $0x7c] sm:$0xf] }
  0xc1   : > { %v6089_v24 = vcombine.low %v3261_v3, %v3264_v20  ;;  %v3277_v27 = vrot.slane %v6033_v63, 5  ;;  %v3275_v31 = vsel %vm7048_vm5, %v6073_v21, %v3274_v22  ;;  %v3276_v32 = vrot.slane %v3274_v22, 4  ;;  %v6051_v4 = vld [vmem:[%s6996_s25 + $0x80] sm:$0x1]  ;;  %v6052_v3 = vld [vmem:[%s6996_s25 + $0x84] sm:$0xe] }
  0xc2   : > { %6694 = vmatmul.mubr.msk.bf16.gmra.mrb[76].mxu0 %vm319_vm0, %v6004_v19  ;;  %v6074_v33 = vrot.slane %v6034_v7, 9  ;;  %v3281_v34 = vrot.slane %v6035_v8, 5  ;;  %v3271_v37 = vsel %vm7048_vm5, %v3269_v26, %v3270_v17  ;;  %v3284_v38 = vrot.slane %v6036_v12, 5  ;;  %v6053_v10 = vld [vmem:[%s6996_s25 + $0x88] sm:$0xf] }
  0xc3   : > { %6700 = vmatmul.mubr.msk.bf16.vlgmr.msra.gmra.mrb[80].mxu1 %vm319_vm0, %v6089_v24  ;;  %6733 = vmatprep.mubr.msk.bf16.mxu0 %vm319_vm0, %v6900_v5  ;;  %v6075_v39 = vrot.slane %v6037_v6, 9  ;;  %v3288_v40 = vrot.slane %v6038_v18, 5  ;;  %v6090_v42 = vcombine.low %v3268_v25, %v3271_v37  ;;  %v3278_v44 = vsel %vm7048_vm5, %v3276_v32, %v3277_v27  ;;  %v6054_v11 = vld [vmem:[%s6996_s25 + $0x8c] sm:$0x1]  ;;  %v6055_v17 = vld [vmem:[%s6996_s25 + $0x90] sm:$0xe] }
  0xc4   : > { %6766 = vmatpush3.bf16.msra.mxu1 %v7337_v54  ;;  %v3282_v45 = vsel %vm7048_vm5, %v6074_v33, %v3281_v34  ;;  %v3283_v48 = vrot.slane %v3281_v34, 4  ;;  %v6091_v51 = vcombine.low %v3275_v31, %v3278_v44  ;;  %v3291_v54 = vrot.slane %v6039_v23, 5  ;;  %v6056_v6 = vld [vmem:[%s6996_s25 + $0x94] sm:$0xf]  ;;  %v6057_v22 = vld [vmem:[%s6996_s25 + $0x98] sm:$0x1] }
  0xc5   : > { %v7548_v52 = vsel %vm7048_vm5, %v6075_v39, %v3288_v40  ;;  %v3290_v53 = vrot.slane %v3288_v40, 4  ;;  %6703 = vmatprep.mubr.msk.bf16.mxu1 %vm319_vm0, %v6090_v42  ;;  %v6076_v60 = vrot.slane %v6040_v28, 9  ;;  %v3295_v61 = vrot.slane %v6041_v29, 5  ;;  %v6058_v27 = vld [vmem:[%s6996_s25 + $0x9c] sm:$0xe] }
  0xc6   : > { %v3285_v59 = vsel %vm7048_vm5, %v3283_v48, %v3284_v38  ;;  %v3298_v62 = vrot.slane %v6042_v30, 5  ;;  %v6077_v1 = vrot.slane %v6043_v35, 9  ;;  %v3302_v2 = vrot.slane %v6044_v36, 5  ;;  %v6059_v28 = vld [vmem:[%s6996_s25 + $0xa0] sm:$0xf]  ;;  %v6905_v35 = vld [vmem:[%s6996_s25 + $0x48] sm:$0xff]  }
  0xc7   : > { %v6092_v63 = vcombine.low %v3282_v45, %v3285_v59  ;;  %v7559_v0 = vsel %vm7048_vm5, %v3290_v53, %v3291_v54  ;;  %v7566_v7 = vsel %vm7048_vm5, %v6076_v60, %v3295_v61  ;;  %v3297_v8 = vrot.slane %v3295_v61, 4  ;;  %v6060_v33 = vld [vmem:[%s6996_s25 + $0xa4] sm:$0x1]  ;;  %v6061_v34 = vld [vmem:[%s6996_s25 + $0xa8] sm:$0xe] }
  0xc8   : > { %v6093_v5 = vcombine.low %v7548_v52, %v7559_v0  ;;  %v3305_v9 = vrot.slane %v6045_v41, 5  ;;  %v7573_v12 = vsel %vm7048_vm5, %v6077_v1, %v3302_v2  ;;  %v3304_v13 = vrot.slane %v3302_v2, 4  ;;  %v6062_v44 = vld [vmem:[%s6996_s25 + $0xac] sm:$0xf]  ;;  %v6063_v45 = vld [vmem:[%s6996_s25 + $0xb0] sm:$0x1] }
  0xc9   : > { %v6078_v14 = vrot.slane %v6046_v49, 9  ;;  %v3309_v15 = vrot.slane %v6047_v50, 5  ;;  %v7580_v18 = vsel %vm7048_vm5, %v3297_v8, %v3298_v62  ;;  %v3312_v19 = vrot.slane %v6048_v55, 5  ;;  %v6064_v53 = vld [vmem:[%s6996_s25 + $0xb4] sm:$0xe] }
  0xca   : > { %6734 = vmatmul.mubr.msk.bf16.vlgmr.msra.gmra.mrb[80].mxu0 %vm319_vm0, %v6901_v43  ;;  %v6079_v20 = vrot.slane %v6049_v56, 9  ;;  %v3316_v21 = vrot.slane %v6050_v57, 5  ;;  %v6094_v23 = vcombine.low %v7566_v7, %v7580_v18  ;;  %v7589_v24 = vsel %vm7048_vm5, %v3304_v13, %v3305_v9  ;;  %v6065_v54 = vld [vmem:[%s6996_s25 + $0xb8] sm:$0xf]  ;;  %v6066_v55 = vld [vmem:[%s6996_s25 + $0xbc] sm:$0x1] }
  0xcb   : > { %6704 = vmatmul.mubr.msk.bf16.gmra.mrb[84].mxu1 %vm319_vm0, %v6091_v51  ;;  %6800 = vmatpush3.bf16.msra.mxu0 %v7356_v16  ;;  %v7593_v25 = vsel %vm7048_vm5, %v6078_v14, %v3309_v15  ;;  %v3311_v26 = vrot.slane %v3309_v15, 4  ;;  %v6904_v16 = vld [vmem:[%s6996_s25 + $0x3c] sm:$0xff]   ;;  %v6095_v29 = vcombine.low %v7573_v12, %v7589_v24  ;;  %v3319_v32 = vrot.slane %v6051_v4, 5  ;;  %v6068_v9 = vld [vmem:[%s6996_s25 + $0xc4] sm:$0xf] }
  0xcc   : > { %6737 = vmatprep.mubr.msk.bf16.mxu0 %vm319_vm0, %v6903_v58  ;;  %6707 = vmatprep.mubr.msk.bf16.mxu1 %vm319_vm0, %v6092_v63  ;;  %v7604_v30 = vsel %vm7048_vm5, %v6079_v20, %v3316_v21  ;;  %v3318_v31 = vrot.slane %v3316_v21, 4  ;;  %v6080_v37 = vrot.slane %v6052_v3, 9  ;;  %v3323_v38 = vrot.slane %v6053_v10, 5  ;;  %v6067_v60 = vld [vmem:[%s6996_s25 + $0xc0] sm:$0xe] }
  0xcd   : > { %v7611_v36 = vsel %vm7048_vm5, %v3311_v26, %v3312_v19  ;;  %v3326_v39 = vrot.slane %v6054_v11, 5  ;;  %v6081_v42 = vrot.slane %v6055_v17, 9  ;;  %v3330_v43 = vrot.slane %v6056_v6, 5  ;;  %v6069_v14 = vld [vmem:[%s6996_s25 + $0xc8] sm:$0x1] }
  0xce   : > { %v6096_v40 = vcombine.low %v7593_v25, %v7611_v36  ;;  %v7617_v41 = vsel %vm7048_vm5, %v3318_v31, %v3319_v32  ;;  %v7625_v49 = vsel %vm7048_vm5, %v6080_v37, %v3323_v38  ;;  %v3325_v50 = vrot.slane %v3323_v38, 4  ;;  %v6188_v17 = vld [vmem:[%s6996_s25 + $0x18] sm:$0xf]  ;;  %v6189_v21 = vld [vmem:[%s6996_s25 + $0x1c] sm:$0xf]  ;;  %v6907_v31 = vld [vmem:[%s6996_s25 + $0x60] sm:$0xff]  }
  0xcf   : > { %v6097_v48 = vcombine.low %v7604_v30, %v7617_v41  ;;  %v3333_v51 = vrot.slane %v6057_v22, 5  ;;  %v7632_v56 = vsel %vm7048_vm5, %v6081_v42, %v3330_v43  ;;  %v3332_v57 = vrot.slane %v3330_v43, 4  ;;  %v6190_v22 = vld [vmem:[%s6996_s25 + $0x20] sm:$0x1]  ;;  %v6191_v37 = vld [vmem:[%s6996_s25 + $0x24] sm:$0xf] }
  0xd0   : > { %v6082_v58 = vrot.slane %v6058_v27, 9  ;;  %v3337_v59 = vrot.slane %v6059_v28, 5  ;;  %v7637_v61 = vsel %vm7048_vm5, %v3325_v50, %v3326_v39  ;;  %v3340_v62 = vrot.slane %v6060_v33, 5  ;;  %v6194_v24 = vld [vmem:[%s6996_s25 + $0x30] sm:$0xf] }
  0xd1   : > { %v6083_v63 = vrot.slane %v6061_v34, 9  ;;  %v3344_v1 = vrot.slane %v6062_v44, 5  ;;  %v6098_v2 = vcombine.low %v7625_v49, %v7637_v61  ;;  %v7644_v4 = vsel %vm7048_vm5, %v3332_v57, %v3333_v51  ;;  %v6192_v44 = vld [vmem:[%s6996_s25 + $0x28] sm:$0xf]  ;;  %v6199_v61 = vld [vmem:[%s6996_s25 + $0x44] sm:$0x1] }
  0xd2   : > { %6738 = vmatmul.mubr.msk.bf16.gmra.mrb[84].mxu0 %vm319_vm0, %v6904_v16  ;;  %v7648_v7 = vsel %vm7048_vm5, %v6082_v58, %v3337_v59  ;;  %v3339_v8 = vrot.slane %v3337_v59, 4  ;;  %v6099_v3 = vcombine.low %v7632_v56, %v7644_v4  ;;  %v3347_v13 = vrot.slane %v6063_v45, 5  ;;  %v6912_v56 = vld [vmem:[%s6996_s25 + $0x9c] sm:$0xff]  }
  0xd3   : > { %6708 = vmatmul.mubr.msk.bf16.gmra.mrb[88].mxu1 %vm319_vm0, %v6093_v5  ;;  %6741 = vmatprep.mubr.msk.bf16.mxu0 %vm319_vm0, %v6905_v35  ;;  %v7660_v10 = vsel %vm7048_vm5, %v6083_v63, %v3344_v1  ;;  %v3346_v11 = vrot.slane %v3344_v1, 4  ;;  %v6084_v0 = vrot.slane %v6064_v53, 9  ;;  %v3351_v5 = vrot.slane %v6065_v54, 5  ;;  %v6193_v54 = vld [vmem:[%s6996_s25 + $0x2c] sm:$0x1] }
  0xd4   : > { %6711 = vmatprep.mubr.msk.bf16.mxu1 %vm319_vm0, %v6094_v23  ;;  %v7666_v52 = vsel %vm7048_vm5, %v3339_v8, %v3340_v62  ;;  %v3354_v15 = vrot.slane %v6066_v55, 5  ;;  %v6085_v19 = vrot.slane %v6067_v60, 9  ;;  %v3358_v20 = vrot.slane %v6068_v9, 5  ;;  %v6906_v23 = vld [vmem:[%s6996_s25 + $0x54] sm:$0xff]   ;;  %v6272_v62 = vld [vmem:[%s6996_s25 + $0x1c] sm:$0xf] }
  0xd5   : > { %v6100_v6 = vcombine.low %v7648_v7, %v7666_v52  ;;  %v7673_v18 = vsel %vm7048_vm5, %v3346_v11, %v3347_v13  ;;  %v7682_v27 = vsel %vm7048_vm5, %v6084_v0, %v3351_v5  ;;  %v3353_v28 = vrot.slane %v3351_v5, 4  ;;  %v6271_v55 = vld [vmem:[%s6996_s25 + $0x18] sm:$0xe]  ;;  %v6273_v11 = vld [vmem:[%s6996_s25 + $0x20] sm:$0x1] }
  0xd6   : > { %v6101_v26 = vcombine.low %v7660_v10, %v7673_v18  ;;  %v3361_v16 = vrot.slane %v6069_v14, 5  ;;  %v7687_v32 = vsel %vm7048_vm5, %v6085_v19, %v3358_v20  ;;  %v3360_v33 = vrot.slane %v3358_v20, 4  ;;  %v6282_v7 = vld [vmem:[%s6996_s25 + $0x44] sm:$0x1] }
  0xd7   : > { %v4204_v34 = vshrl.u32 %v6188_v17, 16  ;;  %v4207_v35 = vshll.u32 %v6188_v17, 16  ;;  %v7693_v38 = vsel %vm7048_vm5, %v3353_v28, %v3354_v15  ;;  %v4213_v39 = vshll.u32 %v6189_v21, 16 }
  0xd8   : > { %v4217_v42 = vshrl.u32 %v6189_v21, 16  ;;  %v4223_v43 = vshll.u32 %v6190_v22, 16  ;;  %v6102_v45 = vcombine.low %v7682_v27, %v7693_v38  ;;  %v7700_v50 = vsel %vm7048_vm5, %v3360_v33, %v3361_v16  ;;  %v6909_v21 = vld [vmem:[%s6996_s25 + $0x78] sm:$0xff]  }
  0xd9   : > { %v4206_v51 = vrot.slane %v4204_v34, 4  ;;  %v4209_v53 = vrot.slane %v4207_v35, 5  ;;  %v6103_v57 = vcombine.low %v7687_v32, %v7700_v50  ;;  %v4215_v58 = vrot.slane %v4213_v39, 5  ;;  %v6195_v35 = vld [vmem:[%s6996_s25 + $0x34] sm:$0xf] }
  0xda   : > { %6742 = vmatmul.mubr.msk.bf16.gmra.mrb[88].mxu0 %vm319_vm0, %v6906_v23  ;;  %v4219_v59 = vrot.slane %v4217_v42, 4  ;;  %v4225_v60 = vrot.slane %v4223_v43, 5  ;;  %v4228_v1 = vshrl.u32 %v6191_v37, 16  ;;  %v4231_v8 = vshll.u32 %v6191_v37, 16 }
  0xdb   : > { %6712 = vmatmul.mubr.msk.bf16.gmra.mrb[92].mxu1 %vm319_vm0, %v6095_v29  ;;  %6745 = vmatprep.mubr.msk.bf16.mxu0 %vm319_vm0, %v6907_v31  ;;  %v4210_v63 = vor.u32 %v4209_v53, %v4206_v51  ;;  %v4237_v9 = vshll.u32 %v6192_v44, 16  ;;  %v4241_v14 = vshrl.u32 %v6192_v44, 16  ;;  %v4247_v0 = vshll.u32 %v6193_v54, 16  ;;  %v6908_v29 = vld [vmem:[%s6996_s25 + $0x6c] sm:$0xff]   ;;  %v6196_v54 = vld [vmem:[%s6996_s25 + $0x38] sm:$0x1] }
  0xdc   : > { %6715 = vmatprep.mubr.msk.bf16.mxu1 %vm319_vm0, %v6096_v40  ;;  %v4220_v13 = vor.u32 %v4219_v59, %v4215_v58  ;;  %v6319_v12 = vrot.slane %v6271_v55, 9  ;;  %v4230_v17 = vrot.slane %v4228_v1, 4  ;;  %v4233_v19 = vrot.slane %v4231_v8, 5 }
  0xdd   : > { %v4211_v15 = vrot.slane %v4210_v63, 4  ;;  %v4239_v20 = vrot.slane %v4237_v9, 5  ;;  %v4243_v40 = vrot.slane %v4241_v14, 4  ;;  %v4249_v22 = vrot.slane %v4247_v0, 5  ;;  %v6275_v14 = vld [vmem:[%s6996_s25 + $0x28] sm:$0xf] }
  0xde   : > { %v4221_v36 = vrot.slane %v4220_v13, 4  ;;  %v5047_v23 = vrot.slane %v6272_v62, 5  ;;  %v4234_v33 = vor.u32 %v4233_v19, %v4230_v17  ;;  %v5050_v34 = vrot.slane %v6273_v11, 5  ;;  %v6198_v19 = vld [vmem:[%s6996_s25 + $0x40] sm:$0xf] }
  0xdf   : > { %v4216_v31 = vsel %vm7055_vm6, %v4211_v15, %v4215_v58  ;;  %v4252_v37 = vshrl.u32 %v6194_v24, 16  ;;  %v4244_v44 = vor.u32 %v4243_v40, %v4239_v20  ;;  %v4255_v63 = vshll.u32 %v6194_v24, 16  ;;  %v6197_v15 = vld [vmem:[%s6996_s25 + $0x3c] sm:$0xf] }
  0xe0   : > { %v4226_v43 = vsel %vm7055_vm6, %v4221_v36, %v4225_v60  ;;  %v7741_v51 = vsel %vm7048_vm5, %v6319_v12, %v5047_v23  ;;  %v5049_v53 = vrot.slane %v5047_v23, 4  ;;  %v4235_v59 = vrot.slane %v4234_v33, 4  ;;  %v6274_v60 = vld [vmem:[%s6996_s25 + $0x24] sm:$0xe]  ;;  %v6278_v33 = vld [vmem:[%s6996_s25 + $0x34] sm:$0xf] }
  0xe1   : > { %v7748_v58 = vcombine.low %v4216_v31, %v4226_v43  ;;  %v4254_v62 = vrot.slane %v4252_v37, 4  ;;  %v4245_v8 = vrot.slane %v4244_v44, 4  ;;  %v4261_v11 = vshll.u32 %v6195_v35, 16  ;;  %v6277_v31 = vld [vmem:[%s6996_s25 + $0x30] sm:$0xe] }
  0xe2   : > { %6746 = vmatmul.mubr.msk.bf16.gmra.mrb[92].mxu0 %vm319_vm0, %v6908_v29  ;;  %v7756_v9 = vsel %vm7048_vm5, %v5049_v53, %v5050_v34  ;;  %v4265_v13 = vshrl.u32 %v6195_v35, 16  ;;  %v4240_v0 = vsel %vm7055_vm6, %v4235_v59, %v4239_v20  ;;  %v4257_v24 = vrot.slane %v4255_v63, 5  ;;  %v6910_v20 = vld [vmem:[%s6996_s25 + $0x84] sm:$0xff]   ;;  %v6911_v34 = vld [vmem:[%s6996_s25 + $0x90] sm:$0xff]   ;;  %v6279_v53 = vld [vmem:[%s6996_s25 + $0x38] sm:$0x1] }
  0xe3   : > { %6716 = vmatmul.mubr.msk.bf16.gmra.mrb[96].mxu1 %vm319_vm0, %v6097_v48  ;;  %6749 = vmatprep.mubr.msk.bf16.mxu0 %vm319_vm0, %v6909_v21  ;;  %v6337_v12 = vcombine.low %v7741_v51, %v7756_v9  ;;  %v4271_v29 = vshll.u32 %v6196_v54, 16  ;;  %v4250_v30 = vsel %vm7055_vm6, %v4245_v8, %v4249_v22  ;;  %v4263_v41 = vrot.slane %v4261_v11, 5 }
  0xe4   : > { %6719 = vmatprep.mubr.msk.bf16.mxu1 %vm319_vm0, %v6098_v2  ;;  %v4267_v48 = vrot.slane %v4265_v13, 4  ;;  %v6320_v17 = vrot.slane %v6274_v60, 9  ;;  %v4258_v36 = vor.u32 %v4257_v24, %v4254_v62  ;;  %v5054_v49 = vrot.slane %v6275_v14, 5 }
  0xe5   : > { %v4273_v40 = vrot.slane %v4271_v29, 5  ;;  %v4285_v44 = vshll.u32 %v6198_v19, 16  ;;  %v4289_v60 = vshrl.u32 %v6198_v19, 16  ;;  %v4295_v14 = vshll.u32 %v6199_v61, 16  ;;  %v6281_v61 = vld [vmem:[%s6996_s25 + $0x40] sm:$0xf] }
  0xe6   : > { %v4268_v22 = vor.u32 %v4267_v48, %v4263_v41  ;;  %v5056_v43 = vrot.slane %v5054_v49, 4  ;;  %v6202_v48 = vld [vmem:[%s6996_s25 + $0x50] sm:$0x1] }
  0xe7   : > { %v6547_v5 = vpop.f32.mrb[0].mxu1  ;;  %v4287_v13 = vrot.slane %v4285_v44, 5  ;;  %v4297_v19 = vrot.slane %v4295_v14, 5 }
  0xe8   : > { %547 = vst.msk [vmem:[%s7711_s21 + $0x90] sm:$0xff] %vm319_vm0, %v6547_v5  ;;  %v466_v25 = vpop.f32.mrb[1].mxu1  ;;  %v6531_v16 = vpop.f32.mrb[0].mxu0  ;;  %v6276_v5 = vld [vmem:[%s6996_s25 + $0x2c] sm:$0x1]  ;;  %v4269_v59 = vrot.slane %v4268_v22, 4 }
  0xe9   : > { %545 = vst.msk [vmem:[%s7711_s21 + $0x80] sm:$0xff] %vm319_vm0, %v466_v25  ;;  %v6548_v28 = vpop.f32.mrb[2].mxu1  ;;  %531 = vst.msk [vmem:[%s7711_s21 + $0x10] sm:$0xff] %vm319_vm0, %v6531_v16  ;;  %v402_v42 = vpop.f32.mrb[1].mxu0  ;;  %v7780_v25 = vcombine.low %v4240_v0, %v4250_v30  ;;  %v5057_v23 = vrot.slane %v6276_v5, 5  ;;  %v4279_v16 = vshll.u32 %v6197_v15, 16 }
  0xea   : > { %548 = vst.msk [vmem:[%s7711_s21 + $0x98] sm:$0xff] %vm319_vm0, %v6548_v28  ;;  %v469_v39 = vpop.f32.mrb[3].mxu1  ;;  %529 = vst.msk [vmem:[%s7711_s21] sm:$0xff] %vm319_vm0, %v402_v42  ;;  %v6532_v55 = vpop.f32.mrb[2].mxu0  ;;  %v4276_v28 = vshrl.u32 %v6197_v15, 16  ;;  %v7792_v42 = vsel %vm7048_vm5, %v6320_v17, %v5054_v49  ;;  %6750 = vmatmul.mubr.msk.bf16.gmra.mrb[96].mxu0 %vm319_vm0, %v6910_v20  ;;  %v4274_v29 = vsel %vm7055_vm6, %v4269_v59, %v4273_v40  ;;  %v4291_v30 = vrot.slane %v4289_v60, 4 }
  0xeb   : > { %546 = vst.msk [vmem:[%s7711_s21 + $0x88] sm:$0xff] %vm319_vm0, %v469_v39  ;;  %532 = vst.msk [vmem:[%s7711_s21 + $0x18] sm:$0xff] %vm319_vm0, %v6532_v55  ;;  %v405_v1 = vpop.f32.mrb[3].mxu0  ;;  %v4259_v39 = vrot.slane %v4258_v36, 4  ;;  %v4281_v63 = vrot.slane %v4279_v16, 5  ;;  %v7807_v11 = vsel %vm7048_vm5, %v5056_v43, %v5057_v23  ;;  %6720 = vmatmul.mubr.msk.bf16.gmra.mrb[100].mxu1 %vm319_vm0, %v6099_v3  ;;  %6753 = vmatprep.mubr.msk.bf16.mxu0 %vm319_vm0, %v6911_v34  ;;  %v6321_v20 = vrot.slane %v6277_v31, 9 }
  0xec   : > { %530 = vst.msk [vmem:[%s7711_s21 + $0x8] sm:$0xff] %vm319_vm0, %v405_v1  ;;  %v4278_v62 = vrot.slane %v4276_v28, 4  ;;  %v6200_v0 = vld [vmem:[%s6996_s25 + $0x48] sm:$0xf]  ;;  %v6338_v5 = vcombine.low %v7792_v42, %v7807_v11  ;;  %v6280_v36 = vld [vmem:[%s6996_s25 + $0x3c] sm:$0xe]  ;;  %6723 = vmatprep.mubr.msk.bf16.mxu1 %vm319_vm0, %v6100_v6  ;;  %v4292_v3 = vor.u32 %v4291_v30, %v4287_v13 }
  0xed   : > { %v4264_v8 = vsel %vm7055_vm6, %v4259_v39, %v4263_v41  ;;  %v6201_v41 = vld [vmem:[%s6996_s25 + $0x4c] sm:$0xf]  ;;  %v5064_v40 = vrot.slane %v6279_v53, 5  ;;  %v4300_v49 = vshrl.u32 %v6200_v0, 16  ;;  %v4303_v28 = vshll.u32 %v6200_v0, 16 }
  0xee   : > { %v4282_v15 = vor.u32 %v4281_v63, %v4278_v62  ;;  %v7826_v17 = vcombine.low %v4264_v8, %v4274_v29  ;;  %v4309_v16 = vshll.u32 %v6201_v41, 16  ;;  %v4293_v31 = vrot.slane %v4292_v3, 4  ;;  %v6205_v30 = vld [vmem:[%s6996_s25 + $0x5c] sm:$0x1]  ;;  %v6215_v42 = vld [vmem:[%s6996_s25 + $0x84] sm:$0xf] }
  0xef   : > { %v6551_v21 = vpop.f32.mrb[4].mxu1  ;;  %v4313_v34 = vshrl.u32 %v6201_v41, 16  ;;  %v4305_v53 = vrot.slane %v4303_v28, 5  ;;  %v6322_v8 = vrot.slane %v6280_v36, 9  ;;  %v6283_v36 = vld [vmem:[%s6996_s25 + $0x48] sm:$0xe] }
  0xf0   : > { %551 = vst.msk [vmem:[%s7711_s21 + $0xb0] sm:$0xff] %vm319_vm0, %v6551_v21  ;;  %v482_v2 = vpop.f32.mrb[5].mxu1  ;;  %v6535_v37 = vpop.f32.mrb[4].mxu0  ;;  %v5061_v21 = vrot.slane %v6278_v33, 5  ;;  %v4283_v4 = vrot.slane %v4282_v15, 4  ;;  %v4302_v33 = vrot.slane %v4300_v49, 4  ;;  %v4298_v62 = vsel %vm7055_vm6, %v4293_v31, %v4297_v19 }
  0xf1   : > { %549 = vst.msk [vmem:[%s7711_s21 + $0xa0] sm:$0xff] %vm319_vm0, %v482_v2  ;;  %v6552_v35 = vpop.f32.mrb[6].mxu1  ;;  %535 = vst.msk [vmem:[%s7711_s21 + $0x30] sm:$0xff] %vm319_vm0, %v6535_v37  ;;  %v418_v55 = vpop.f32.mrb[5].mxu0  ;;  %v6913_v37 = vld [vmem:[%s6996_s25 + $0xa8] sm:$0xff]   ;;  %v5068_v15 = vrot.slane %v6281_v61, 5 }
  0xf2   : > { %552 = vst.msk [vmem:[%s7711_s21 + $0xb8] sm:$0xff] %vm319_vm0, %v6552_v35  ;;  %v485_v54 = vpop.f32.mrb[7].mxu1  ;;  %533 = vst.msk [vmem:[%s7711_s21 + $0x20] sm:$0xff] %vm319_vm0, %v418_v55  ;;  %v6536_v1 = vpop.f32.mrb[6].mxu0  ;;  %v7837_v22 = vsel %vm7048_vm5, %v6321_v20, %v5061_v21  ;;  %v5063_v23 = vrot.slane %v5061_v21, 4  ;;  %v4288_v6 = vsel %vm7055_vm6, %v4283_v4, %v4287_v13  ;;  %v4319_v55 = vshll.u32 %v6202_v48, 16  ;;  %6754 = vmatmul.mubr.msk.bf16.gmra.mrb[100].mxu0 %vm319_vm0, %v6912_v56 }
  0xf3   : > { %550 = vst.msk [vmem:[%s7711_s21 + $0xa8] sm:$0xff] %vm319_vm0, %v485_v54  ;;  %536 = vst.msk [vmem:[%s7711_s21 + $0x38] sm:$0xff] %vm319_vm0, %v6536_v1  ;;  %v421_v24 = vpop.f32.mrb[7].mxu0  ;;  %v6203_v35 = vld [vmem:[%s6996_s25 + $0x54] sm:$0xf]  ;;  %v4311_v54 = vrot.slane %v4309_v16, 5  ;;  %v7863_v14 = vcombine.low %v4288_v6, %v4298_v62  ;;  %6724 = vmatmul.mubr.msk.bf16.gmra.mrb[104].mxu1 %vm319_vm0, %v6101_v26  ;;  %6757 = vmatprep.mubr.msk.bf16.mxu0 %vm319_vm0, %v6913_v37  ;;  %v7881_v4 = vsel %vm7048_vm5, %v6322_v8, %v5068_v15 }
  0xf4   : > { %534 = vst.msk [vmem:[%s7711_s21 + $0x28] sm:$0xff] %vm319_vm0, %v421_v24  ;;  %v7850_v44 = vsel %vm7048_vm5, %v5063_v23, %v5064_v40  ;;  %v4315_v1 = vrot.slane %v4313_v34, 4  ;;  %v6204_v13 = vld [vmem:[%s6996_s25 + $0x58] sm:$0xf]  ;;  %v4306_v24 = vor.u32 %v4305_v53, %v4302_v33  ;;  %v4321_v29 = vrot.slane %v4319_v55, 5  ;;  %6727 = vmatprep.mubr.msk.bf16.mxu1 %vm319_vm0, %v6102_v45  ;;  %v1264_v50 = vld [vmem:[%s7711_s21 + $0x10] sm:$0xff] }
  0xf5   : > { %v6339_v60 = vcombine.low %v7837_v22, %v7850_v44  ;;  %v5071_v19 = vrot.slane %v6282_v7, 5  ;;  %v4324_v20 = vshrl.u32 %v6203_v35, 16  ;;  %v4327_v21 = vshll.u32 %v6203_v35, 16  ;;  %v6284_v49 = vld [vmem:[%s6996_s25 + $0x4c] sm:$0xf]  ;;  %v6914_v23 = vld [vmem:[%s6996_s25 + $0xb4] sm:$0xff]  }
  0xf6   : > { %v4316_v48 = vor.u32 %v4315_v1, %v4311_v54  ;;  %v4307_v56 = vrot.slane %v4306_v24, 4  ;;  %v5070_v3 = vrot.slane %v5068_v15, 4  ;;  %v4333_v40 = vshll.u32 %v6204_v13, 16  ;;  %v6206_v45 = vld [vmem:[%s6996_s25 + $0x60] sm:$0xf] }
  0xf7   : > { %v6555_v2 = vpop.f32.mrb[8].mxu1  ;;  %v4326_v18 = vrot.slane %v4324_v20, 4  ;;  %v4329_v26 = vrot.slane %v4327_v21, 5  ;;  %v4337_v61 = vshrl.u32 %v6204_v13, 16  ;;  %v4343_v38 = vshll.u32 %v6205_v30, 16 }
  0xf8   : > { %555 = vst.msk [vmem:[%s7711_s21 + $0xd0] sm:$0xff] %vm319_vm0, %v6555_v2  ;;  %v498_v52 = vpop.f32.mrb[9].mxu1  ;;  %v6539_v43 = vpop.f32.mrb[8].mxu0  ;;  %v4317_v10 = vrot.slane %v4316_v48, 4  ;;  %v6285_v2 = vld [vmem:[%s6996_s25 + $0x50] sm:$0x1]  ;;  %v4312_v16 = vsel %vm7055_vm6, %v4307_v56, %v4311_v54  ;;  %v7894_v7 = vsel %vm7048_vm5, %v5070_v3, %v5071_v19 }
  0xf9   : > { %553 = vst.msk [vmem:[%s7711_s21 + $0xc0] sm:$0xff] %vm319_vm0, %v498_v52  ;;  %v6556_v39 = vpop.f32.mrb[10].mxu1  ;;  %539 = vst.msk [vmem:[%s7711_s21 + $0x50] sm:$0xff] %vm319_vm0, %v6539_v43  ;;  %v434_v63 = vpop.f32.mrb[9].mxu0  ;;  %v4335_v27 = vrot.slane %v4333_v40, 5  ;;  %v6340_v31 = vcombine.low %v7881_v4, %v7894_v7  ;;  %v4330_v33 = vor.u32 %v4329_v26, %v4326_v18  ;;  %v4339_v34 = vrot.slane %v4337_v61, 4 }
  0xfa   : > { %556 = vst.msk [vmem:[%s7711_s21 + $0xd8] sm:$0xff] %vm319_vm0, %v6556_v39  ;;  %v501_v59 = vpop.f32.mrb[11].mxu1  ;;  %537 = vst.msk [vmem:[%s7711_s21 + $0x40] sm:$0xff] %vm319_vm0, %v434_v63  ;;  %v6540_v0 = vpop.f32.mrb[10].mxu0  ;;  %v4322_v6 = vsel %vm7055_vm6, %v4317_v10, %v4321_v29  ;;  %v6207_v35 = vld [vmem:[%s6996_s25 + $0x64] sm:$0xf]  ;;  %6758 = vmatmul.mubr.msk.bf16.gmra.mrb[104].mxu0 %vm319_vm0, %v6914_v23 }
  0xfb   : > { %554 = vst.msk [vmem:[%s7711_s21 + $0xc8] sm:$0xff] %vm319_vm0, %v501_v59  ;;  %540 = vst.msk [vmem:[%s7711_s21 + $0x58] sm:$0xff] %vm319_vm0, %v6540_v0  ;;  %v437_v41 = vpop.f32.mrb[11].mxu0  ;;  %v6208_v37 = vld [vmem:[%s6996_s25 + $0x68] sm:$0x1]  ;;  %v6915_v39 = vld [vmem:[%s6996_s25 + $0xc0] sm:$0xff]   ;;  %v7908_v53 = vcombine.low %v4312_v16, %v4322_v6  ;;  %v4340_v13 = vor.u32 %v4339_v34, %v4335_v27  ;;  %6728 = vmatmul.mubr.msk.bf16.gmra.mrb[108].mxu1 %vm319_vm0, %v6103_v57 }
  0xfc   : > { %538 = vst.msk [vmem:[%s7711_s21 + $0x48] sm:$0xff] %vm319_vm0, %v437_v41  ;;  %v4345_v54 = vrot.slane %v4343_v38, 5  ;;  %v6323_v59 = vrot.slane %v6283_v36, 9  ;;  %v5075_v62 = vrot.slane %v6284_v49, 5  ;;  %v6286_v63 = vld [vmem:[%s6996_s25 + $0x54] sm:$0xe]  ;;  %6761 = vmatprep.mubr.msk.bf16.mxu0 %vm319_vm0, %v6915_v39  ;;  %6767 = vmatprep.mubr.msk.bf16.mxu1 %vm319_vm0, %v7748_v58 }
  0xfd   : > { %v4331_v8 = vrot.slane %v4330_v33, 4  ;;  %v5078_v24 = vrot.slane %v6285_v2, 5  ;;  %v4348_v29 = vshrl.u32 %v6206_v45, 16  ;;  %v4351_v48 = vshll.u32 %v6206_v45, 16  ;;  %v6287_v20 = vld [vmem:[%s6996_s25 + $0x58] sm:$0xf] }
  0xfe   : > { %v7921_v30 = vsel %vm7048_vm5, %v6323_v59, %v5075_v62  ;;  %v5077_v41 = vrot.slane %v5075_v62, 4  ;;  %v4357_v19 = vshll.u32 %v6207_v35, 16  ;;  %v4341_v36 = vrot.slane %v4340_v13, 4  ;;  %v6288_v49 = vld [vmem:[%s6996_s25 + $0x5c] sm:$0x1]  ;;  %v6916_v23 = vld [vmem:[%s6996_s25 + $0xcc] sm:$0xff]  }
  0xff   : > { %v6559_v28 = vpop.f32.mrb[12].mxu1  ;;  %v4336_v21 = vsel %vm7055_vm6, %v4331_v8, %v4335_v27  ;;  %v4350_v3 = vrot.slane %v4348_v29, 4  ;;  %v4361_v40 = vshrl.u32 %v6207_v35, 16  ;;  %v4353_v18 = vrot.slane %v4351_v48, 5  ;;  %v6209_v2 = vld [vmem:[%s6996_s25 + $0x6c] sm:$0xf] }
 0x100   : > { %559 = vst.msk [vmem:[%s7711_s21 + $0xf0] sm:$0xff] %vm319_vm0, %v6559_v28  ;;  %v514_v52 = vpop.f32.mrb[13].mxu1  ;;  %v6543_v55 = vpop.f32.mrb[12].mxu0  ;;  %v7939_v10 = vsel %vm7048_vm5, %v5077_v41, %v5078_v24  ;;  %v4359_v26 = vrot.slane %v4357_v19, 5  ;;  %v4367_v61 = vshll.u32 %v6208_v37, 16  ;;  %v4346_v32 = vsel %vm7055_vm6, %v4341_v36, %v4345_v54  ;;  %v1262_v45 = vld [vmem:[%s7711_s21] sm:$0xff] }
 0x101   : > { %557 = vst.msk [vmem:[%s7711_s21 + $0xe0] sm:$0xff] %vm319_vm0, %v514_v52  ;;  %v6560_v43 = vpop.f32.mrb[14].mxu1  ;;  %543 = vst.msk [vmem:[%s7711_s21 + $0x70] sm:$0xff] %vm319_vm0, %v6543_v55  ;;  %v450_v0 = vpop.f32.mrb[13].mxu0  ;;  %v6341_v57 = vcombine.low %v7921_v30, %v7939_v10  ;;  %v4363_v28 = vrot.slane %v4361_v40, 4  ;;  %v6324_v16 = vrot.slane %v6286_v63, 9  ;;  %v7950_v27 = vcombine.low %v4336_v21, %v4346_v32 }
 0x102   : > { %560 = vst.msk [vmem:[%s7711_s21 + $0xf8] sm:$0xff] %vm319_vm0, %v6560_v43  ;;  %v517_v1 = vpop.f32.mrb[15].mxu1  ;;  %541 = vst.msk [vmem:[%s7711_s21 + $0x60] sm:$0xff] %vm319_vm0, %v450_v0  ;;  %v6544_v15 = vpop.f32.mrb[14].mxu0  ;;  %v4354_v52 = vor.u32 %v4353_v18, %v4350_v3  ;;  %v4369_v6 = vrot.slane %v4367_v61, 5  ;;  %v5082_v33 = vrot.slane %v6287_v20, 5  ;;  %6762 = vmatmul.mubr.msk.bf16.gmra.mrb[108].mxu0 %vm319_vm0, %v6916_v23 }
 0x103   : > { %558 = vst.msk [vmem:[%s7711_s21 + $0xe8] sm:$0xff] %vm319_vm0, %v517_v1  ;;  %544 = vst.msk [vmem:[%s7711_s21 + $0x78] sm:$0xff] %vm319_vm0, %v6544_v15  ;;  %v453_v56 = vpop.f32.mrb[15].mxu0  ;;  %v6210_v58 = vld [vmem:[%s6996_s25 + $0x70] sm:$0xf]  ;;  %v1265_v37 = vld [vmem:[%s7711_s21 + $0x18] sm:$0xff]  ;;  %v4364_v39 = vor.u32 %v4363_v28, %v4359_v26  ;;  %6768 = vmatmul.mubr.msk.bf16.vlgmr.msra.gmra.mrb[112].mxu1 %vm319_vm0, %v7780_v25  ;;  %6801 = vmatprep.mubr.msk.bf16.mxu0 %vm319_vm0, %v6337_v12 }
 0x104   : > { %542 = vst.msk [vmem:[%s7711_s21 + $0x68] sm:$0xff] %vm319_vm0, %v453_v56  ;;  %v5085_v43 = vrot.slane %v6288_v49, 5  ;;  %v6211_v54 = vld [vmem:[%s6996_s25 + $0x74] sm:$0x1]  ;;  %v4372_v55 = vshrl.u32 %v6209_v2, 16  ;;  %v4355_v1 = vrot.slane %v4354_v52, 4  ;;  %v7959_v8 = vsel %vm7048_vm5, %v6324_v16, %v5082_v33  ;;  %6771 = vmatprep.mubr.msk.bf16.mxu1 %vm319_vm0, %v7826_v17 }
 0x105   : > { %v6289_v59 = vld [vmem:[%s6996_s25 + $0x60] sm:$0xe]  ;;  %v5084_v13 = vrot.slane %v5082_v33, 4  ;;  %v6290_v24 = vld [vmem:[%s6996_s25 + $0x64] sm:$0xf]  ;;  %v1263_v41 = vld [vmem:[%s7711_s21 + $0x8] sm:$0xff] }
 0x106   : > { %v4365_v48 = vrot.slane %v4364_v39, 4  ;;  %v4374_v19 = vrot.slane %v4372_v55, 4  ;;  %v4375_v20 = vshll.u32 %v6209_v2, 16  ;;  %v4360_v56 = vsel %vm7055_vm6, %v4355_v1, %v4359_v26  ;;  %v6291_v18 = vld [vmem:[%s6996_s25 + $0x68] sm:$0x1]  ;;  %v1269_v1 = vld [vmem:[%s7711_s21 + $0x38] sm:$0xff] }
 0x107   : > { %v6565_v38 = vpop.f32.mrb[16].mxu1  ;;  %v7971_v3 = vsel %vm7048_vm5, %v5084_v13, %v5085_v43  ;;  %v4381_v40 = vshll.u32 %v6210_v58, 16  ;;  %v6212_v61 = vld [vmem:[%s6996_s25 + $0x78] sm:$0xf]  ;;  %v7987_v16 = vld [vmem:[%s6996_s25 + $0x7c] sm:$0xf] }
 0x108   : > { %v1296_v34 = vadd.f32 %v6565_v38, %v1264_v50  ;;  %v1135_v35 = vpop.f32.mrb[17].mxu1  ;;  %v6599_v0 = vpop.f32.mrb[16].mxu0  ;;  %v4370_v2 = vsel %vm7055_vm6, %v4365_v48, %v4369_v6  ;;  %v6342_v26 = vcombine.low %v7959_v8, %v7971_v3  ;;  %v4377_v32 = vrot.slane %v4375_v20, 5  ;;  %v1268_v43 = vld [vmem:[%s7711_s21 + $0x30] sm:$0xff]  ;;  %v6214_v13 = vld [vmem:[%s6996_s25 + $0x80] sm:$0x1] }
 0x109   : > { %v1294_v62 = vadd.f32 %v1262_v45, %v1135_v35  ;;  %v6566_v63 = vpop.f32.mrb[18].mxu1  ;;  %v1708_v21 = vpop.f32.mrb[17].mxu0  ;;  %v4385_v50 = vshrl.u32 %v6210_v58, 16  ;;  %v7997_v23 = vcombine.low %v4360_v56, %v4370_v2  ;;  %v4383_v38 = vrot.slane %v4381_v40, 5  ;;  %v1267_v40 = vld [vmem:[%s7711_s21 + $0x28] sm:$0xff] }
 0x10a   : > { %1328 = vst.msk [vmem:[%s7711_s21 + $0x10] sm:$0xff] %vm319_vm0, %v1296_v34  ;;  %v1297_v29 = vadd.f32 %v6566_v63, %v1265_v37  ;;  %v1138_v15 = vpop.f32.mrb[19].mxu1  ;;  %v7973_v49 = vpop.f32.mrb[18].mxu0  ;;  %v4391_v45 = vshll.u32 %v6211_v54, 16  ;;  %v6325_v52 = vrot.slane %v6289_v59, 9  ;;  %v4378_v6 = vor.u32 %v4377_v32, %v4374_v19  ;;  %v1266_v54 = vld [vmem:[%s7711_s21 + $0x20] sm:$0xff]  ;;  %6802 = vmatmul.mubr.msk.bf16.vlgmr.msra.gmra.mrb[112].mxu0 %vm319_vm0, %v6338_v5 }
 0x10b   : > { %1326 = vst.msk [vmem:[%s7711_s21] sm:$0xff] %vm319_vm0, %v1294_v62  ;;  %v1295_v36 = vadd.f32 %v1263_v41, %v1138_v15  ;;  %v7984_v28 = vpop.f32.mrb[19].mxu0  ;;  %v4387_v25 = vrot.slane %v4385_v50, 4  ;;  %v5089_v33 = vrot.slane %v6290_v24, 5  ;;  %v5092_v51 = vrot.slane %v6291_v18, 5  ;;  %6772 = vmatmul.mubr.msk.bf16.gmra.mrb[116].mxu1 %vm319_vm0, %v7863_v14  ;;  %6805 = vmatprep.mubr.msk.bf16.mxu0 %vm319_vm0, %v6339_v60 }
 0x10c   : > { %1329 = vst.msk [vmem:[%s7711_s21 + $0x18] sm:$0xff] %vm319_vm0, %v1297_v29  ;;  %v4393_v9 = vrot.slane %v4391_v45, 5  ;;  %v4396_v12 = vshrl.u32 %v6212_v61, 16  ;;  %v4399_v58 = vshll.u32 %v6212_v61, 16  ;;  %v4405_v34 = vshll.u32 %v7987_v16, 16  ;;  %6775 = vmatprep.mubr.msk.bf16.mxu1 %vm319_vm0, %v7908_v53 }
 0x10d   : > { %1327 = vst.msk [vmem:[%s7711_s21 + $0x8] sm:$0xff] %vm319_vm0, %v1295_v36  ;;  %v4379_v35 = vrot.slane %v4378_v6, 4  ;;  %v4388_v37 = vor.u32 %v4387_v25, %v4383_v38  ;;  %v8006_v17 = vsel %vm7048_vm5, %v6325_v52, %v5089_v33  ;;  %v5091_v55 = vrot.slane %v5089_v33, 4  ;;  %v6292_v18 = vld [vmem:[%s6996_s25 + $0x6c] sm:$0xe] }
 0x10e   : > { %v4398_v24 = vrot.slane %v4396_v12, 4  ;;  %v4401_v29 = vrot.slane %v4399_v58, 5  ;;  %v8011_v15 = vrot.slane %v4405_v34, 5  ;;  %v6293_v45 = vld [vmem:[%s6996_s25 + $0x70] sm:$0xf]  ;;  %v4409_v12 = vshrl.u32 %v7987_v16, 16 }
 0x10f   : > { %v6569_v39 = vpop.f32.mrb[20].mxu1  ;;  %v4384_v41 = vsel %vm7055_vm6, %v4379_v35, %v4383_v38  ;;  %v4389_v48 = vrot.slane %v4388_v37, 4  ;;  %v8023_v38 = vsel %vm7048_vm5, %v5091_v55, %v5092_v51  ;;  %v6294_v52 = vld [vmem:[%s6996_s25 + $0x74] sm:$0x1]  ;;  %v6216_v11 = vld [vmem:[%s6996_s25 + $0x88] sm:$0xf] }
 0x110   : > { %v1300_v62 = vadd.f32 %v6569_v39, %v1268_v43  ;;  %v1151_v63 = vpop.f32.mrb[21].mxu1  ;;  %v6343_v51 = vcombine.low %v8006_v17, %v8023_v38  ;;  %v6217_v58 = vld [vmem:[%s6996_s25 + $0x8c] sm:$0x1]  ;;  %v6603_v14 = vpop.f32.mrb[20].mxu0  ;;  %v4415_v22 = vshll.u32 %v6214_v13, 16  ;;  %v6326_v44 = vrot.slane %v6292_v18, 9 }
 0x111   : > { %v1837_v59 = vld [vmem:[%s7711_s21 + $0x10] sm:$0xff]  ;;  %v1298_v36 = vadd.f32 %v1266_v54, %v1151_v63  ;;  %v6570_v56 = vpop.f32.mrb[22].mxu1  ;;  %v5096_v60 = vrot.slane %v6293_v45, 5  ;;  %v5099_v34 = vrot.slane %v6294_v52, 5  ;;  %v1724_v35 = vpop.f32.mrb[21].mxu0  ;;  %v4411_v16 = vrot.slane %v4409_v12, 4 }
 0x112   : > { %v1869_v19 = vadd.f32 %v6599_v0, %v1837_v59  ;;  %v1835_v20 = vld [vmem:[%s7711_s21] sm:$0xff]  ;;  %1332 = vst.msk [vmem:[%s7711_s21 + $0x30] sm:$0xff] %vm319_vm0, %v1300_v62  ;;  %v1301_v32 = vadd.f32 %v6570_v56, %v1269_v1  ;;  %v1154_v50 = vpop.f32.mrb[23].mxu1  ;;  %v4402_v0 = vor.u32 %v4401_v29, %v4398_v24  ;;  %v4420_v37 = vshrl.u32 %v6215_v42, 16  ;;  %v6604_v53 = vpop.f32.mrb[22].mxu0  ;;  %6806 = vmatmul.mubr.msk.bf16.gmra.mrb[116].mxu0 %vm319_vm0, %v6340_v31  ;;  %v1273_v12 = vld [vmem:[%s7711_s21 + $0x58] sm:$0xff] }
 0x113   : > { %v1867_v61 = vadd.f32 %v1835_v20, %v1708_v21  ;;  %v1838_v2 = vld [vmem:[%s7711_s21 + $0x18] sm:$0xff]  ;;  %v4394_v21 = vsel %vm7055_vm6, %v4389_v48, %v4393_v9  ;;  %1330 = vst.msk [vmem:[%s7711_s21 + $0x20] sm:$0xff] %vm319_vm0, %v1298_v36  ;;  %v1299_v33 = vadd.f32 %v1267_v40, %v1154_v50  ;;  %v4423_v39 = vshll.u32 %v6215_v42, 16  ;;  %v1727_v63 = vpop.f32.mrb[23].mxu0  ;;  %6776 = vmatmul.mubr.msk.bf16.gmra.mrb[120].mxu1 %vm319_vm0, %v7950_v27  ;;  %v6218_v27 = vld [vmem:[%s6996_s25 + $0x90] sm:$0xf] }
 0x114   : > { %1901 = vst.msk [vmem:[%s7711_s21 + $0x10] sm:$0xff] %vm319_vm0, %v1869_v19  ;;  %v1870_v6 = vadd.f32 %v7973_v49, %v1838_v2  ;;  %v1836_v25 = vld [vmem:[%s7711_s21 + $0x8] sm:$0xff]  ;;  %v8049_v5 = vcombine.low %v4384_v41, %v4394_v21  ;;  %1333 = vst.msk [vmem:[%s7711_s21 + $0x38] sm:$0xff] %vm319_vm0, %v1301_v32  ;;  %v4403_v9 = vrot.slane %v4402_v0, 4  ;;  %v6295_v43 = vld [vmem:[%s6996_s25 + $0x78] sm:$0xe]  ;;  %v8072_v55 = vsel %vm7048_vm5, %v6326_v44, %v5096_v60 }
 0x115   : > { %1899 = vst.msk [vmem:[%s7711_s21] sm:$0xff] %vm319_vm0, %v1867_v61  ;;  %v1868_v49 = vadd.f32 %v1836_v25, %v7984_v28  ;;  %1331 = vst.msk [vmem:[%s7711_s21 + $0x28] sm:$0xff] %vm319_vm0, %v1299_v33  ;;  %v4417_v54 = vrot.slane %v4415_v22, 5  ;;  %v5098_v59 = vrot.slane %v5096_v60, 4  ;;  %v4429_v62 = vshll.u32 %v6216_v11, 16  ;;  %v1272_v2 = vld [vmem:[%s7711_s21 + $0x50] sm:$0xff]  ;;  %6809 = vmatprep.mubr.msk.bf16.mxu0 %vm319_vm0, %v6341_v57  ;;  %6779 = vmatprep.mubr.msk.bf16.mxu1 %vm319_vm0, %v7997_v23 }
 0x116   : > { %1902 = vst.msk [vmem:[%s7711_s21 + $0x18] sm:$0xff] %vm319_vm0, %v1870_v6  ;;  %v4408_v28 = vsel %vm7055_vm6, %v4403_v9, %v8011_v15  ;;  %v4412_v1 = vor.u32 %v4411_v16, %v8011_v15  ;;  %v4422_v13 = vrot.slane %v4420_v37, 4  ;;  %v4425_v24 = vrot.slane %v4423_v39, 5  ;;  %v6296_v41 = vld [vmem:[%s6996_s25 + $0x7c] sm:$0xf] }
 0x117   : > { %1900 = vst.msk [vmem:[%s7711_s21 + $0x8] sm:$0xff] %vm319_vm0, %v1868_v49  ;;  %v4433_v29 = vshrl.u32 %v6216_v11, 16  ;;  %v8078_v48 = vsel %vm7048_vm5, %v5098_v59, %v5099_v34  ;;  %v8080_v19 = vrot.slane %v4429_v62, 5  ;;  %v4439_v20 = vshll.u32 %v6217_v58, 16  ;;  %v6573_v45 = vpop.f32.mrb[24].mxu1  ;;  %v1270_v11 = vld [vmem:[%s7711_s21 + $0x40] sm:$0xff] }
 0x118   : > { %v6327_v56 = vrot.slane %v6295_v43, 9  ;;  %v4413_v40 = vrot.slane %v4412_v1, 4  ;;  %v6344_v18 = vcombine.low %v8072_v55, %v8078_v48  ;;  %v4426_v15 = vor.u32 %v4425_v24, %v4422_v13  ;;  %v6297_v6 = vld [vmem:[%s6996_s25 + $0x80] sm:$0x1]  ;;  %v1167_v42 = vpop.f32.mrb[25].mxu1  ;;  %v6607_v24 = vpop.f32.mrb[24].mxu0 }
 0x119   : > { %v1841_v36 = vld [vmem:[%s7711_s21 + $0x30] sm:$0xff]  ;;  %v4435_v61 = vrot.slane %v4433_v29, 4  ;;  %v4441_v50 = vrot.slane %v4439_v20, 5  ;;  %v5103_v25 = vrot.slane %v6296_v41, 5  ;;  %v1304_v33 = vadd.f32 %v6573_v45, %v1272_v2  ;;  %v6574_v9 = vpop.f32.mrb[26].mxu1 }
 0x11a   : > { %v1839_v32 = vld [vmem:[%s7711_s21 + $0x20] sm:$0xff]  ;;  %v1873_v0 = vadd.f32 %v6603_v14, %v1841_v36  ;;  %v4418_v4 = vsel %vm7055_vm6, %v4413_v40, %v4417_v54  ;;  %v4427_v7 = vrot.slane %v4426_v15, 4  ;;  %v1302_v10 = vadd.f32 %v1270_v11, %v1167_v42  ;;  %v1271_v14 = vld [vmem:[%s7711_s21 + $0x48] sm:$0xff]  ;;  %v6219_v22 = vld [vmem:[%s6996_s25 + $0x94] sm:$0xf]  ;;  %v1170_v34 = vpop.f32.mrb[27].mxu1  ;;  %6810 = vmatmul.mubr.msk.bf16.gmra.mrb[120].mxu0 %vm319_vm0, %v6342_v26 }
 0x11b   : > { %v1871_v52 = vadd.f32 %v1839_v32, %v1724_v35  ;;  %v1842_v21 = vld [vmem:[%s7711_s21 + $0x38] sm:$0xff]  ;;  %v4436_v31 = vor.u32 %v4435_v61, %v8080_v19  ;;  %v6246_v30 = vcombine.low %v4408_v28, %v4418_v4  ;;  %1336 = vst.msk [vmem:[%s7711_s21 + $0x50] sm:$0xff] %vm319_vm0, %v1304_v33  ;;  %v1305_v60 = vadd.f32 %v6574_v9, %v1273_v12  ;;  %v6298_v16 = vld [vmem:[%s6996_s25 + $0x84] sm:$0xe]  ;;  %v6299_v54 = vld [vmem:[%s6996_s25 + $0x88] sm:$0xf] }
 0x11c   : > { %v1840_v49 = vld [vmem:[%s7711_s21 + $0x28] sm:$0xff]  ;;  %1905 = vst.msk [vmem:[%s7711_s21 + $0x30] sm:$0xff] %vm319_vm0, %v1873_v0  ;;  %v1874_v57 = vadd.f32 %v6604_v53, %v1842_v21  ;;  %v4432_v23 = vsel %vm7055_vm6, %v4427_v7, %v8080_v19  ;;  %v8121_v35 = vsel %vm7048_vm5, %v6327_v56, %v5103_v25  ;;  %v6220_v28 = vld [vmem:[%s6996_s25 + $0x98] sm:$0x1]  ;;  %1334 = vst.msk [vmem:[%s7711_s21 + $0x40] sm:$0xff] %vm319_vm0, %v1302_v10  ;;  %v5105_v39 = vrot.slane %v5103_v25, 4 }
 0x11d   : > { %1903 = vst.msk [vmem:[%s7711_s21 + $0x20] sm:$0xff] %vm319_vm0, %v1871_v52  ;;  %v1872_v58 = vadd.f32 %v1840_v49, %v1727_v63  ;;  %v4437_v44 = vrot.slane %v4436_v31, 4  ;;  %v1303_v37 = vadd.f32 %v1271_v14, %v1170_v34  ;;  %v5106_v53 = vrot.slane %v6297_v6, 5  ;;  %1337 = vst.msk [vmem:[%s7711_s21 + $0x58] sm:$0xff] %vm319_vm0, %v1305_v60  ;;  %v6300_v13 = vld [vmem:[%s6996_s25 + $0x8c] sm:$0x1]  ;;  %6780 = vmatmul.mubr.msk.bf16.gmra.mrb[124].mxu1 %vm319_vm0, %v8049_v5 }
 0x11e   : > { %1906 = vst.msk [vmem:[%s7711_s21 + $0x38] sm:$0xff] %vm319_vm0, %v1874_v57  ;;  %v4444_v43 = vshrl.u32 %v6218_v27, 16  ;;  %v4447_v62 = vshll.u32 %v6218_v27, 16  ;;  %v4453_v63 = vshll.u32 %v6219_v22, 16  ;;  %v4457_v1 = vshrl.u32 %v6219_v22, 16  ;;  %v1740_v56 = vpop.f32.mrb[25].mxu0  ;;  %6813 = vmatprep.mubr.msk.bf16.mxu0 %vm319_vm0, %v6343_v51  ;;  %6783 = vmatprep.mubr.msk.bf16.mxu1 %vm319_vm0, %v6246_v30 }
 0x11f   : > { %1904 = vst.msk [vmem:[%s7711_s21 + $0x28] sm:$0xff] %vm319_vm0, %v1872_v58  ;;  %v4442_v59 = vsel %vm7055_vm6, %v4437_v44, %v4441_v50  ;;  %1335 = vst.msk [vmem:[%s7711_s21 + $0x48] sm:$0xff] %vm319_vm0, %v1303_v37  ;;  %v8143_v41 = vsel %vm7048_vm5, %v5105_v39, %v5106_v53  ;;  %v4463_v20 = vshll.u32 %v6220_v28, 16  ;;  %v6221_v36 = vld [vmem:[%s6996_s25 + $0x9c] sm:$0xf]  ;;  %v6608_v50 = vpop.f32.mrb[26].mxu0 }
 0x120   : > { %v8137_v29 = vcombine.low %v4432_v23, %v4442_v59  ;;  %v4446_v19 = vrot.slane %v4444_v43, 4  ;;  %v6345_v40 = vcombine.low %v8121_v35, %v8143_v41  ;;  %v4449_v15 = vrot.slane %v4447_v62, 5  ;;  %v6222_v32 = vld [vmem:[%s6996_s25 + $0xa0] sm:$0xf]  ;;  %v1743_v6 = vpop.f32.mrb[27].mxu0  ;;  %v6577_v57 = vpop.f32.mrb[28].mxu1 }
 0x121   : > { %v4455_v61 = vrot.slane %v4453_v63, 5  ;;  %v4459_v2 = vrot.slane %v4457_v1, 4  ;;  %v4465_v0 = vrot.slane %v4463_v20, 5  ;;  %v6328_v45 = vrot.slane %v6298_v16, 9  ;;  %v6223_v7 = vld [vmem:[%s6996_s25 + $0xa4] sm:$0x1] }
 0x122   : > { %v5110_v52 = vrot.slane %v6299_v54, 5  ;;  %v5113_v21 = vrot.slane %v6300_v13, 5  ;;  %v4450_v25 = vor.u32 %v4449_v15, %v4446_v19  ;;  %v4468_v8 = vshrl.u32 %v6221_v36, 16  ;;  %v1845_v11 = vld [vmem:[%s7711_s21 + $0x50] sm:$0xff]  ;;  %v1274_v58 = vld [vmem:[%s7711_s21 + $0x60] sm:$0xff]  ;;  %v1183_v60 = vpop.f32.mrb[29].mxu1  ;;  %6814 = vmatmul.mubr.msk.bf16.gmra.mrb[124].mxu0 %vm319_vm0, %v6344_v18 }
 0x123   : > { %v4460_v4 = vor.u32 %v4459_v2, %v4455_v61  ;;  %v4471_v3 = vshll.u32 %v6221_v36, 16  ;;  %v4477_v31 = vshll.u32 %v6222_v32, 16  ;;  %v4481_v17 = vshrl.u32 %v6222_v32, 16  ;;  %v1276_v9 = vld [vmem:[%s7711_s21 + $0x70] sm:$0xff]  ;;  %v1843_v12 = vld [vmem:[%s7711_s21 + $0x40] sm:$0xff]  ;;  %v1277_v28 = vld [vmem:[%s7711_s21 + $0x78] sm:$0xff]  ;;  %6817 = vmatprep.mubr.msk.bf16.mxu0 %vm319_vm0, %v6345_v40 }
 0x124   : > { %v8163_v26 = vsel %vm7048_vm5, %v6328_v45, %v5110_v52  ;;  %v5112_v5 = vrot.slane %v5110_v52, 4  ;;  %v4451_v38 = vrot.slane %v4450_v25, 4  ;;  %v4470_v51 = vrot.slane %v4468_v8, 4  ;;  %v1846_v34 = vld [vmem:[%s7711_s21 + $0x58] sm:$0xff]  ;;  %v6301_v37 = vld [vmem:[%s6996_s25 + $0x90] sm:$0xe] }
 0x125   : > { %v4461_v33 = vrot.slane %v4460_v4, 4  ;;  %v4473_v42 = vrot.slane %v4471_v3, 5  ;;  %v4479_v27 = vrot.slane %v4477_v31, 5  ;;  %v4483_v30 = vrot.slane %v4481_v17, 4  ;;  %v6578_v59 = vpop.f32.mrb[30].mxu1  ;;  %6784 = vmatmul.mubr.msk.bf16.gmra.mrb[128].mxu1 %vm319_vm0, %v8137_v29 }
 0x126   : > { %v8168_v49 = vsel %vm7048_vm5, %v5112_v5, %v5113_v21  ;;  %v4487_v10 = vshll.u32 %v6223_v7, 16  ;;  %v4456_v14 = vsel %vm7055_vm6, %v4451_v38, %v4455_v61  ;;  %v1844_v16 = vld [vmem:[%s7711_s21 + $0x48] sm:$0xff]  ;;  %v1877_v54 = vadd.f32 %v6607_v24, %v1845_v11  ;;  %v6302_v62 = vld [vmem:[%s6996_s25 + $0x94] sm:$0xf]  ;;  %v6303_v63 = vld [vmem:[%s6996_s25 + $0x98] sm:$0x1] }
 0x127   : > { %v4466_v22 = vsel %vm7055_vm6, %v4461_v33, %v4465_v0  ;;  %v6346_v23 = vcombine.low %v8163_v26, %v8168_v49  ;;  %v4474_v44 = vor.u32 %v4473_v42, %v4470_v51  ;;  %v4484_v53 = vor.u32 %v4483_v30, %v4479_v27  ;;  %v1186_v36 = vpop.f32.mrb[31].mxu1  ;;  %v6224_v15 = vld [vmem:[%s6996_s25 + $0xa8] sm:$0xf]  ;;  %v6225_v61 = vld [vmem:[%s6996_s25 + $0xac] sm:$0xf]  ;;  %v8211_v21 = vpop.f32.mrb[28].mxu0 }
 0x128   : > { %v6248_v39 = vcombine.low %v4456_v14, %v4466_v22  ;;  %v4489_v43 = vrot.slane %v4487_v10, 5  ;;  %v1308_v13 = vadd.f32 %v6577_v57, %v1276_v9  ;;  %v1875_v19 = vadd.f32 %v1843_v12, %v1740_v56  ;;  %1909 = vst.msk [vmem:[%s7711_s21 + $0x50] sm:$0xff] %vm319_vm0, %v1877_v54  ;;  %v1275_v56 = vld [vmem:[%s7711_s21 + $0x68] sm:$0xff]  ;;  %v6226_v45 = vld [vmem:[%s6996_s25 + $0xb0] sm:$0x1]  ;;  %v1756_v4 = vpop.f32.mrb[29].mxu0 }
 0x129   : > { %v4475_v1 = vrot.slane %v4474_v44, 4  ;;  %v1306_v20 = vadd.f32 %v1274_v58, %v1183_v60  ;;  %v4485_v24 = vrot.slane %v4484_v53, 4  ;;  %v1878_v2 = vadd.f32 %v6608_v50, %v1846_v34  ;;  %v6304_v52 = vld [vmem:[%s6996_s25 + $0x9c] sm:$0xe]  ;;  %v6305_v29 = vld [vmem:[%s6996_s25 + $0xa0] sm:$0xf] }
 0x12a   : > { %v1309_v32 = vadd.f32 %v6578_v59, %v1277_v28  ;;  %v1876_v0 = vadd.f32 %v1844_v16, %v1743_v6  ;;  %1340 = vst.msk [vmem:[%s7711_s21 + $0x70] sm:$0xff] %vm319_vm0, %v1308_v13  ;;  %1907 = vst.msk [vmem:[%s7711_s21 + $0x40] sm:$0xff] %vm319_vm0, %v1875_v19  ;;  %v1307_v48 = vadd.f32 %v1275_v56, %v1186_v36  ;;  %v6329_v18 = vrot.slane %v6301_v37, 9  ;;  %v6306_v25 = vld [vmem:[%s6996_s25 + $0xa4] sm:$0x1]  ;;  %v6612_v17 = vpop.f32.mrb[30].mxu0 }
 0x12b   : > { %v4480_v55 = vsel %vm7055_vm6, %v4475_v1, %v4479_v27  ;;  %1338 = vst.msk [vmem:[%s7711_s21 + $0x60] sm:$0xff] %vm319_vm0, %v1306_v20  ;;  %v5117_v50 = vrot.slane %v6302_v62, 5  ;;  %6787 = vmatprep.mubr.msk.bf16.mxu1 %vm319_vm0, %v6248_v39  ;;  %v4490_v35 = vsel %vm7055_vm6, %v4485_v24, %v4489_v43  ;;  %1910 = vst.msk [vmem:[%s7711_s21 + $0x58] sm:$0xff] %vm319_vm0, %v1878_v2  ;;  %v5120_v41 = vrot.slane %v6303_v63, 5  ;;  %v6227_v31 = vld [vmem:[%s6996_s25 + $0xb4] sm:$0xf] }
 0x12c   : > { %1341 = vst.msk [vmem:[%s7711_s21 + $0x78] sm:$0xff] %vm319_vm0, %v1309_v32  ;;  %1908 = vst.msk [vmem:[%s7711_s21 + $0x48] sm:$0xff] %vm319_vm0, %v1876_v0  ;;  %v4492_v40 = vshrl.u32 %v6224_v15, 16  ;;  %v4495_v6 = vshll.u32 %v6224_v15, 16  ;;  %v6249_v7 = vcombine.low %v4480_v55, %v4490_v35  ;;  %v4501_v5 = vshll.u32 %v6225_v61, 16  ;;  %v8228_v11 = vpop.f32.mrb[31].mxu0  ;;  %6818 = vmatmul.mubr.msk.bf16.gmra.mrb[128].mxu0 %vm319_vm0, %v6346_v23 }
 0x12d   : > { %1339 = vst.msk [vmem:[%s7711_s21 + $0x68] sm:$0xff] %vm319_vm0, %v1307_v48  ;;  %v5118_v8 = vsel %vm7048_vm5, %v6329_v18, %v5117_v50  ;;  %v5119_v3 = vrot.slane %v5117_v50, 4  ;;  %v4505_v51 = vshrl.u32 %v6225_v61, 16  ;;  %v4511_v42 = vshll.u32 %v6226_v45, 16  ;;  %v6228_v9 = vld [vmem:[%s6996_s25 + $0xb8] sm:$0xf] }
 0x12e   : > { %v4494_v38 = vrot.slane %v4492_v40, 4  ;;  %v4497_v33 = vrot.slane %v4495_v6, 5  ;;  %v4503_v30 = vrot.slane %v4501_v5, 5  ;;  %v6330_v10 = vrot.slane %v6304_v52, 9  ;;  %v6229_v44 = vld [vmem:[%s6996_s25 + $0xbc] sm:$0x1]  ;;  %6788 = vmatmul.mubr.msk.bf16.gmra.mrb[132].mxu1 %vm319_vm0, %v6249_v7 }
 0x12f   : > { %v5121_v27 = vsel %vm7048_vm5, %v5119_v3, %v5120_v41  ;;  %v5124_v57 = vrot.slane %v6305_v29, 5  ;;  %v4507_v14 = vrot.slane %v4505_v51, 4  ;;  %v4513_v22 = vrot.slane %v4511_v42, 5  ;;  %v6581_v59 = vpop.f32.mrb[32].mxu1  ;;  %v1280_v15 = vld [vmem:[%s7711_s21 + $0x90] sm:$0xff]  ;;  %v1278_v61 = vld [vmem:[%s7711_s21 + $0x80] sm:$0xff] }
 0x130   : > { %v6347_v12 = vcombine.low %v5118_v8, %v5121_v27  ;;  %v4498_v58 = vor.u32 %v4497_v33, %v4494_v38  ;;  %v5127_v28 = vrot.slane %v6306_v25, 5  ;;  %v4516_v16 = vshrl.u32 %v6227_v31, 16  ;;  %v1199_v1 = vpop.f32.mrb[33].mxu1  ;;  %v1281_v52 = vld [vmem:[%s7711_s21 + $0x98] sm:$0xff]  ;;  %v6307_v41 = vld [vmem:[%s6996_s25 + $0xa8] sm:$0xe] }
 0x131   : > { %v8236_v60 = vsel %vm7048_vm5, %v6330_v10, %v5124_v57  ;;  %v5126_v34 = vrot.slane %v5124_v57, 4  ;;  %v4508_v39 = vor.u32 %v4507_v14, %v4503_v30  ;;  %v4519_v53 = vshll.u32 %v6227_v31, 16  ;;  %v1849_v54 = vld [vmem:[%s7711_s21 + $0x70] sm:$0xff]  ;;  %v6582_v2 = vpop.f32.mrb[34].mxu1  ;;  %v6308_v40 = vld [vmem:[%s6996_s25 + $0xac] sm:$0xf] }
 0x132   : > { %v4499_v37 = vrot.slane %v4498_v58, 4  ;;  %v4525_v43 = vshll.u32 %v6228_v9, 16  ;;  %6821 = vmatprep.mubr.msk.bf16.mxu0 %vm319_vm0, %v6347_v12  ;;  %v4518_v63 = vrot.slane %v4516_v16, 4  ;;  %v4529_v26 = vshrl.u32 %v6228_v9, 16  ;;  %v1847_v23 = vld [vmem:[%s7711_s21 + $0x60] sm:$0xff]  ;;  %v1202_v48 = vpop.f32.mrb[35].mxu1 }
 0x133   : > { %v5128_v62 = vsel %vm7048_vm5, %v5126_v34, %v5127_v28  ;;  %v4535_v49 = vshll.u32 %v6229_v44, 16  ;;  %v4509_v19 = vrot.slane %v4508_v39, 4  ;;  %v4521_v36 = vrot.slane %v4519_v53, 5  ;;  %v1850_v24 = vld [vmem:[%s7711_s21 + $0x78] sm:$0xff]  ;;  %v6309_v6 = vld [vmem:[%s6996_s25 + $0xb0] sm:$0x1] }
 0x134   : > { %v4504_v13 = vsel %vm7055_vm6, %v4499_v37, %v4503_v30  ;;  %v6348_v20 = vcombine.low %v8236_v60, %v5128_v62  ;;  %v4527_v32 = vrot.slane %v4525_v43, 5  ;;  %v4531_v0 = vrot.slane %v4529_v26, 4  ;;  %v1848_v55 = vld [vmem:[%s7711_s21 + $0x68] sm:$0xff]  ;;  %v6230_v5 = vld [vmem:[%s6996_s25 + $0xc0] sm:$0xf]  ;;  %v8267_v38 = vpop.f32.mrb[32].mxu0 }
 0x135   : > { %v4537_v56 = vrot.slane %v4535_v49, 5  ;;  %v1881_v45 = vadd.f32 %v8211_v21, %v1849_v54  ;;  %v4514_v18 = vsel %vm7055_vm6, %v4509_v19, %v4513_v22  ;;  %v4522_v50 = vor.u32 %v4521_v36, %v4518_v63  ;;  %v1279_v3 = vld [vmem:[%s7711_s21 + $0x88] sm:$0xff]  ;;  %v6231_v31 = vld [vmem:[%s6996_s25 + $0xc4] sm:$0xf]  ;;  %v6310_v44 = vld [vmem:[%s6996_s25 + $0xb4] sm:$0xe] }
 0x136   : > { %v1312_v29 = vadd.f32 %v6581_v59, %v1280_v15  ;;  %v1879_v35 = vadd.f32 %v1847_v23, %v1756_v4  ;;  %v6250_v25 = vcombine.low %v4504_v13, %v4514_v18  ;;  %v4532_v21 = vor.u32 %v4531_v0, %v4527_v32  ;;  %v6232_v27 = vld [vmem:[%s6996_s25 + $0xc8] sm:$0x1]  ;;  %6822 = vmatmul.mubr.msk.bf16.gmra.mrb[132].mxu0 %vm319_vm0, %v6348_v20  ;;  %v6311_v39 = vld [vmem:[%s6996_s25 + $0xb8] sm:$0xf]  ;;  %v6312_v53 = vld [vmem:[%s6996_s25 + $0xbc] sm:$0x1] }
 0x137   : > { %1913 = vst.msk [vmem:[%s7711_s21 + $0x70] sm:$0xff] %vm319_vm0, %v1881_v45  ;;  %v1310_v7 = vadd.f32 %v1278_v61, %v1199_v1  ;;  %v1882_v8 = vadd.f32 %v6612_v17, %v1850_v24  ;;  %v4523_v33 = vrot.slane %v4522_v50, 4  ;;  %v1313_v4 = vadd.f32 %v6582_v2, %v1281_v52  ;;  %v8275_v17 = vpop.f32.mrb[33].mxu0  ;;  %v6233_v63 = vld [vmem:[%s6996_s25 + $0xcc] sm:$0xf]  ;;  %v6585_v61 = vpop.f32.mrb[36].mxu1 }
 0x138   : > { %1344 = vst.msk [vmem:[%s7711_s21 + $0x90] sm:$0xff] %vm319_vm0, %v1312_v29  ;;  %1911 = vst.msk [vmem:[%s7711_s21 + $0x60] sm:$0xff] %vm319_vm0, %v1879_v35  ;;  %v1880_v51 = vadd.f32 %v1848_v55, %v8228_v11  ;;  %v1311_v42 = vadd.f32 %v1279_v3, %v1202_v48  ;;  %6791 = vmatprep.mubr.msk.bf16.mxu1 %vm319_vm0, %v6250_v25  ;;  %v4533_v30 = vrot.slane %v4532_v21, 4  ;;  %v6331_v10 = vrot.slane %v6307_v41, 9  ;;  %v8282_v12 = vpop.f32.mrb[34].mxu0  ;;  %v1215_v45 = vpop.f32.mrb[37].mxu1 }
 0x139   : > { %1342 = vst.msk [vmem:[%s7711_s21 + $0x80] sm:$0xff] %vm319_vm0, %v1310_v7  ;;  %1914 = vst.msk [vmem:[%s7711_s21 + $0x78] sm:$0xff] %vm319_vm0, %v1882_v8  ;;  %v5131_v57 = vrot.slane %v6308_v40, 5  ;;  %v5134_v9 = vrot.slane %v6309_v6, 5  ;;  %v4528_v11 = vsel %vm7055_vm6, %v4523_v33, %v4527_v32  ;;  %v4540_v58 = vshrl.u32 %v6230_v5, 16  ;;  %v8294_v60 = vpop.f32.mrb[35].mxu0 }
 0x13a   : > { %1345 = vst.msk [vmem:[%s7711_s21 + $0x98] sm:$0xff] %vm319_vm0, %v1313_v4  ;;  %1912 = vst.msk [vmem:[%s7711_s21 + $0x68] sm:$0xff] %vm319_vm0, %v1880_v51  ;;  %v4543_v14 = vshll.u32 %v6230_v5, 16  ;;  %v4549_v22 = vshll.u32 %v6231_v31, 16  ;;  %v4538_v34 = vsel %vm7055_vm6, %v4533_v30, %v4537_v56  ;;  %v4553_v37 = vshrl.u32 %v6231_v31, 16  ;;  %v6586_v50 = vpop.f32.mrb[38].mxu1 }
 0x13b   : > { %1343 = vst.msk [vmem:[%s7711_s21 + $0x88] sm:$0xff] %vm319_vm0, %v1311_v42  ;;  %v5132_v28 = vsel %vm7048_vm5, %v6331_v10, %v5131_v57  ;;  %v5133_v16 = vrot.slane %v5131_v57, 4  ;;  %v6251_v43 = vcombine.low %v4528_v11, %v4538_v34  ;;  %v4542_v54 = vrot.slane %v4540_v58, 4  ;;  %v6234_v13 = vld [vmem:[%s6996_s25 + $0xd0] sm:$0xf]  ;;  %v1282_v31 = vld [vmem:[%s7711_s21 + $0xa0] sm:$0xff] }
 0x13c   : > { %v4545_v59 = vrot.slane %v4543_v14, 5  ;;  %v4551_v62 = vrot.slane %v4549_v22, 5  ;;  %v4555_v49 = vrot.slane %v4553_v37, 4  ;;  %v4559_v23 = vshll.u32 %v6232_v27, 16  ;;  %v6235_v32 = vld [vmem:[%s6996_s25 + $0xd4] sm:$0x1] }
 0x13d   : > { %v5135_v26 = vsel %vm7048_vm5, %v5133_v16, %v5134_v9  ;;  %v6332_v1 = vrot.slane %v6310_v44, 9  ;;  %6792 = vmatmul.mubr.msk.bf16.gmra.mrb[136].mxu1 %vm319_vm0, %v6251_v43  ;;  %v5138_v36 = vrot.slane %v6311_v39, 5  ;;  %v5141_v15 = vrot.slane %v6312_v53, 5  ;;  %v1284_v25 = vld [vmem:[%s7711_s21 + $0xb0] sm:$0xff]  ;;  %v1218_v33 = vpop.f32.mrb[39].mxu1  ;;  %v1285_v57 = vld [vmem:[%s7711_s21 + $0xb8] sm:$0xff] }
 0x13e   : > { %v6349_v19 = vcombine.low %v5132_v28, %v5135_v26  ;;  %v4546_v20 = vor.u32 %v4545_v59, %v4542_v54  ;;  %v4556_v24 = vor.u32 %v4555_v49, %v4551_v62  ;;  %v4561_v2 = vrot.slane %v4559_v23, 5  ;;  %v6313_v4 = vld [vmem:[%s6996_s25 + $0xc0] sm:$0xe]  ;;  %v1283_v11 = vld [vmem:[%s7711_s21 + $0xa8] sm:$0xff]  ;;  %v6314_v58 = vld [vmem:[%s6996_s25 + $0xc4] sm:$0xf] }
 0x13f   : > { %v4564_v0 = vshrl.u32 %v6233_v63, 16  ;;  %v4567_v56 = vshll.u32 %v6233_v63, 16  ;;  %v5139_v55 = vsel %vm7048_vm5, %v6332_v1, %v5138_v36  ;;  %v5140_v48 = vrot.slane %v5138_v36, 4  ;;  %v1853_v6 = vld [vmem:[%s7711_s21 + $0x90] sm:$0xff]  ;;  %v8327_v14 = vpop.f32.mrb[36].mxu0 }
 0x140   : > { %6825 = vmatprep.mubr.msk.bf16.mxu0 %vm319_vm0, %v6349_v19  ;;  %v4547_v52 = vrot.slane %v4546_v20, 4  ;;  %v4573_v18 = vshll.u32 %v6234_v13, 16  ;;  %v4557_v29 = vrot.slane %v4556_v24, 4  ;;  %v4577_v40 = vshrl.u32 %v6234_v13, 16  ;;  %v1851_v5 = vld [vmem:[%s7711_s21 + $0x80] sm:$0xff]  ;;  %v1788_v39 = vpop.f32.mrb[37].mxu0 }
 0x141   : > { %v4566_v35 = vrot.slane %v4564_v0, 4  ;;  %v4569_v41 = vrot.slane %v4567_v56, 5  ;;  %v5142_v7 = vsel %vm7048_vm5, %v5140_v48, %v5141_v15  ;;  %v4583_v3 = vshll.u32 %v6235_v32, 16  ;;  %v1854_v10 = vld [vmem:[%s7711_s21 + $0x98] sm:$0xff]  ;;  %v6315_v16 = vld [vmem:[%s6996_s25 + $0xc8] sm:$0x1] }
 0x142   : > { %v4552_v21 = vsel %vm7055_vm6, %v4547_v52, %v4551_v62  ;;  %v4575_v8 = vrot.slane %v4573_v18, 5  ;;  %v4562_v51 = vsel %vm7055_vm6, %v4557_v29, %v4561_v2  ;;  %v6350_v42 = vcombine.low %v5139_v55, %v5142_v7  ;;  %v1852_v9 = vld [vmem:[%s7711_s21 + $0x88] sm:$0xff]  ;;  %v6317_v62 = vld [vmem:[%s6996_s25 + $0xd0] sm:$0xf]  ;;  %v6318_v63 = vld [vmem:[%s6996_s25 + $0xd4] sm:$0x1] }
 0x143   : > { %v4570_v27 = vor.u32 %v4569_v41, %v4566_v35  ;;  %v4579_v30 = vrot.slane %v4577_v40, 4  ;;  %v6252_v22 = vcombine.low %v4552_v21, %v4562_v51  ;;  %v4585_v44 = vrot.slane %v4583_v3, 5  ;;  %v6316_v37 = vld [vmem:[%s6996_s25 + $0xcc] sm:$0xe]  ;;  %v6620_v26 = vpop.f32.mrb[38].mxu0  ;;  %v6589_v52 = vpop.f32.mrb[40].mxu1 }
 0x144   : > { %v1885_v34 = vadd.f32 %v8267_v38, %v1853_v6  ;;  %v1316_v28 = vadd.f32 %v6585_v61, %v1284_v25  ;;  %6826 = vmatmul.mubr.msk.bf16.gmra.mrb[136].mxu0 %vm319_vm0, %v6350_v42  ;;  %v1883_v54 = vadd.f32 %v1851_v5, %v8275_v17  ;;  %v1314_v59 = vadd.f32 %v1282_v31, %v1215_v45  ;;  %v1791_v1 = vpop.f32.mrb[39].mxu0  ;;  %v1288_v55 = vld [vmem:[%s7711_s21 + $0xd0] sm:$0xff]  ;;  %v1231_v18 = vpop.f32.mrb[41].mxu1  ;;  %v1289_v6 = vld [vmem:[%s7711_s21 + $0xd8] sm:$0xff]  ;;  %v1287_v3 = vld [vmem:[%s7711_s21 + $0xc8] sm:$0xff] }
 0x145   : > { %v4571_v53 = vrot.slane %v4570_v27, 4  ;;  %v4580_v43 = vor.u32 %v4579_v30, %v4575_v8  ;;  %6795 = vmatprep.mubr.msk.bf16.mxu1 %vm319_vm0, %v6252_v22  ;;  %v1886_v38 = vadd.f32 %v8282_v12, %v1854_v10  ;;  %v1317_v49 = vadd.f32 %v6586_v50, %v1285_v57  ;;  %v1286_v50 = vld [vmem:[%s7711_s21 + $0xc0] sm:$0xff]  ;;  %v6590_v40 = vpop.f32.mrb[42].mxu1 }
 0x146   : > { %1917 = vst.msk [vmem:[%s7711_s21 + $0x90] sm:$0xff] %vm319_vm0, %v1885_v34  ;;  %1348 = vst.msk [vmem:[%s7711_s21 + $0xb0] sm:$0xff] %vm319_vm0, %v1316_v28  ;;  %v1884_v17 = vadd.f32 %v1852_v9, %v8294_v60  ;;  %v1315_v23 = vadd.f32 %v1283_v11, %v1218_v33  ;;  %v6333_v20 = vrot.slane %v6313_v4, 9  ;;  %v5145_v36 = vrot.slane %v6314_v58, 5 }
 0x147   : > { %v4576_v13 = vsel %vm7055_vm6, %v4571_v53, %v4575_v8  ;;  %v4581_v19 = vrot.slane %v4580_v43, 4  ;;  %1915 = vst.msk [vmem:[%s7711_s21 + $0x80] sm:$0xff] %vm319_vm0, %v1883_v54  ;;  %1346 = vst.msk [vmem:[%s7711_s21 + $0xa0] sm:$0xff] %vm319_vm0, %v1314_v59  ;;  %v5148_v12 = vrot.slane %v6315_v16, 5  ;;  %v6334_v60 = vrot.slane %v6316_v37, 9  ;;  %v1234_v8 = vpop.f32.mrb[43].mxu1 }
 0x148   : > { %1918 = vst.msk [vmem:[%s7711_s21 + $0x98] sm:$0xff] %vm319_vm0, %v1886_v38  ;;  %1349 = vst.msk [vmem:[%s7711_s21 + $0xb8] sm:$0xff] %vm319_vm0, %v1317_v49  ;;  %v5152_v15 = vrot.slane %v6317_v62, 5  ;;  %v5155_v61 = vrot.slane %v6318_v63, 5  ;;  %v5146_v2 = vsel %vm7048_vm5, %v6333_v20, %v5145_v36  ;;  %v5147_v32 = vrot.slane %v5145_v36, 4  ;;  %v6623_v42 = vpop.f32.mrb[40].mxu0 }
 0x149   : > { %1916 = vst.msk [vmem:[%s7711_s21 + $0x88] sm:$0xff] %vm319_vm0, %v1884_v17  ;;  %1347 = vst.msk [vmem:[%s7711_s21 + $0xa8] sm:$0xff] %vm319_vm0, %v1315_v23  ;;  %v4586_v24 = vsel %vm7055_vm6, %v4581_v19, %v4585_v44  ;;  %v1320_v47 = vadd.f32 %v6589_v52, %v1288_v55  ;;  %v1318_v41 = vadd.f32 %v1286_v50, %v1231_v18  ;;  %v1804_v10 = vpop.f32.mrb[41].mxu0  ;;  %v1292_v44 = vld [vmem:[%s7711_s21 + $0xf0] sm:$0xff]  ;;  %v1293_v63 = vld [vmem:[%s7711_s21 + $0xf8] sm:$0xff] }
 0x14a   : > { %v6253_v0 = vcombine.low %v4576_v13, %v4586_v24  ;;  %v5153_v56 = vsel %vm7048_vm5, %v6334_v60, %v5152_v15  ;;  %v5154_v45 = vrot.slane %v5152_v15, 4  ;;  %v5149_v48 = vsel %vm7048_vm5, %v5147_v32, %v5148_v12  ;;  %v6624_v57 = vpop.f32.mrb[42].mxu0  ;;  %v1291_v23 = vld [vmem:[%s7711_s21 + $0xe8] sm:$0xff]  ;;  %v2267_v36 = vld [vmem:[%s7711_s21 + $0x10] sm:$0xff]  ;;  %v2265_v15 = vld [vmem:[%s7711_s21] sm:$0xff] }
 0x14b   : > { %v6351_v29 = vcombine.low %v5146_v2, %v5149_v48  ;;  %1352 = vst.msk [vmem:[%s7711_s21 + $0xd0] sm:$0xff] %vm319_vm0, %v1320_v47  ;;  %v1321_v7 = vadd.f32 %v6590_v40, %v1289_v6  ;;  %1350 = vst.msk [vmem:[%s7711_s21 + $0xc0] sm:$0xff] %vm319_vm0, %v1318_v41  ;;  %v1319_v31 = vadd.f32 %v1287_v3, %v1234_v8  ;;  %v1807_v9 = vpop.f32.mrb[43].mxu0  ;;  %v2268_v32 = vld [vmem:[%s7711_s21 + $0x18] sm:$0xff]  ;;  %v2266_v55 = vld [vmem:[%s7711_s21 + $0x8] sm:$0xff] }
 0x14c   : > { %6796 = vmatmul.mubr.msk.bf16.gmra.mrb[140].mxu1 %vm319_vm0, %v6253_v0  ;;  %v5156_v35 = vsel %vm7048_vm5, %v5154_v45, %v5155_v61 }
 0x14d   : > { %v6352_v25 = vcombine.low %v5153_v56, %v5156_v35  ;;  %v1857_v21 = vld [vmem:[%s7711_s21 + $0xb0] sm:$0xff]  ;;  %6829 = vmatprep.mubr.msk.bf16.mxu0 %vm319_vm0, %v6351_v29  ;;  %1353 = vst.msk [vmem:[%s7711_s21 + $0xd8] sm:$0xff] %vm319_vm0, %v1321_v7  ;;  %1351 = vst.msk [vmem:[%s7711_s21 + $0xc8] sm:$0xff] %vm319_vm0, %v1319_v31  ;;  %v6593_v22 = vpop.f32.mrb[44].mxu1 }
 0x14e   : > { %v1889_v46 = vadd.f32 %v8327_v14, %v1857_v21  ;;  %v1855_v5 = vld [vmem:[%s7711_s21 + $0xa0] sm:$0xff]  ;;  %v1324_v16 = vadd.f32 %v6593_v22, %v1292_v44  ;;  %v1247_v37 = vpop.f32.mrb[45].mxu1  ;;  %v2271_v7 = vld [vmem:[%s7711_s21 + $0x30] sm:$0xff] }
 0x14f   : > { %6830 = vmatmul.mubr.msk.bf16.gmra.mrb[140].mxu0 %vm319_vm0, %v6352_v25  ;;  %v1887_v33 = vadd.f32 %v1855_v5, %v1788_v39  ;;  %v1858_v4 = vld [vmem:[%s7711_s21 + $0xb8] sm:$0xff]  ;;  %v1290_v39 = vld [vmem:[%s7711_s21 + $0xe0] sm:$0xff]  ;;  %v6627_v54 = vpop.f32.mrb[44].mxu0  ;;  %v6594_v62 = vpop.f32.mrb[46].mxu1 }
 0x150   : > { %v1856_v51 = vld [vmem:[%s7711_s21 + $0xa8] sm:$0xff]  ;;  %1921 = vst.msk [vmem:[%s7711_s21 + $0xb0] sm:$0xff] %vm319_vm0, %v1889_v46  ;;  %v1890_v27 = vadd.f32 %v6620_v26, %v1858_v4  ;;  %v1322_v59 = vadd.f32 %v1290_v39, %v1247_v37  ;;  %v1820_v38 = vpop.f32.mrb[45].mxu0  ;;  %1356 = vst.msk [vmem:[%s7711_s21 + $0xf0] sm:$0xff] %vm319_vm0, %v1324_v16  ;;  %v1325_v49 = vadd.f32 %v6594_v62, %v1293_v63  ;;  %v1250_v17 = vpop.f32.mrb[47].mxu1  ;;  %v2269_v46 = vld [vmem:[%s7711_s21 + $0x20] sm:$0xff] }
 0x151   : > { %v1888_v30 = vadd.f32 %v1856_v51, %v1791_v1  ;;  %1919 = vst.msk [vmem:[%s7711_s21 + $0xa0] sm:$0xff] %vm319_vm0, %v1887_v33  ;;  %v6628_v1 = vpop.f32.mrb[46].mxu0  ;;  %v1323_v13 = vadd.f32 %v1291_v23, %v1250_v17  ;;  %v2272_v4 = vld [vmem:[%s7711_s21 + $0x38] sm:$0xff]  ;;  %v2275_v37 = vld [vmem:[%s7711_s21 + $0x50] sm:$0xff] }
 0x152   : > { %1922 = vst.msk [vmem:[%s7711_s21 + $0xb8] sm:$0xff] %vm319_vm0, %v1890_v27  ;;  %v1861_v11 = vld [vmem:[%s7711_s21 + $0xd0] sm:$0xff]  ;;  %v1859_v14 = vld [vmem:[%s7711_s21 + $0xc0] sm:$0xff]  ;;  %1354 = vst.msk [vmem:[%s7711_s21 + $0xe0] sm:$0xff] %vm319_vm0, %v1322_v59  ;;  %v1823_v19 = vpop.f32.mrb[47].mxu0 }
 0x153   : > { %1920 = vst.msk [vmem:[%s7711_s21 + $0xa8] sm:$0xff] %vm319_vm0, %v1888_v30  ;;  %v1893_v58 = vadd.f32 %v6623_v42, %v1861_v11  ;;  %v1891_v34 = vadd.f32 %v1859_v14, %v1804_v10  ;;  %1357 = vst.msk [vmem:[%s7711_s21 + $0xf8] sm:$0xff] %vm319_vm0, %v1325_v49  ;;  %v2270_v10 = vld [vmem:[%s7711_s21 + $0x28] sm:$0xff] }
 0x154   : > { %v1862_v28 = vld [vmem:[%s7711_s21 + $0xd8] sm:$0xff]  ;;  %v1860_v43 = vld [vmem:[%s7711_s21 + $0xc8] sm:$0xff]  ;;  %1355 = vst.msk [vmem:[%s7711_s21 + $0xe8] sm:$0xff] %vm319_vm0, %v1323_v13 }
 0x155   : > { %1925 = vst.msk [vmem:[%s7711_s21 + $0xd0] sm:$0xff] %vm319_vm0, %v1893_v58  ;;  %v1894_v53 = vadd.f32 %v6624_v57, %v1862_v28  ;;  %1923 = vst.msk [vmem:[%s7711_s21 + $0xc0] sm:$0xff] %vm319_vm0, %v1891_v34  ;;  %v1892_v26 = vadd.f32 %v1860_v43, %v1807_v9  ;;  %v6633_v20 = vpop.f32.mrb[48].mxu1 }
 0x156   : > { %v2299_v12 = vadd.f32 %v6633_v20, %v2267_v36  ;;  %v2138_v60 = vpop.f32.mrb[49].mxu1 }
 0x157   : > { %1926 = vst.msk [vmem:[%s7711_s21 + $0xd8] sm:$0xff] %vm319_vm0, %v1894_v53  ;;  %1924 = vst.msk [vmem:[%s7711_s21 + $0xc8] sm:$0xff] %vm319_vm0, %v1892_v26  ;;  %v1865_v61 = vld [vmem:[%s7711_s21 + $0xf0] sm:$0xff]  ;;  %v2297_v24 = vadd.f32 %v2265_v15, %v2138_v60  ;;  %v6634_v2 = vpop.f32.mrb[50].mxu1  ;;  %v2276_v26 = vld [vmem:[%s7711_s21 + $0x58] sm:$0xff] }
 0x158   : > { %v1897_v0 = vadd.f32 %v6627_v54, %v1865_v61  ;;  %2331 = vst.msk [vmem:[%s7711_s21 + $0x10] sm:$0xff] %vm319_vm0, %v2299_v12  ;;  %v2300_v45 = vadd.f32 %v6634_v2, %v2268_v32  ;;  %v2141_v52 = vpop.f32.mrb[51].mxu1  ;;  %v2273_v54 = vld [vmem:[%s7711_s21 + $0x40] sm:$0xff]  ;;  %v2279_v32 = vld [vmem:[%s7711_s21 + $0x70] sm:$0xff] }
 0x159   : > { %v1863_v56 = vld [vmem:[%s7711_s21 + $0xe0] sm:$0xff]  ;;  %v6667_v48 = vpop.f32.mrb[48].mxu0  ;;  %2329 = vst.msk [vmem:[%s7711_s21] sm:$0xff] %vm319_vm0, %v2297_v24  ;;  %v2298_v50 = vadd.f32 %v2266_v55, %v2141_v52 }
 0x15a   : > { %v1895_v47 = vadd.f32 %v1863_v56, %v1820_v38  ;;  %v1866_v18 = vld [vmem:[%s7711_s21 + $0xf8] sm:$0xff]  ;;  %v2932_v29 = vpop.f32.mrb[49].mxu0  ;;  %1929 = vst.msk [vmem:[%s7711_s21 + $0xf0] sm:$0xff] %vm319_vm0, %v1897_v0  ;;  %2332 = vst.msk [vmem:[%s7711_s21 + $0x18] sm:$0xff] %vm319_vm0, %v2300_v45  ;;  %v2277_v52 = vld [vmem:[%s7711_s21 + $0x60] sm:$0xff] }
 0x15b   : > { %v1898_v35 = vadd.f32 %v6628_v1, %v1866_v18  ;;  %v1864_v41 = vld [vmem:[%s7711_s21 + $0xe8] sm:$0xff]  ;;  %v6668_v40 = vpop.f32.mrb[50].mxu0  ;;  %2330 = vst.msk [vmem:[%s7711_s21 + $0x8] sm:$0xff] %vm319_vm0, %v2298_v50  ;;  %v2280_v18 = vld [vmem:[%s7711_s21 + $0x78] sm:$0xff] }
 0x15c   : > { %1927 = vst.msk [vmem:[%s7711_s21 + $0xe0] sm:$0xff] %vm319_vm0, %v1895_v47  ;;  %v1896_v6 = vadd.f32 %v1864_v41, %v1823_v19  ;;  %v2935_v25 = vpop.f32.mrb[51].mxu0  ;;  %v2274_v1 = vld [vmem:[%s7711_s21 + $0x48] sm:$0xff] }
 0x15d   : > { %1930 = vst.msk [vmem:[%s7711_s21 + $0xf8] sm:$0xff] %vm319_vm0, %v1898_v35  ;;  %v6637_v21 = vpop.f32.mrb[52].mxu1 }
 0x15e   : > { %1928 = vst.msk [vmem:[%s7711_s21 + $0xe8] sm:$0xff] %vm319_vm0, %v1896_v6  ;;  %v2303_v8 = vadd.f32 %v6637_v21, %v2271_v7  ;;  %v2154_v3 = vpop.f32.mrb[53].mxu1 }
 0x15f   : > { %v3061_v5 = vld [vmem:[%s7711_s21 + $0x10] sm:$0xff]  ;;  %v2301_v31 = vadd.f32 %v2269_v46, %v2154_v3  ;;  %v6638_v33 = vpop.f32.mrb[54].mxu1 }
 0x160   : > { %v3093_v51 = vadd.f32 %v6667_v48, %v3061_v5  ;;  %2335 = vst.msk [vmem:[%s7711_s21 + $0x30] sm:$0xff] %vm319_vm0, %v2303_v8  ;;  %v3059_v42 = vld [vmem:[%s7711_s21] sm:$0xff]  ;;  %v2304_v27 = vadd.f32 %v6638_v33, %v2272_v4  ;;  %v2157_v30 = vpop.f32.mrb[55].mxu1  ;;  %v2283_v4 = vld [vmem:[%s7711_s21 + $0x90] sm:$0xff] }
 0x161   : > { %v3091_v57 = vadd.f32 %v3059_v42, %v2932_v29  ;;  %2333 = vst.msk [vmem:[%s7711_s21 + $0x20] sm:$0xff] %vm319_vm0, %v2301_v31  ;;  %v3062_v9 = vld [vmem:[%s7711_s21 + $0x18] sm:$0xff]  ;;  %v2302_v11 = vadd.f32 %v2270_v10, %v2157_v30  ;;  %v2281_v30 = vld [vmem:[%s7711_s21 + $0x80] sm:$0xff] }
 0x162   : > { %3125 = vst.msk [vmem:[%s7711_s21 + $0x10] sm:$0xff] %vm319_vm0, %v3093_v51  ;;  %v3094_v58 = vadd.f32 %v6668_v40, %v3062_v9  ;;  %2336 = vst.msk [vmem:[%s7711_s21 + $0x38] sm:$0xff] %vm319_vm0, %v2304_v27  ;;  %v3060_v14 = vld [vmem:[%s7711_s21 + $0x8] sm:$0xff]  ;;  %v6671_v22 = vpop.f32.mrb[52].mxu0 }
 0x163   : > { %3123 = vst.msk [vmem:[%s7711_s21] sm:$0xff] %vm319_vm0, %v3091_v57  ;;  %v3092_v44 = vadd.f32 %v3060_v14, %v2935_v25  ;;  %2334 = vst.msk [vmem:[%s7711_s21 + $0x28] sm:$0xff] %vm319_vm0, %v2302_v11  ;;  %v2948_v34 = vpop.f32.mrb[53].mxu0  ;;  %v2278_v40 = vld [vmem:[%s7711_s21 + $0x68] sm:$0xff]  ;;  %v2284_v11 = vld [vmem:[%s7711_s21 + $0x98] sm:$0xff] }
 0x164   : > { %3126 = vst.msk [vmem:[%s7711_s21 + $0x18] sm:$0xff] %vm319_vm0, %v3094_v58  ;;  %v6672_v28 = vpop.f32.mrb[54].mxu0 }
 0x165   : > { %3124 = vst.msk [vmem:[%s7711_s21 + $0x8] sm:$0xff] %vm319_vm0, %v3092_v44  ;;  %v6641_v16 = vpop.f32.mrb[56].mxu1  ;;  %v2951_v39 = vpop.f32.mrb[55].mxu0 }
 0x166   : > { %v2307_v53 = vadd.f32 %v6641_v16, %v2275_v37  ;;  %v2170_v43 = vpop.f32.mrb[57].mxu1 }
 0x167   : > { %v3065_v59 = vld [vmem:[%s7711_s21 + $0x30] sm:$0xff]  ;;  %v2305_v62 = vadd.f32 %v2273_v54, %v2170_v43  ;;  %v6642_v63 = vpop.f32.mrb[58].mxu1 }
 0x168   : > { %v3097_v38 = vadd.f32 %v6671_v22, %v3065_v59  ;;  %2339 = vst.msk [vmem:[%s7711_s21 + $0x50] sm:$0xff] %vm319_vm0, %v2307_v53  ;;  %v3063_v49 = vld [vmem:[%s7711_s21 + $0x20] sm:$0xff]  ;;  %v2308_v17 = vadd.f32 %v6642_v63, %v2276_v26  ;;  %v2173_v23 = vpop.f32.mrb[59].mxu1 }
 0x169   : > { %v3095_v13 = vadd.f32 %v3063_v49, %v2948_v34  ;;  %2337 = vst.msk [vmem:[%s7711_s21 + $0x40] sm:$0xff] %vm319_vm0, %v2305_v62  ;;  %v3066_v19 = vld [vmem:[%s7711_s21 + $0x38] sm:$0xff]  ;;  %v2306_v20 = vadd.f32 %v2274_v1, %v2173_v23  ;;  %v2282_v34 = vld [vmem:[%s7711_s21 + $0x88] sm:$0xff]  ;;  %v2287_v62 = vld [vmem:[%s7711_s21 + $0xb0] sm:$0xff] }
 0x16a   : > { %3129 = vst.msk [vmem:[%s7711_s21 + $0x30] sm:$0xff] %vm319_vm0, %v3097_v38  ;;  %v3098_v36 = vadd.f32 %v6672_v28, %v3066_v19  ;;  %2340 = vst.msk [vmem:[%s7711_s21 + $0x58] sm:$0xff] %vm319_vm0, %v2308_v17  ;;  %v3064_v12 = vld [vmem:[%s7711_s21 + $0x28] sm:$0xff]  ;;  %v2285_v49 = vld [vmem:[%s7711_s21 + $0xa0] sm:$0xff] }
 0x16b   : > { %v6675_v60 = vpop.f32.mrb[56].mxu0  ;;  %3127 = vst.msk [vmem:[%s7711_s21 + $0x20] sm:$0xff] %vm319_vm0, %v3095_v13  ;;  %v3096_v15 = vadd.f32 %v3064_v12, %v2951_v39  ;;  %2338 = vst.msk [vmem:[%s7711_s21 + $0x48] sm:$0xff] %vm319_vm0, %v2306_v20  ;;  %v2288_v19 = vld [vmem:[%s7711_s21 + $0xb8] sm:$0xff] }
 0x16c   : > { %v2964_v61 = vpop.f32.mrb[57].mxu0  ;;  %3130 = vst.msk [vmem:[%s7711_s21 + $0x38] sm:$0xff] %vm319_vm0, %v3098_v36 }
 0x16d   : > { %v6676_v24 = vpop.f32.mrb[58].mxu0  ;;  %3128 = vst.msk [vmem:[%s7711_s21 + $0x28] sm:$0xff] %vm319_vm0, %v3096_v15  ;;  %v6645_v2 = vpop.f32.mrb[60].mxu1 }
 0x16e   : > { %v2967_v0 = vpop.f32.mrb[59].mxu0  ;;  %v2311_v56 = vadd.f32 %v6645_v2, %v2279_v32  ;;  %v2186_v45 = vpop.f32.mrb[61].mxu1 }
 0x16f   : > { %v3069_v55 = vld [vmem:[%s7711_s21 + $0x50] sm:$0xff]  ;;  %v2309_v48 = vadd.f32 %v2277_v52, %v2186_v45  ;;  %v6646_v47 = vpop.f32.mrb[62].mxu1 }
 0x170   : > { %v3101_v50 = vadd.f32 %v6675_v60, %v3069_v55  ;;  %2343 = vst.msk [vmem:[%s7711_s21 + $0x70] sm:$0xff] %vm319_vm0, %v2311_v56  ;;  %v3067_v29 = vld [vmem:[%s7711_s21 + $0x40] sm:$0xff]  ;;  %v2312_v35 = vadd.f32 %v6646_v47, %v2280_v18  ;;  %v2189_v41 = vpop.f32.mrb[63].mxu1 }
 0x171   : > { %v3099_v6 = vadd.f32 %v3067_v29, %v2964_v61  ;;  %2341 = vst.msk [vmem:[%s7711_s21 + $0x60] sm:$0xff] %vm319_vm0, %v2309_v48  ;;  %v3070_v25 = vld [vmem:[%s7711_s21 + $0x58] sm:$0xff]  ;;  %v2310_v21 = vadd.f32 %v2278_v40, %v2189_v41  ;;  %v2286_v61 = vld [vmem:[%s7711_s21 + $0xa8] sm:$0xff]  ;;  %v2291_v48 = vld [vmem:[%s7711_s21 + $0xd0] sm:$0xff] }
 0x172   : > { %3133 = vst.msk [vmem:[%s7711_s21 + $0x50] sm:$0xff] %vm319_vm0, %v3101_v50  ;;  %v3102_v7 = vadd.f32 %v6676_v24, %v3070_v25  ;;  %2344 = vst.msk [vmem:[%s7711_s21 + $0x78] sm:$0xff] %vm319_vm0, %v2312_v35  ;;  %v3068_v8 = vld [vmem:[%s7711_s21 + $0x48] sm:$0xff]  ;;  %v2289_v29 = vld [vmem:[%s7711_s21 + $0xc0] sm:$0xff] }
 0x173   : > { %v6679_v3 = vpop.f32.mrb[60].mxu0  ;;  %3131 = vst.msk [vmem:[%s7711_s21 + $0x40] sm:$0xff] %vm319_vm0, %v3099_v6  ;;  %v3100_v46 = vadd.f32 %v3068_v8, %v2967_v0  ;;  %2342 = vst.msk [vmem:[%s7711_s21 + $0x68] sm:$0xff] %vm319_vm0, %v2310_v21  ;;  %v2292_v25 = vld [vmem:[%s7711_s21 + $0xd8] sm:$0xff] }
 0x174   : > { %v2980_v5 = vpop.f32.mrb[61].mxu0  ;;  %3134 = vst.msk [vmem:[%s7711_s21 + $0x58] sm:$0xff] %vm319_vm0, %v3102_v7 }
 0x175   : > { %v6680_v31 = vpop.f32.mrb[62].mxu0  ;;  %3132 = vst.msk [vmem:[%s7711_s21 + $0x48] sm:$0xff] %vm319_vm0, %v3100_v46  ;;  %v6649_v33 = vpop.f32.mrb[64].mxu1 }
 0x176   : > { %v2983_v51 = vpop.f32.mrb[63].mxu0  ;;  %v2315_v42 = vadd.f32 %v6649_v33, %v2283_v4  ;;  %v2202_v27 = vpop.f32.mrb[65].mxu1 }
 0x177   : > { %v3073_v10 = vld [vmem:[%s7711_s21 + $0x70] sm:$0xff]  ;;  %v2313_v57 = vadd.f32 %v2281_v30, %v2202_v27  ;;  %v6650_v9 = vpop.f32.mrb[66].mxu1 }
 0x178   : > { %v3105_v58 = vadd.f32 %v6679_v3, %v3073_v10  ;;  %2347 = vst.msk [vmem:[%s7711_s21 + $0x90] sm:$0xff] %vm319_vm0, %v2315_v42  ;;  %v3071_v14 = vld [vmem:[%s7711_s21 + $0x60] sm:$0xff]  ;;  %v2316_v22 = vadd.f32 %v6650_v9, %v2284_v11  ;;  %v2205_v44 = vpop.f32.mrb[67].mxu1 }
 0x179   : > { %v3103_v28 = vadd.f32 %v3071_v14, %v2980_v5  ;;  %2345 = vst.msk [vmem:[%s7711_s21 + $0x80] sm:$0xff] %vm319_vm0, %v2313_v57  ;;  %v3074_v16 = vld [vmem:[%s7711_s21 + $0x78] sm:$0xff]  ;;  %v2314_v37 = vadd.f32 %v2282_v34, %v2205_v44  ;;  %v2290_v5 = vld [vmem:[%s7711_s21 + $0xc8] sm:$0xff]  ;;  %v2295_v57 = vld [vmem:[%s7711_s21 + $0xf0] sm:$0xff] }
 0x17a   : > { %3137 = vst.msk [vmem:[%s7711_s21 + $0x70] sm:$0xff] %vm319_vm0, %v3105_v58  ;;  %v3106_v39 = vadd.f32 %v6680_v31, %v3074_v16  ;;  %2348 = vst.msk [vmem:[%s7711_s21 + $0x98] sm:$0xff] %vm319_vm0, %v2316_v22  ;;  %v3072_v53 = vld [vmem:[%s7711_s21 + $0x68] sm:$0xff]  ;;  %v2293_v14 = vld [vmem:[%s7711_s21 + $0xe0] sm:$0xff] }
 0x17b   : > { %3135 = vst.msk [vmem:[%s7711_s21 + $0x60] sm:$0xff] %vm319_vm0, %v3103_v28  ;;  %v3104_v43 = vadd.f32 %v3072_v53, %v2983_v51  ;;  %2346 = vst.msk [vmem:[%s7711_s21 + $0x88] sm:$0xff] %vm319_vm0, %v2314_v37  ;;  %v2296_v16 = vld [vmem:[%s7711_s21 + $0xf8] sm:$0xff] }
 0x17c   : > { %3138 = vst.msk [vmem:[%s7711_s21 + $0x78] sm:$0xff] %vm319_vm0, %v3106_v39  ;;  %v6683_v54 = vpop.f32.mrb[64].mxu0 }
 0x17d   : > { %3136 = vst.msk [vmem:[%s7711_s21 + $0x68] sm:$0xff] %vm319_vm0, %v3104_v43  ;;  %v6653_v59 = vpop.f32.mrb[68].mxu1  ;;  %v2996_v63 = vpop.f32.mrb[65].mxu0 }
 0x17e   : > { %v2319_v26 = vadd.f32 %v6653_v59, %v2287_v62  ;;  %v2218_v38 = vpop.f32.mrb[69].mxu1  ;;  %v6684_v17 = vpop.f32.mrb[66].mxu0  ;;  %v2294_v59 = vld [vmem:[%s7711_s21 + $0xe8] sm:$0xff] }
 0x17f   : > { %v3077_v23 = vld [vmem:[%s7711_s21 + $0x90] sm:$0xff]  ;;  %v2317_v1 = vadd.f32 %v2285_v49, %v2218_v38  ;;  %v6654_v13 = vpop.f32.mrb[70].mxu1  ;;  %v2999_v20 = vpop.f32.mrb[67].mxu0 }
 0x180   : > { %v3109_v36 = vadd.f32 %v6683_v54, %v3077_v23  ;;  %2351 = vst.msk [vmem:[%s7711_s21 + $0xb0] sm:$0xff] %vm319_vm0, %v2319_v26  ;;  %v3075_v12 = vld [vmem:[%s7711_s21 + $0x80] sm:$0xff]  ;;  %v2320_v60 = vadd.f32 %v6654_v13, %v2288_v19  ;;  %v2221_v15 = vpop.f32.mrb[71].mxu1  ;;  %v3631_v19 = vld [vmem:[%s7711_s21 + $0x10] sm:$0xff] }
 0x181   : > { %v3107_v24 = vadd.f32 %v3075_v12, %v2996_v63  ;;  %2349 = vst.msk [vmem:[%s7711_s21 + $0xa0] sm:$0xff] %vm319_vm0, %v2317_v1  ;;  %v3078_v2 = vld [vmem:[%s7711_s21 + $0x98] sm:$0xff]  ;;  %v2318_v32 = vadd.f32 %v2286_v61, %v2221_v15 }
 0x182   : > { %3141 = vst.msk [vmem:[%s7711_s21 + $0x90] sm:$0xff] %vm319_vm0, %v3109_v36  ;;  %v3110_v0 = vadd.f32 %v6684_v17, %v3078_v2  ;;  %2352 = vst.msk [vmem:[%s7711_s21 + $0xb8] sm:$0xff] %vm319_vm0, %v2320_v60  ;;  %v3076_v56 = vld [vmem:[%s7711_s21 + $0x88] sm:$0xff]  ;;  %v3629_v60 = vld [vmem:[%s7711_s21] sm:$0xff] }
 0x183   : > { %3139 = vst.msk [vmem:[%s7711_s21 + $0x80] sm:$0xff] %vm319_vm0, %v3107_v24  ;;  %v3108_v45 = vadd.f32 %v3076_v56, %v2999_v20  ;;  %2350 = vst.msk [vmem:[%s7711_s21 + $0xa8] sm:$0xff] %vm319_vm0, %v2318_v32  ;;  %v3632_v32 = vld [vmem:[%s7711_s21 + $0x18] sm:$0xff] }
 0x184   : > { %3142 = vst.msk [vmem:[%s7711_s21 + $0x98] sm:$0xff] %vm319_vm0, %v3110_v0  ;;  %v6687_v52 = vpop.f32.mrb[68].mxu0 }
 0x185   : > { %3140 = vst.msk [vmem:[%s7711_s21 + $0x88] sm:$0xff] %vm319_vm0, %v3108_v45  ;;  %v6657_v55 = vpop.f32.mrb[72].mxu1  ;;  %v3012_v47 = vpop.f32.mrb[69].mxu0 }
 0x186   : > { %v2323_v18 = vadd.f32 %v6657_v55, %v2291_v48  ;;  %v2234_v50 = vpop.f32.mrb[73].mxu1  ;;  %v6688_v35 = vpop.f32.mrb[70].mxu0  ;;  %v3630_v55 = vld [vmem:[%s7711_s21 + $0x8] sm:$0xff] }
 0x187   : > { %v3081_v41 = vld [vmem:[%s7711_s21 + $0xb0] sm:$0xff]  ;;  %v2321_v40 = vadd.f32 %v2289_v29, %v2234_v50  ;;  %v6658_v6 = vpop.f32.mrb[74].mxu1  ;;  %v3015_v21 = vpop.f32.mrb[71].mxu0 }
 0x188   : > { %v3113_v7 = vadd.f32 %v6687_v52, %v3081_v41  ;;  %2355 = vst.msk [vmem:[%s7711_s21 + $0xd0] sm:$0xff] %vm319_vm0, %v2323_v18  ;;  %v3079_v8 = vld [vmem:[%s7711_s21 + $0xa0] sm:$0xff]  ;;  %v2324_v3 = vadd.f32 %v6658_v6, %v2292_v25  ;;  %v2237_v46 = vpop.f32.mrb[75].mxu1  ;;  %v3635_v6 = vld [vmem:[%s7711_s21 + $0x30] sm:$0xff] }
 0x189   : > { %v3111_v31 = vadd.f32 %v3079_v8, %v3012_v47  ;;  %2353 = vst.msk [vmem:[%s7711_s21 + $0xc0] sm:$0xff] %vm319_vm0, %v2321_v40  ;;  %v3082_v33 = vld [vmem:[%s7711_s21 + $0xb8] sm:$0xff]  ;;  %v2322_v4 = vadd.f32 %v2290_v5, %v2237_v46  ;;  %v3633_v8 = vld [vmem:[%s7711_s21 + $0x20] sm:$0xff] }
 0x18a   : > { %3145 = vst.msk [vmem:[%s7711_s21 + $0xb0] sm:$0xff] %vm319_vm0, %v3113_v7  ;;  %v3114_v51 = vadd.f32 %v6688_v35, %v3082_v33  ;;  %2356 = vst.msk [vmem:[%s7711_s21 + $0xd8] sm:$0xff] %vm319_vm0, %v2324_v3  ;;  %v3080_v42 = vld [vmem:[%s7711_s21 + $0xa8] sm:$0xff]  ;;  %v3636_v33 = vld [vmem:[%s7711_s21 + $0x38] sm:$0xff] }
 0x18b   : > { %3143 = vst.msk [vmem:[%s7711_s21 + $0xa0] sm:$0xff] %vm319_vm0, %v3111_v31  ;;  %v3112_v27 = vadd.f32 %v3080_v42, %v3015_v21  ;;  %2354 = vst.msk [vmem:[%s7711_s21 + $0xc8] sm:$0xff] %vm319_vm0, %v2322_v4 }
 0x18c   : > { %3146 = vst.msk [vmem:[%s7711_s21 + $0xb8] sm:$0xff] %vm319_vm0, %v3114_v51  ;;  %v6691_v30 = vpop.f32.mrb[72].mxu0 }
 0x18d   : > { %3144 = vst.msk [vmem:[%s7711_s21 + $0xa8] sm:$0xff] %vm319_vm0, %v3112_v27  ;;  %v6661_v10 = vpop.f32.mrb[76].mxu1  ;;  %v3028_v9 = vpop.f32.mrb[73].mxu0 }
 0x18e   : > { %v2327_v11 = vadd.f32 %v6661_v10, %v2295_v57  ;;  %v2250_v58 = vpop.f32.mrb[77].mxu1  ;;  %v6692_v22 = vpop.f32.mrb[74].mxu0  ;;  %v3634_v10 = vld [vmem:[%s7711_s21 + $0x28] sm:$0xff] }
 0x18f   : > { %v3085_v44 = vld [vmem:[%s7711_s21 + $0xd0] sm:$0xff]  ;;  %v2325_v34 = vadd.f32 %v2293_v14, %v2250_v58  ;;  %v6662_v28 = vpop.f32.mrb[78].mxu1  ;;  %v3031_v37 = vpop.f32.mrb[75].mxu0 }
 0x190   : > { %v3117_v39 = vadd.f32 %v6691_v30, %v3085_v44  ;;  %2359 = vst.msk [vmem:[%s7711_s21 + $0xf0] sm:$0xff] %vm319_vm0, %v2327_v11  ;;  %v3083_v53 = vld [vmem:[%s7711_s21 + $0xc0] sm:$0xff]  ;;  %v2328_v43 = vadd.f32 %v6662_v28, %v2296_v16  ;;  %v2253_v54 = vpop.f32.mrb[79].mxu1  ;;  %v3639_v28 = vld [vmem:[%s7711_s21 + $0x50] sm:$0xff] }
 0x191   : > { %v3115_v62 = vadd.f32 %v3083_v53, %v3028_v9  ;;  %2357 = vst.msk [vmem:[%s7711_s21 + $0xe0] sm:$0xff] %vm319_vm0, %v2325_v34  ;;  %v3086_v63 = vld [vmem:[%s7711_s21 + $0xd8] sm:$0xff]  ;;  %v2326_v26 = vadd.f32 %v2294_v59, %v2253_v54  ;;  %v3637_v53 = vld [vmem:[%s7711_s21 + $0x40] sm:$0xff] }
 0x192   : > { %3149 = vst.msk [vmem:[%s7711_s21 + $0xd0] sm:$0xff] %vm319_vm0, %v3117_v39  ;;  %v3118_v38 = vadd.f32 %v6692_v22, %v3086_v63  ;;  %2360 = vst.msk [vmem:[%s7711_s21 + $0xf8] sm:$0xff] %vm319_vm0, %v2328_v43  ;;  %v3084_v49 = vld [vmem:[%s7711_s21 + $0xc8] sm:$0xff]  ;;  %v3640_v63 = vld [vmem:[%s7711_s21 + $0x58] sm:$0xff] }
 0x193   : > { %3147 = vst.msk [vmem:[%s7711_s21 + $0xc0] sm:$0xff] %vm319_vm0, %v3115_v62  ;;  %v3116_v17 = vadd.f32 %v3084_v49, %v3031_v37  ;;  %2358 = vst.msk [vmem:[%s7711_s21 + $0xe8] sm:$0xff] %vm319_vm0, %v2326_v26 }
 0x194   : > { %3150 = vst.msk [vmem:[%s7711_s21 + $0xd8] sm:$0xff] %vm319_vm0, %v3118_v38 }
 0x195   : > { %v6695_v23 = vpop.f32.mrb[76].mxu0  ;;  %3148 = vst.msk [vmem:[%s7711_s21 + $0xc8] sm:$0xff] %vm319_vm0, %v3116_v17 }
 0x196   : > { %v3044_v1 = vpop.f32.mrb[77].mxu0  ;;  %v6701_v13 = vpop.f32.mrb[80].mxu1 }
 0x197   : > { %v3663_v20 = vadd.f32 %v6701_v13, %v3631_v19  ;;  %v6696_v36 = vpop.f32.mrb[78].mxu0  ;;  %v3502_v12 = vpop.f32.mrb[81].mxu1  ;;  %v3089_v15 = vld [vmem:[%s7711_s21 + $0xf0] sm:$0xff] }
 0x198   : > { %v3661_v61 = vadd.f32 %v3629_v60, %v3502_v12  ;;  %v3047_v24 = vpop.f32.mrb[79].mxu0  ;;  %v6702_v2 = vpop.f32.mrb[82].mxu1  ;;  %v3121_v0 = vadd.f32 %v6695_v23, %v3089_v15  ;;  %v3087_v56 = vld [vmem:[%s7711_s21 + $0xe0] sm:$0xff] }
 0x199   : > { %3695 = vst.msk [vmem:[%s7711_s21 + $0x10] sm:$0xff] %vm319_vm0, %v3663_v20  ;;  %v3664_v45 = vadd.f32 %v6702_v2, %v3632_v32  ;;  %v3505_v52 = vpop.f32.mrb[83].mxu1  ;;  %v3119_v48 = vadd.f32 %v3087_v56, %v3044_v1  ;;  %v3090_v47 = vld [vmem:[%s7711_s21 + $0xf8] sm:$0xff]  ;;  %v3638_v1 = vld [vmem:[%s7711_s21 + $0x48] sm:$0xff]  ;;  %v3641_v56 = vld [vmem:[%s7711_s21 + $0x60] sm:$0xff] }
 0x19a   : > { %3693 = vst.msk [vmem:[%s7711_s21] sm:$0xff] %vm319_vm0, %v3661_v61  ;;  %v3662_v18 = vadd.f32 %v3630_v55, %v3505_v52  ;;  %3153 = vst.msk [vmem:[%s7711_s21 + $0xf0] sm:$0xff] %vm319_vm0, %v3121_v0  ;;  %v3122_v50 = vadd.f32 %v6696_v36, %v3090_v47  ;;  %v3088_v29 = vld [vmem:[%s7711_s21 + $0xe8] sm:$0xff]  ;;  %v3644_v47 = vld [vmem:[%s7711_s21 + $0x78] sm:$0xff] }
 0x19b   : > { %3696 = vst.msk [vmem:[%s7711_s21 + $0x18] sm:$0xff] %vm319_vm0, %v3664_v45  ;;  %3151 = vst.msk [vmem:[%s7711_s21 + $0xe0] sm:$0xff] %vm319_vm0, %v3119_v48  ;;  %v3120_v35 = vadd.f32 %v3088_v29, %v3047_v24  ;;  %v3643_v24 = vld [vmem:[%s7711_s21 + $0x70] sm:$0xff] }
 0x19c   : > { %3694 = vst.msk [vmem:[%s7711_s21 + $0x8] sm:$0xff] %vm319_vm0, %v3662_v18  ;;  %3154 = vst.msk [vmem:[%s7711_s21 + $0xf8] sm:$0xff] %vm319_vm0, %v3122_v50 }
 0x19d   : > { %v6735_v41 = vpop.f32.mrb[80].mxu0  ;;  %3152 = vst.msk [vmem:[%s7711_s21 + $0xe8] sm:$0xff] %vm319_vm0, %v3120_v35 }
 0x19e   : > { %v6705_v40 = vpop.f32.mrb[84].mxu1  ;;  %v3932_v25 = vpop.f32.mrb[81].mxu0 }
 0x19f   : > { %v3667_v21 = vadd.f32 %v6705_v40, %v3635_v6  ;;  %v3518_v7 = vpop.f32.mrb[85].mxu1  ;;  %v6736_v3 = vpop.f32.mrb[82].mxu0  ;;  %v3642_v40 = vld [vmem:[%s7711_s21 + $0x68] sm:$0xff] }
 0x1a0   : > { %v4061_v46 = vld [vmem:[%s7711_s21 + $0x10] sm:$0xff]  ;;  %v3665_v5 = vadd.f32 %v3633_v8, %v3518_v7  ;;  %v6706_v31 = vpop.f32.mrb[86].mxu1  ;;  %v3935_v4 = vpop.f32.mrb[83].mxu0 }
 0x1a1   : > { %v4093_v51 = vadd.f32 %v6735_v41, %v4061_v46  ;;  %3699 = vst.msk [vmem:[%s7711_s21 + $0x30] sm:$0xff] %vm319_vm0, %v3667_v21  ;;  %v4059_v42 = vld [vmem:[%s7711_s21] sm:$0xff]  ;;  %v3668_v27 = vadd.f32 %v6706_v31, %v3636_v33  ;;  %v3521_v30 = vpop.f32.mrb[87].mxu1  ;;  %v3647_v31 = vld [vmem:[%s7711_s21 + $0x90] sm:$0xff] }
 0x1a2   : > { %v4091_v57 = vadd.f32 %v4059_v42, %v3932_v25  ;;  %3697 = vst.msk [vmem:[%s7711_s21 + $0x20] sm:$0xff] %vm319_vm0, %v3665_v5  ;;  %v4062_v9 = vld [vmem:[%s7711_s21 + $0x18] sm:$0xff]  ;;  %v3666_v11 = vadd.f32 %v3634_v10, %v3521_v30  ;;  %v3645_v42 = vld [vmem:[%s7711_s21 + $0x80] sm:$0xff] }
 0x1a3   : > { %4125 = vst.msk [vmem:[%s7711_s21 + $0x10] sm:$0xff] %vm319_vm0, %v4093_v51  ;;  %v4094_v58 = vadd.f32 %v6736_v3, %v4062_v9  ;;  %3700 = vst.msk [vmem:[%s7711_s21 + $0x38] sm:$0xff] %vm319_vm0, %v3668_v27  ;;  %v4060_v14 = vld [vmem:[%s7711_s21 + $0x8] sm:$0xff]  ;;  %v3648_v9 = vld [vmem:[%s7711_s21 + $0x98] sm:$0xff] }
 0x1a4   : > { %4123 = vst.msk [vmem:[%s7711_s21] sm:$0xff] %vm319_vm0, %v4091_v57  ;;  %v4092_v22 = vadd.f32 %v4060_v14, %v3935_v4  ;;  %3698 = vst.msk [vmem:[%s7711_s21 + $0x28] sm:$0xff] %vm319_vm0, %v3666_v11 }
 0x1a5   : > { %4126 = vst.msk [vmem:[%s7711_s21 + $0x18] sm:$0xff] %vm319_vm0, %v4094_v58  ;;  %v6739_v44 = vpop.f32.mrb[84].mxu0 }
 0x1a6   : > { %4124 = vst.msk [vmem:[%s7711_s21 + $0x8] sm:$0xff] %vm319_vm0, %v4092_v22  ;;  %v6709_v34 = vpop.f32.mrb[88].mxu1  ;;  %v3948_v16 = vpop.f32.mrb[85].mxu0 }
 0x1a7   : > { %v3671_v37 = vadd.f32 %v6709_v34, %v3639_v28  ;;  %v3534_v39 = vpop.f32.mrb[89].mxu1  ;;  %v6740_v43 = vpop.f32.mrb[86].mxu0  ;;  %v3646_v34 = vld [vmem:[%s7711_s21 + $0x88] sm:$0xff] }
 0x1a8   : > { %v4065_v54 = vld [vmem:[%s7711_s21 + $0x30] sm:$0xff]  ;;  %v3669_v59 = vadd.f32 %v3637_v53, %v3534_v39  ;;  %v6710_v62 = vpop.f32.mrb[90].mxu1  ;;  %v3951_v26 = vpop.f32.mrb[87].mxu0 }
 0x1a9   : > { %v4097_v38 = vadd.f32 %v6739_v44, %v4065_v54  ;;  %3703 = vst.msk [vmem:[%s7711_s21 + $0x50] sm:$0xff] %vm319_vm0, %v3671_v37  ;;  %v4063_v49 = vld [vmem:[%s7711_s21 + $0x20] sm:$0xff]  ;;  %v3672_v17 = vadd.f32 %v6710_v62, %v3640_v63  ;;  %v3537_v23 = vpop.f32.mrb[91].mxu1  ;;  %v3651_v62 = vld [vmem:[%s7711_s21 + $0xb0] sm:$0xff] }
 0x1aa   : > { %v4095_v13 = vadd.f32 %v4063_v49, %v3948_v16  ;;  %3701 = vst.msk [vmem:[%s7711_s21 + $0x40] sm:$0xff] %vm319_vm0, %v3669_v59  ;;  %v4066_v19 = vld [vmem:[%s7711_s21 + $0x38] sm:$0xff]  ;;  %v3670_v20 = vadd.f32 %v3638_v1, %v3537_v23  ;;  %v3649_v49 = vld [vmem:[%s7711_s21 + $0xa0] sm:$0xff] }
 0x1ab   : > { %4129 = vst.msk [vmem:[%s7711_s21 + $0x30] sm:$0xff] %vm319_vm0, %v4097_v38  ;;  %v4098_v36 = vadd.f32 %v6740_v43, %v4066_v19  ;;  %3704 = vst.msk [vmem:[%s7711_s21 + $0x58] sm:$0xff] %vm319_vm0, %v3672_v17  ;;  %v4064_v12 = vld [vmem:[%s7711_s21 + $0x28] sm:$0xff]  ;;  %v3652_v19 = vld [vmem:[%s7711_s21 + $0xb8] sm:$0xff] }
 0x1ac   : > { %4127 = vst.msk [vmem:[%s7711_s21 + $0x20] sm:$0xff] %vm319_vm0, %v4095_v13  ;;  %v4096_v60 = vadd.f32 %v4064_v12, %v3951_v26  ;;  %3702 = vst.msk [vmem:[%s7711_s21 + $0x48] sm:$0xff] %vm319_vm0, %v3670_v20 }
 0x1ad   : > { %4130 = vst.msk [vmem:[%s7711_s21 + $0x38] sm:$0xff] %vm319_vm0, %v4098_v36  ;;  %v6743_v15 = vpop.f32.mrb[88].mxu0 }
 0x1ae   : > { %4128 = vst.msk [vmem:[%s7711_s21 + $0x28] sm:$0xff] %vm319_vm0, %v4096_v60  ;;  %v6713_v61 = vpop.f32.mrb[92].mxu1  ;;  %v3964_v2 = vpop.f32.mrb[89].mxu0 }
 0x1af   : > { %v3675_v32 = vadd.f32 %v6713_v61, %v3643_v24  ;;  %v3550_v0 = vpop.f32.mrb[93].mxu1  ;;  %v6744_v45 = vpop.f32.mrb[90].mxu0  ;;  %v3650_v61 = vld [vmem:[%s7711_s21 + $0xa8] sm:$0xff] }
 0x1b0   : > { %v4069_v52 = vld [vmem:[%s7711_s21 + $0x50] sm:$0xff]  ;;  %v3673_v55 = vadd.f32 %v3641_v56, %v3550_v0  ;;  %v6714_v48 = vpop.f32.mrb[94].mxu1  ;;  %v3967_v18 = vpop.f32.mrb[91].mxu0 }
 0x1b1   : > { %v4101_v50 = vadd.f32 %v6743_v15, %v4069_v52  ;;  %3707 = vst.msk [vmem:[%s7711_s21 + $0x70] sm:$0xff] %vm319_vm0, %v3675_v32  ;;  %v4067_v29 = vld [vmem:[%s7711_s21 + $0x40] sm:$0xff]  ;;  %v3676_v35 = vadd.f32 %v6714_v48, %v3644_v47  ;;  %v3553_v41 = vpop.f32.mrb[95].mxu1  ;;  %v3655_v48 = vld [vmem:[%s7711_s21 + $0xd0] sm:$0xff] }
 0x1b2   : > { %v4099_v6 = vadd.f32 %v4067_v29, %v3964_v2  ;;  %3705 = vst.msk [vmem:[%s7711_s21 + $0x60] sm:$0xff] %vm319_vm0, %v3673_v55  ;;  %v4070_v25 = vld [vmem:[%s7711_s21 + $0x58] sm:$0xff]  ;;  %v3674_v21 = vadd.f32 %v3642_v40, %v3553_v41  ;;  %v3653_v29 = vld [vmem:[%s7711_s21 + $0xc0] sm:$0xff] }
 0x1b3   : > { %4133 = vst.msk [vmem:[%s7711_s21 + $0x50] sm:$0xff] %vm319_vm0, %v4101_v50  ;;  %v4102_v7 = vadd.f32 %v6744_v45, %v4070_v25  ;;  %3708 = vst.msk [vmem:[%s7711_s21 + $0x78] sm:$0xff] %vm319_vm0, %v3676_v35  ;;  %v4068_v8 = vld [vmem:[%s7711_s21 + $0x48] sm:$0xff]  ;;  %v3656_v25 = vld [vmem:[%s7711_s21 + $0xd8] sm:$0xff] }
 0x1b4   : > { %4131 = vst.msk [vmem:[%s7711_s21 + $0x40] sm:$0xff] %vm319_vm0, %v4099_v6  ;;  %v4100_v3 = vadd.f32 %v4068_v8, %v3967_v18  ;;  %3706 = vst.msk [vmem:[%s7711_s21 + $0x68] sm:$0xff] %vm319_vm0, %v3674_v21 }
 0x1b5   : > { %4134 = vst.msk [vmem:[%s7711_s21 + $0x58] sm:$0xff] %vm319_vm0, %v4102_v7  ;;  %v6747_v46 = vpop.f32.mrb[92].mxu0 }
 0x1b6   : > { %4132 = vst.msk [vmem:[%s7711_s21 + $0x48] sm:$0xff] %vm319_vm0, %v4100_v3  ;;  %v6717_v5 = vpop.f32.mrb[96].mxu1  ;;  %v3980_v33 = vpop.f32.mrb[93].mxu0 }
 0x1b7   : > { %v3679_v4 = vadd.f32 %v6717_v5, %v3647_v31  ;;  %v3566_v51 = vpop.f32.mrb[97].mxu1  ;;  %v6748_v27 = vpop.f32.mrb[94].mxu0  ;;  %v3654_v5 = vld [vmem:[%s7711_s21 + $0xc8] sm:$0xff] }
 0x1b8   : > { %v4073_v30 = vld [vmem:[%s7711_s21 + $0x70] sm:$0xff]  ;;  %v3677_v10 = vadd.f32 %v3645_v42, %v3566_v51  ;;  %v6718_v57 = vpop.f32.mrb[98].mxu1  ;;  %v3983_v11 = vpop.f32.mrb[95].mxu0 }
 0x1b9   : > { %v4105_v58 = vadd.f32 %v6747_v46, %v4073_v30  ;;  %3711 = vst.msk [vmem:[%s7711_s21 + $0x90] sm:$0xff] %vm319_vm0, %v3679_v4  ;;  %v4071_v14 = vld [vmem:[%s7711_s21 + $0x60] sm:$0xff]  ;;  %v3680_v22 = vadd.f32 %v6718_v57, %v3648_v9  ;;  %v3569_v44 = vpop.f32.mrb[99].mxu1  ;;  %v3659_v57 = vld [vmem:[%s7711_s21 + $0xf0] sm:$0xff] }
 0x1ba   : > { %v4103_v28 = vadd.f32 %v4071_v14, %v3980_v33  ;;  %3709 = vst.msk [vmem:[%s7711_s21 + $0x80] sm:$0xff] %vm319_vm0, %v3677_v10  ;;  %v4074_v16 = vld [vmem:[%s7711_s21 + $0x78] sm:$0xff]  ;;  %v3678_v37 = vadd.f32 %v3646_v34, %v3569_v44  ;;  %v3657_v14 = vld [vmem:[%s7711_s21 + $0xe0] sm:$0xff] }
 0x1bb   : > { %4137 = vst.msk [vmem:[%s7711_s21 + $0x70] sm:$0xff] %vm319_vm0, %v4105_v58  ;;  %v4106_v39 = vadd.f32 %v6748_v27, %v4074_v16  ;;  %3712 = vst.msk [vmem:[%s7711_s21 + $0x98] sm:$0xff] %vm319_vm0, %v3680_v22  ;;  %v4072_v53 = vld [vmem:[%s7711_s21 + $0x68] sm:$0xff]  ;;  %v3660_v16 = vld [vmem:[%s7711_s21 + $0xf8] sm:$0xff] }
 0x1bc   : > { %4135 = vst.msk [vmem:[%s7711_s21 + $0x60] sm:$0xff] %vm319_vm0, %v4103_v28  ;;  %v4104_v43 = vadd.f32 %v4072_v53, %v3983_v11  ;;  %3710 = vst.msk [vmem:[%s7711_s21 + $0x88] sm:$0xff] %vm319_vm0, %v3678_v37 }
 0x1bd   : > { %4138 = vst.msk [vmem:[%s7711_s21 + $0x78] sm:$0xff] %vm319_vm0, %v4106_v39  ;;  %v6751_v54 = vpop.f32.mrb[96].mxu0 }
 0x1be   : > { %4136 = vst.msk [vmem:[%s7711_s21 + $0x68] sm:$0xff] %vm319_vm0, %v4104_v43  ;;  %v6721_v59 = vpop.f32.mrb[100].mxu1  ;;  %v3996_v63 = vpop.f32.mrb[97].mxu0 }
 0x1bf   : > { %v3683_v26 = vadd.f32 %v6721_v59, %v3651_v62  ;;  %v3582_v38 = vpop.f32.mrb[101].mxu1  ;;  %v6752_v17 = vpop.f32.mrb[98].mxu0  ;;  %v3658_v59 = vld [vmem:[%s7711_s21 + $0xe8] sm:$0xff] }
 0x1c0   : > { %v4077_v23 = vld [vmem:[%s7711_s21 + $0x90] sm:$0xff]  ;;  %v3681_v1 = vadd.f32 %v3649_v49, %v3582_v38  ;;  %v6722_v13 = vpop.f32.mrb[102].mxu1  ;;  %v3999_v20 = vpop.f32.mrb[99].mxu0 }
 0x1c1   : > { %v4109_v36 = vadd.f32 %v6751_v54, %v4077_v23  ;;  %3715 = vst.msk [vmem:[%s7711_s21 + $0xb0] sm:$0xff] %vm319_vm0, %v3683_v26  ;;  %v4075_v12 = vld [vmem:[%s7711_s21 + $0x80] sm:$0xff]  ;;  %v3684_v60 = vadd.f32 %v6722_v13, %v3652_v19  ;;  %v3585_v15 = vpop.f32.mrb[103].mxu1  ;;  %v4855_v19 = vld [vmem:[%s7711_s21 + $0x10] sm:$0xff] }
 0x1c2   : > { %v4107_v24 = vadd.f32 %v4075_v12, %v3996_v63  ;;  %3713 = vst.msk [vmem:[%s7711_s21 + $0xa0] sm:$0xff] %vm319_vm0, %v3681_v1  ;;  %v4078_v2 = vld [vmem:[%s7711_s21 + $0x98] sm:$0xff]  ;;  %v3682_v32 = vadd.f32 %v3650_v61, %v3585_v15 }
 0x1c3   : > { %4141 = vst.msk [vmem:[%s7711_s21 + $0x90] sm:$0xff] %vm319_vm0, %v4109_v36  ;;  %v4110_v0 = vadd.f32 %v6752_v17, %v4078_v2  ;;  %3716 = vst.msk [vmem:[%s7711_s21 + $0xb8] sm:$0xff] %vm319_vm0, %v3684_v60  ;;  %v4076_v56 = vld [vmem:[%s7711_s21 + $0x88] sm:$0xff]  ;;  %v4853_v60 = vld [vmem:[%s7711_s21] sm:$0xff] }
 0x1c4   : > { %4139 = vst.msk [vmem:[%s7711_s21 + $0x80] sm:$0xff] %vm319_vm0, %v4107_v24  ;;  %v4108_v45 = vadd.f32 %v4076_v56, %v3999_v20  ;;  %3714 = vst.msk [vmem:[%s7711_s21 + $0xa8] sm:$0xff] %vm319_vm0, %v3682_v32  ;;  %v4856_v32 = vld [vmem:[%s7711_s21 + $0x18] sm:$0xff] }
 0x1c5   : > { %4142 = vst.msk [vmem:[%s7711_s21 + $0x98] sm:$0xff] %vm319_vm0, %v4110_v0  ;;  %v6755_v52 = vpop.f32.mrb[100].mxu0 }
 0x1c6   : > { %4140 = vst.msk [vmem:[%s7711_s21 + $0x88] sm:$0xff] %vm319_vm0, %v4108_v45  ;;  %v6725_v55 = vpop.f32.mrb[104].mxu1  ;;  %v4012_v47 = vpop.f32.mrb[101].mxu0 }
 0x1c7   : > { %v3687_v18 = vadd.f32 %v6725_v55, %v3655_v48  ;;  %v3598_v50 = vpop.f32.mrb[105].mxu1  ;;  %v6756_v35 = vpop.f32.mrb[102].mxu0  ;;  %v4854_v55 = vld [vmem:[%s7711_s21 + $0x8] sm:$0xff] }
 0x1c8   : > { %v4081_v41 = vld [vmem:[%s7711_s21 + $0xb0] sm:$0xff]  ;;  %v3685_v40 = vadd.f32 %v3653_v29, %v3598_v50  ;;  %v6726_v6 = vpop.f32.mrb[106].mxu1  ;;  %v4015_v21 = vpop.f32.mrb[103].mxu0 }
 0x1c9   : > { %v4113_v7 = vadd.f32 %v6755_v52, %v4081_v41  ;;  %3719 = vst.msk [vmem:[%s7711_s21 + $0xd0] sm:$0xff] %vm319_vm0, %v3687_v18  ;;  %v4079_v8 = vld [vmem:[%s7711_s21 + $0xa0] sm:$0xff]  ;;  %v3688_v3 = vadd.f32 %v6726_v6, %v3656_v25  ;;  %v3601_v46 = vpop.f32.mrb[107].mxu1  ;;  %v4859_v6 = vld [vmem:[%s7711_s21 + $0x30] sm:$0xff] }
 0x1ca   : > { %v4111_v31 = vadd.f32 %v4079_v8, %v4012_v47  ;;  %3717 = vst.msk [vmem:[%s7711_s21 + $0xc0] sm:$0xff] %vm319_vm0, %v3685_v40  ;;  %v4082_v33 = vld [vmem:[%s7711_s21 + $0xb8] sm:$0xff]  ;;  %v3686_v4 = vadd.f32 %v3654_v5, %v3601_v46  ;;  %v4857_v8 = vld [vmem:[%s7711_s21 + $0x20] sm:$0xff] }
 0x1cb   : > { %4145 = vst.msk [vmem:[%s7711_s21 + $0xb0] sm:$0xff] %vm319_vm0, %v4113_v7  ;;  %v4114_v51 = vadd.f32 %v6756_v35, %v4082_v33  ;;  %3720 = vst.msk [vmem:[%s7711_s21 + $0xd8] sm:$0xff] %vm319_vm0, %v3688_v3  ;;  %v4080_v42 = vld [vmem:[%s7711_s21 + $0xa8] sm:$0xff]  ;;  %v4860_v33 = vld [vmem:[%s7711_s21 + $0x38] sm:$0xff] }
 0x1cc   : > { %4143 = vst.msk [vmem:[%s7711_s21 + $0xa0] sm:$0xff] %vm319_vm0, %v4111_v31  ;;  %v4112_v27 = vadd.f32 %v4080_v42, %v4015_v21  ;;  %3718 = vst.msk [vmem:[%s7711_s21 + $0xc8] sm:$0xff] %vm319_vm0, %v3686_v4 }
 0x1cd   : > { %4146 = vst.msk [vmem:[%s7711_s21 + $0xb8] sm:$0xff] %vm319_vm0, %v4114_v51  ;;  %v6759_v30 = vpop.f32.mrb[104].mxu0 }
 0x1ce   : > { %4144 = vst.msk [vmem:[%s7711_s21 + $0xa8] sm:$0xff] %vm319_vm0, %v4112_v27  ;;  %v6729_v10 = vpop.f32.mrb[108].mxu1  ;;  %v4028_v9 = vpop.f32.mrb[105].mxu0 }
 0x1cf   : > { %v3691_v11 = vadd.f32 %v6729_v10, %v3659_v57  ;;  %v3614_v58 = vpop.f32.mrb[109].mxu1  ;;  %v6760_v22 = vpop.f32.mrb[106].mxu0  ;;  %v4858_v10 = vld [vmem:[%s7711_s21 + $0x28] sm:$0xff] }
 0x1d0   : > { %v4085_v44 = vld [vmem:[%s7711_s21 + $0xd0] sm:$0xff]  ;;  %v3689_v34 = vadd.f32 %v3657_v14, %v3614_v58  ;;  %v6730_v28 = vpop.f32.mrb[110].mxu1  ;;  %v4031_v37 = vpop.f32.mrb[107].mxu0 }
 0x1d1   : > { %v4117_v39 = vadd.f32 %v6759_v30, %v4085_v44  ;;  %3723 = vst.msk [vmem:[%s7711_s21 + $0xf0] sm:$0xff] %vm319_vm0, %v3691_v11  ;;  %v4083_v53 = vld [vmem:[%s7711_s21 + $0xc0] sm:$0xff]  ;;  %v3692_v43 = vadd.f32 %v6730_v28, %v3660_v16  ;;  %v3617_v54 = vpop.f32.mrb[111].mxu1  ;;  %v4863_v28 = vld [vmem:[%s7711_s21 + $0x50] sm:$0xff] }
 0x1d2   : > { %v4115_v62 = vadd.f32 %v4083_v53, %v4028_v9  ;;  %3721 = vst.msk [vmem:[%s7711_s21 + $0xe0] sm:$0xff] %vm319_vm0, %v3689_v34  ;;  %v4086_v63 = vld [vmem:[%s7711_s21 + $0xd8] sm:$0xff]  ;;  %v3690_v26 = vadd.f32 %v3658_v59, %v3617_v54  ;;  %v4861_v53 = vld [vmem:[%s7711_s21 + $0x40] sm:$0xff] }
 0x1d3   : > { %4149 = vst.msk [vmem:[%s7711_s21 + $0xd0] sm:$0xff] %vm319_vm0, %v4117_v39  ;;  %v4118_v38 = vadd.f32 %v6760_v22, %v4086_v63  ;;  %3724 = vst.msk [vmem:[%s7711_s21 + $0xf8] sm:$0xff] %vm319_vm0, %v3692_v43  ;;  %v4084_v49 = vld [vmem:[%s7711_s21 + $0xc8] sm:$0xff]  ;;  %v8856_v54 = vld [vmem:[%s9151_s2] ss:$0 sm:$0xff] }
 0x1d4   : > { %4147 = vst.msk [vmem:[%s7711_s21 + $0xc0] sm:$0xff] %vm319_vm0, %v4115_v62  ;;  %v4116_v17 = vadd.f32 %v4084_v49, %v4031_v37  ;;  %3722 = vst.msk [vmem:[%s7711_s21 + $0xe8] sm:$0xff] %vm319_vm0, %v3690_v26  ;;  %v4864_v26 = vld [vmem:[%s7711_s21 + $0x58] sm:$0xff] }
 0x1d5   : > { %4150 = vst.msk [vmem:[%s7711_s21 + $0xd8] sm:$0xff] %vm319_vm0, %v4118_v38  ;;  %v6763_v23 = vpop.f32.mrb[108].mxu0 }
 0x1d6   : > { %4148 = vst.msk [vmem:[%s7711_s21 + $0xc8] sm:$0xff] %vm319_vm0, %v4116_v17  ;;  %v4044_v1 = vpop.f32.mrb[109].mxu0  ;;  %v6769_v13 = vpop.f32.mrb[112].mxu1 }
 0x1d7   : > { %v4887_v20 = vadd.f32 %v6769_v13, %v4855_v19  ;;  %v6764_v36 = vpop.f32.mrb[110].mxu0  ;;  %v4726_v12 = vpop.f32.mrb[113].mxu1  ;;  %v4862_v13 = vld [vmem:[%s7711_s21 + $0x48] sm:$0xff] }
 0x1d8   : > { %v4089_v15 = vld [vmem:[%s7711_s21 + $0xf0] sm:$0xff]  ;;  %v4885_v61 = vadd.f32 %v4853_v60, %v4726_v12  ;;  %v4047_v24 = vpop.f32.mrb[111].mxu0  ;;  %v6770_v2 = vpop.f32.mrb[114].mxu1 }
 0x1d9   : > { %v4121_v0 = vadd.f32 %v6763_v23, %v4089_v15  ;;  %v4087_v56 = vld [vmem:[%s7711_s21 + $0xe0] sm:$0xff]  ;;  %4919 = vst.msk [vmem:[%s7711_s21 + $0x10] sm:$0xff] %vm319_vm0, %v4887_v20  ;;  %v4888_v45 = vadd.f32 %v6770_v2, %v4856_v32  ;;  %v4729_v52 = vpop.f32.mrb[115].mxu1 }
 0x1da   : > { %v4119_v48 = vadd.f32 %v4087_v56, %v4044_v1  ;;  %v4090_v47 = vld [vmem:[%s7711_s21 + $0xf8] sm:$0xff]  ;;  %4917 = vst.msk [vmem:[%s7711_s21] sm:$0xff] %vm319_vm0, %v4885_v61  ;;  %v4886_v18 = vadd.f32 %v4854_v55, %v4729_v52 }
 0x1db   : > { %4153 = vst.msk [vmem:[%s7711_s21 + $0xf0] sm:$0xff] %vm319_vm0, %v4121_v0  ;;  %v4122_v50 = vadd.f32 %v6764_v36, %v4090_v47  ;;  %v4088_v29 = vld [vmem:[%s7711_s21 + $0xe8] sm:$0xff]  ;;  %4920 = vst.msk [vmem:[%s7711_s21 + $0x18] sm:$0xff] %vm319_vm0, %v4888_v45 }
 0x1dc   : > { %4151 = vst.msk [vmem:[%s7711_s21 + $0xe0] sm:$0xff] %vm319_vm0, %v4119_v48  ;;  %v4120_v35 = vadd.f32 %v4088_v29, %v4047_v24  ;;  %4918 = vst.msk [vmem:[%s7711_s21 + $0x8] sm:$0xff] %vm319_vm0, %v4886_v18 }
 0x1dd   : > { %4154 = vst.msk [vmem:[%s7711_s21 + $0xf8] sm:$0xff] %vm319_vm0, %v4122_v50  ;;  %v6803_v41 = vpop.f32.mrb[112].mxu0  ;;  %v4867_v50 = vld [vmem:[%s7711_s21 + $0x70] sm:$0xff] }
 0x1de   : > { %4152 = vst.msk [vmem:[%s7711_s21 + $0xe8] sm:$0xff] %vm319_vm0, %v4120_v35  ;;  %v6773_v40 = vpop.f32.mrb[116].mxu1  ;;  %v5296_v25 = vpop.f32.mrb[113].mxu0 }
 0x1df   : > { %v4891_v21 = vadd.f32 %v6773_v40, %v4859_v6  ;;  %v4742_v7 = vpop.f32.mrb[117].mxu1  ;;  %v6804_v3 = vpop.f32.mrb[114].mxu0  ;;  %v4865_v6 = vld [vmem:[%s7711_s21 + $0x60] sm:$0xff] }
 0x1e0   : > { %v5425_v46 = vld [vmem:[%s7711_s21 + $0x10] sm:$0xff]  ;;  %v4889_v5 = vadd.f32 %v4857_v8, %v4742_v7  ;;  %v6774_v31 = vpop.f32.mrb[118].mxu1  ;;  %v5299_v4 = vpop.f32.mrb[115].mxu0 }
 0x1e1   : > { %v5457_v51 = vadd.f32 %v6803_v41, %v5425_v46  ;;  %4923 = vst.msk [vmem:[%s7711_s21 + $0x30] sm:$0xff] %vm319_vm0, %v4891_v21  ;;  %v5423_v42 = vld [vmem:[%s7711_s21] sm:$0xff]  ;;  %v4892_v27 = vadd.f32 %v6774_v31, %v4860_v33  ;;  %v4745_v30 = vpop.f32.mrb[119].mxu1  ;;  %v4868_v46 = vld [vmem:[%s7711_s21 + $0x78] sm:$0xff] }
 0x1e2   : > { %v5455_v57 = vadd.f32 %v5423_v42, %v5296_v25  ;;  %4921 = vst.msk [vmem:[%s7711_s21 + $0x20] sm:$0xff] %vm319_vm0, %v4889_v5  ;;  %v5426_v9 = vld [vmem:[%s7711_s21 + $0x18] sm:$0xff]  ;;  %v4890_v11 = vadd.f32 %v4858_v10, %v4745_v30  ;;  %v4866_v42 = vld [vmem:[%s7711_s21 + $0x68] sm:$0xff] }
 0x1e3   : > { %5489 = vst.msk [vmem:[%s7711_s21 + $0x10] sm:$0xff] %vm319_vm0, %v5457_v51  ;;  %v5458_v58 = vadd.f32 %v6804_v3, %v5426_v9  ;;  %4924 = vst.msk [vmem:[%s7711_s21 + $0x38] sm:$0xff] %vm319_vm0, %v4892_v27  ;;  %v5424_v14 = vld [vmem:[%s7711_s21 + $0x8] sm:$0xff] }
 0x1e4   : > { %5487 = vst.msk [vmem:[%s7711_s21] sm:$0xff] %vm319_vm0, %v5455_v57  ;;  %v5456_v22 = vadd.f32 %v5424_v14, %v5299_v4  ;;  %4922 = vst.msk [vmem:[%s7711_s21 + $0x28] sm:$0xff] %vm319_vm0, %v4890_v11 }
 0x1e5   : > { %5490 = vst.msk [vmem:[%s7711_s21 + $0x18] sm:$0xff] %vm319_vm0, %v5458_v58  ;;  %v6807_v44 = vpop.f32.mrb[116].mxu0 }
 0x1e6   : > { %5488 = vst.msk [vmem:[%s7711_s21 + $0x8] sm:$0xff] %vm319_vm0, %v5456_v22  ;;  %v6777_v34 = vpop.f32.mrb[120].mxu1  ;;  %v5312_v16 = vpop.f32.mrb[117].mxu0 }
 0x1e7   : > { %v4895_v37 = vadd.f32 %v6777_v34, %v4863_v28  ;;  %v4758_v39 = vpop.f32.mrb[121].mxu1  ;;  %v6808_v43 = vpop.f32.mrb[118].mxu0 }
 0x1e8   : > { %v5429_v59 = vld [vmem:[%s7711_s21 + $0x30] sm:$0xff]  ;;  %v4893_v62 = vadd.f32 %v4861_v53, %v4758_v39  ;;  %v6778_v63 = vpop.f32.mrb[122].mxu1  ;;  %v5315_v38 = vpop.f32.mrb[119].mxu0 }
 0x1e9   : > { %v5461_v49 = vadd.f32 %v6807_v44, %v5429_v59  ;;  %4927 = vst.msk [vmem:[%s7711_s21 + $0x50] sm:$0xff] %vm319_vm0, %v4895_v37  ;;  %v5427_v17 = vld [vmem:[%s7711_s21 + $0x20] sm:$0xff]  ;;  %v4896_v23 = vadd.f32 %v6778_v63, %v4864_v26  ;;  %v4761_v1 = vpop.f32.mrb[123].mxu1 }
 0x1ea   : > { %v5521_v19 = vld [vmem:[%s7711_s21 + $0x10] sm:$0xff]  ;;  %v5459_v20 = vadd.f32 %v5427_v17, %v5312_v16  ;;  %4925 = vst.msk [vmem:[%s7711_s21 + $0x40] sm:$0xff] %vm319_vm0, %v4893_v62  ;;  %v5430_v36 = vld [vmem:[%s7711_s21 + $0x38] sm:$0xff]  ;;  %v4894_v12 = vadd.f32 %v4862_v13, %v4761_v1  ;;  %v4869_v17 = vld [vmem:[%s7711_s21 + $0x80] sm:$0xff] }
 0x1eb   : > { %v5560_v60 = vadd.f32 %v8856_v54, %v5521_v19  ;;  %v5519_v15 = vld [vmem:[%s7711_s21] sm:$0xff]  ;;  %5493 = vst.msk [vmem:[%s7711_s21 + $0x30] sm:$0xff] %vm319_vm0, %v5461_v49  ;;  %v5462_v61 = vadd.f32 %v6808_v43, %v5430_v36  ;;  %4928 = vst.msk [vmem:[%s7711_s21 + $0x58] sm:$0xff] %vm319_vm0, %v4896_v23  ;;  %v5428_v24 = vld [vmem:[%s7711_s21 + $0x28] sm:$0xff] }
 0x1ec   : > { %v5558_v2 = vadd.f32 %v8856_v54, %v5519_v15  ;;  %v5522_v32 = vld [vmem:[%s7711_s21 + $0x18] sm:$0xff]  ;;  %5491 = vst.msk [vmem:[%s7711_s21 + $0x20] sm:$0xff] %vm319_vm0, %v5459_v20  ;;  %v5460_v0 = vadd.f32 %v5428_v24, %v5315_v38  ;;  %4926 = vst.msk [vmem:[%s7711_s21 + $0x48] sm:$0xff] %vm319_vm0, %v4894_v12  ;;  %v4871_v62 = vld [vmem:[%s7711_s21 + $0x90] sm:$0xff] }
 0x1ed   : > { %v5592_v56 = vmax.f32 %v5560_v60, 0.0  ;;  %v5561_v45 = vadd.f32 %v8856_v54, %v5522_v32  ;;  %v5520_v52 = vld [vmem:[%s7711_s21 + $0x8] sm:$0xff]  ;;  %5494 = vst.msk [vmem:[%s7711_s21 + $0x38] sm:$0xff] %vm319_vm0, %v5462_v61  ;;  %v6811_v55 = vpop.f32.mrb[120].mxu0  ;;  %v4872_v36 = vld [vmem:[%s7711_s21 + $0x98] sm:$0xff] }
 0x1ee   : > { %v5590_v48 = vmax.f32 %v5558_v2, 0.0  ;;  %v5559_v47 = vadd.f32 %v8856_v54, %v5520_v52  ;;  %5492 = vst.msk [vmem:[%s7711_s21 + $0x28] sm:$0xff] %vm319_vm0, %v5460_v0  ;;  %v5328_v29 = vpop.f32.mrb[121].mxu0  ;;  %v4870_v2 = vld [vmem:[%s7711_s21 + $0x88] sm:$0xff] }
 0x1ef   : > { %5624 = vst.msk [vmem:[%s7711_s21 + $0x10] sm:$0xff] %vm319_vm0, %v5592_v56  ;;  %v5593_v35 = vmax.f32 %v5561_v45, 0.0  ;;  %v6812_v25 = vpop.f32.mrb[122].mxu0 }
 0x1f0   : > { %v6781_v18 = vpop.f32.mrb[124].mxu1  ;;  %5622 = vst.msk [vmem:[%s7711_s21] sm:$0xff] %vm319_vm0, %v5590_v48  ;;  %v5591_v21 = vmax.f32 %v5559_v47, 0.0  ;;  %v5433_v7 = vld [vmem:[%s7711_s21 + $0x50] sm:$0xff]  ;;  %v5331_v5 = vpop.f32.mrb[123].mxu0 }
 0x1f1   : > { %v4899_v41 = vadd.f32 %v6781_v18, %v4867_v50  ;;  %v4774_v40 = vpop.f32.mrb[125].mxu1  ;;  %5625 = vst.msk [vmem:[%s7711_s21 + $0x18] sm:$0xff] %vm319_vm0, %v5593_v35  ;;  %v5465_v31 = vadd.f32 %v6811_v55, %v5433_v7  ;;  %v5431_v33 = vld [vmem:[%s7711_s21 + $0x40] sm:$0xff] }
 0x1f2   : > { %v4897_v8 = vadd.f32 %v4865_v6, %v4774_v40  ;;  %v6782_v3 = vpop.f32.mrb[126].mxu1  ;;  %5623 = vst.msk [vmem:[%s7711_s21 + $0x8] sm:$0xff] %vm319_vm0, %v5591_v21  ;;  %v5525_v27 = vld [vmem:[%s7711_s21 + $0x30] sm:$0xff]  ;;  %v5463_v30 = vadd.f32 %v5431_v33, %v5328_v29  ;;  %v5434_v10 = vld [vmem:[%s7711_s21 + $0x58] sm:$0xff]  ;;  %v4873_v33 = vld [vmem:[%s7711_s21 + $0xa0] sm:$0xff] }
 0x1f3   : > { %4931 = vst.msk [vmem:[%s7711_s21 + $0x70] sm:$0xff] %vm319_vm0, %v4899_v41  ;;  %v4900_v4 = vadd.f32 %v6782_v3, %v4868_v46  ;;  %v4777_v51 = vpop.f32.mrb[127].mxu1  ;;  %v5564_v9 = vadd.f32 %v8856_v54, %v5525_v27  ;;  %v5523_v11 = vld [vmem:[%s7711_s21 + $0x20] sm:$0xff]  ;;  %5497 = vst.msk [vmem:[%s7711_s21 + $0x50] sm:$0xff] %vm319_vm0, %v5465_v31  ;;  %v5466_v58 = vadd.f32 %v6812_v25, %v5434_v10  ;;  %v5432_v14 = vld [vmem:[%s7711_s21 + $0x48] sm:$0xff] }
 0x1f4   : > { %4929 = vst.msk [vmem:[%s7711_s21 + $0x60] sm:$0xff] %vm319_vm0, %v4897_v8  ;;  %v4898_v57 = vadd.f32 %v4866_v42, %v4777_v51  ;;  %v5562_v22 = vadd.f32 %v8856_v54, %v5523_v11  ;;  %v5526_v44 = vld [vmem:[%s7711_s21 + $0x38] sm:$0xff]  ;;  %5495 = vst.msk [vmem:[%s7711_s21 + $0x40] sm:$0xff] %vm319_vm0, %v5463_v30  ;;  %v5464_v34 = vadd.f32 %v5432_v14, %v5331_v5  ;;  %v4875_v8 = vld [vmem:[%s7711_s21 + $0xb0] sm:$0xff] }
 0x1f5   : > { %4932 = vst.msk [vmem:[%s7711_s21 + $0x78] sm:$0xff] %vm319_vm0, %v4900_v4  ;;  %v5596_v28 = vmax.f32 %v5564_v9, 0.0  ;;  %v5565_v16 = vadd.f32 %v8856_v54, %v5526_v44  ;;  %v5524_v37 = vld [vmem:[%s7711_s21 + $0x28] sm:$0xff]  ;;  %5498 = vst.msk [vmem:[%s7711_s21 + $0x58] sm:$0xff] %vm319_vm0, %v5466_v58  ;;  %v6815_v39 = vpop.f32.mrb[124].mxu0  ;;  %v4876_v10 = vld [vmem:[%s7711_s21 + $0xb8] sm:$0xff] }
 0x1f6   : > { %4930 = vst.msk [vmem:[%s7711_s21 + $0x68] sm:$0xff] %vm319_vm0, %v4898_v57  ;;  %v5594_v53 = vmax.f32 %v5562_v22, 0.0  ;;  %v5563_v43 = vadd.f32 %v8856_v54, %v5524_v37  ;;  %5496 = vst.msk [vmem:[%s7711_s21 + $0x48] sm:$0xff] %vm319_vm0, %v5464_v34  ;;  %v5344_v63 = vpop.f32.mrb[125].mxu0  ;;  %v4874_v22 = vld [vmem:[%s7711_s21 + $0xa8] sm:$0xff] }
 0x1f7   : > { %5628 = vst.msk [vmem:[%s7711_s21 + $0x30] sm:$0xff] %vm319_vm0, %v5596_v28  ;;  %v5597_v26 = vmax.f32 %v5565_v16, 0.0  ;;  %v6816_v23 = vpop.f32.mrb[126].mxu0 }
 0x1f8   : > { %v6785_v59 = vpop.f32.mrb[128].mxu1  ;;  %5626 = vst.msk [vmem:[%s7711_s21 + $0x20] sm:$0xff] %vm319_vm0, %v5594_v53  ;;  %v5595_v1 = vmax.f32 %v5563_v43, 0.0  ;;  %v5347_v12 = vpop.f32.mrb[127].mxu0 }
 0x1f9   : > { %v4903_v38 = vadd.f32 %v6785_v59, %v4871_v62  ;;  %v4790_v49 = vpop.f32.mrb[129].mxu1  ;;  %5629 = vst.msk [vmem:[%s7711_s21 + $0x38] sm:$0xff] %vm319_vm0, %v5597_v26 }
 0x1fa   : > { %v5437_v13 = vld [vmem:[%s7711_s21 + $0x70] sm:$0xff]  ;;  %v4901_v19 = vadd.f32 %v4869_v17, %v4790_v49  ;;  %v6786_v20 = vpop.f32.mrb[130].mxu1  ;;  %5627 = vst.msk [vmem:[%s7711_s21 + $0x28] sm:$0xff] %vm319_vm0, %v5595_v1 }
 0x1fb   : > { %v5469_v60 = vadd.f32 %v6815_v39, %v5437_v13  ;;  %4935 = vst.msk [vmem:[%s7711_s21 + $0x90] sm:$0xff] %vm319_vm0, %v4903_v38  ;;  %v5435_v15 = vld [vmem:[%s7711_s21 + $0x60] sm:$0xff]  ;;  %v4904_v61 = vadd.f32 %v6786_v20, %v4872_v36  ;;  %v4793_v24 = vpop.f32.mrb[131].mxu1  ;;  %v5529_v32 = vld [vmem:[%s7711_s21 + $0x50] sm:$0xff] }
 0x1fc   : > { %v5467_v0 = vadd.f32 %v5435_v15, %v5344_v63  ;;  %4933 = vst.msk [vmem:[%s7711_s21 + $0x80] sm:$0xff] %vm319_vm0, %v4901_v19  ;;  %v5438_v56 = vld [vmem:[%s7711_s21 + $0x78] sm:$0xff]  ;;  %v4902_v45 = vadd.f32 %v4870_v2, %v4793_v24  ;;  %v5568_v52 = vadd.f32 %v8856_v54, %v5529_v32  ;;  %v5527_v55 = vld [vmem:[%s7711_s21 + $0x40] sm:$0xff]  ;;  %v4879_v24 = vld [vmem:[%s7711_s21 + $0xd0] sm:$0xff] }
 0x1fd   : > { %5501 = vst.msk [vmem:[%s7711_s21 + $0x70] sm:$0xff] %vm319_vm0, %v5469_v60  ;;  %v5470_v48 = vadd.f32 %v6816_v23, %v5438_v56  ;;  %4936 = vst.msk [vmem:[%s7711_s21 + $0x98] sm:$0xff] %vm319_vm0, %v4904_v61  ;;  %v5436_v47 = vld [vmem:[%s7711_s21 + $0x68] sm:$0xff]  ;;  %v5566_v18 = vadd.f32 %v8856_v54, %v5527_v55  ;;  %v5530_v50 = vld [vmem:[%s7711_s21 + $0x58] sm:$0xff] }
 0x1fe   : > { %5499 = vst.msk [vmem:[%s7711_s21 + $0x60] sm:$0xff] %vm319_vm0, %v5467_v0  ;;  %v5468_v29 = vadd.f32 %v5436_v47, %v5347_v12  ;;  %4934 = vst.msk [vmem:[%s7711_s21 + $0x88] sm:$0xff] %vm319_vm0, %v4902_v45  ;;  %v5600_v35 = vmax.f32 %v5568_v52, 0.0  ;;  %v5569_v41 = vadd.f32 %v8856_v54, %v5530_v50  ;;  %v5528_v40 = vld [vmem:[%s7711_s21 + $0x48] sm:$0xff]  ;;  %v4877_v52 = vld [vmem:[%s7711_s21 + $0xc0] sm:$0xff] }
 0x1ff   : > { %5502 = vst.msk [vmem:[%s7711_s21 + $0x78] sm:$0xff] %vm319_vm0, %v5470_v48  ;;  %v6819_v6 = vpop.f32.mrb[128].mxu0  ;;  %v5598_v25 = vmax.f32 %v5566_v18, 0.0  ;;  %v5567_v21 = vadd.f32 %v8856_v54, %v5528_v40 }
 0x200   : > { %5500 = vst.msk [vmem:[%s7711_s21 + $0x68] sm:$0xff] %vm319_vm0, %v5468_v29  ;;  %v5360_v3 = vpop.f32.mrb[129].mxu0  ;;  %5632 = vst.msk [vmem:[%s7711_s21 + $0x50] sm:$0xff] %vm319_vm0, %v5600_v35  ;;  %v5601_v46 = vmax.f32 %v5569_v41, 0.0  ;;  %v4880_v35 = vld [vmem:[%s7711_s21 + $0xd8] sm:$0xff] }
 0x201   : > { %v6789_v7 = vpop.f32.mrb[132].mxu1  ;;  %v6820_v4 = vpop.f32.mrb[130].mxu0  ;;  %5630 = vst.msk [vmem:[%s7711_s21 + $0x40] sm:$0xff] %vm319_vm0, %v5598_v25  ;;  %v5599_v51 = vmax.f32 %v5567_v21, 0.0 }
 0x202   : > { %v4907_v5 = vadd.f32 %v6789_v7, %v4875_v8  ;;  %v4806_v31 = vpop.f32.mrb[133].mxu1  ;;  %v5441_v42 = vld [vmem:[%s7711_s21 + $0x90] sm:$0xff]  ;;  %v5363_v57 = vpop.f32.mrb[131].mxu0  ;;  %5633 = vst.msk [vmem:[%s7711_s21 + $0x58] sm:$0xff] %vm319_vm0, %v5601_v46  ;;  %v4878_v8 = vld [vmem:[%s7711_s21 + $0xc8] sm:$0xff] }
 0x203   : > { %v4905_v27 = vadd.f32 %v4873_v33, %v4806_v31  ;;  %v6790_v30 = vpop.f32.mrb[134].mxu1  ;;  %v5473_v9 = vadd.f32 %v6819_v6, %v5441_v42  ;;  %v5439_v11 = vld [vmem:[%s7711_s21 + $0x80] sm:$0xff]  ;;  %5631 = vst.msk [vmem:[%s7711_s21 + $0x48] sm:$0xff] %vm319_vm0, %v5599_v51 }
 0x204   : > { %4939 = vst.msk [vmem:[%s7711_s21 + $0xb0] sm:$0xff] %vm319_vm0, %v4907_v5  ;;  %v4908_v58 = vadd.f32 %v6790_v30, %v4876_v10  ;;  %v4809_v14 = vpop.f32.mrb[135].mxu1  ;;  %v5533_v44 = vld [vmem:[%s7711_s21 + $0x70] sm:$0xff]  ;;  %v5471_v34 = vadd.f32 %v5439_v11, %v5360_v3  ;;  %v5442_v28 = vld [vmem:[%s7711_s21 + $0x98] sm:$0xff] }
 0x205   : > { %4937 = vst.msk [vmem:[%s7711_s21 + $0xa0] sm:$0xff] %vm319_vm0, %v4905_v27  ;;  %v4906_v16 = vadd.f32 %v4874_v22, %v4809_v14  ;;  %v5572_v37 = vadd.f32 %v8856_v54, %v5533_v44  ;;  %v5531_v39 = vld [vmem:[%s7711_s21 + $0x60] sm:$0xff]  ;;  %5505 = vst.msk [vmem:[%s7711_s21 + $0x90] sm:$0xff] %vm319_vm0, %v5473_v9  ;;  %v5474_v53 = vadd.f32 %v6820_v4, %v5442_v28  ;;  %v5440_v43 = vld [vmem:[%s7711_s21 + $0x88] sm:$0xff] }
 0x206   : > { %4940 = vst.msk [vmem:[%s7711_s21 + $0xb8] sm:$0xff] %vm319_vm0, %v4908_v58  ;;  %v5570_v59 = vadd.f32 %v8856_v54, %v5531_v39  ;;  %v5534_v62 = vld [vmem:[%s7711_s21 + $0x78] sm:$0xff]  ;;  %5503 = vst.msk [vmem:[%s7711_s21 + $0x80] sm:$0xff] %vm319_vm0, %v5471_v34  ;;  %v5472_v63 = vadd.f32 %v5440_v43, %v5363_v57 }
 0x207   : > { %4938 = vst.msk [vmem:[%s7711_s21 + $0xa8] sm:$0xff] %vm319_vm0, %v4906_v16  ;;  %v5604_v26 = vmax.f32 %v5572_v37, 0.0  ;;  %v5573_v38 = vadd.f32 %v8856_v54, %v5534_v62  ;;  %v5532_v49 = vld [vmem:[%s7711_s21 + $0x68] sm:$0xff]  ;;  %5506 = vst.msk [vmem:[%s7711_s21 + $0x98] sm:$0xff] %vm319_vm0, %v5474_v53 }
 0x208   : > { %v5602_v23 = vmax.f32 %v5570_v59, 0.0  ;;  %v5571_v1 = vadd.f32 %v8856_v54, %v5532_v49  ;;  %5504 = vst.msk [vmem:[%s7711_s21 + $0x88] sm:$0xff] %vm319_vm0, %v5472_v63 }
 0x209   : > { %v6823_v17 = vpop.f32.mrb[132].mxu0  ;;  %5636 = vst.msk [vmem:[%s7711_s21 + $0x70] sm:$0xff] %vm319_vm0, %v5604_v26  ;;  %v5605_v19 = vmax.f32 %v5573_v38, 0.0 }
 0x20a   : > { %v5376_v13 = vpop.f32.mrb[133].mxu0  ;;  %5634 = vst.msk [vmem:[%s7711_s21 + $0x60] sm:$0xff] %vm319_vm0, %v5602_v23  ;;  %v5603_v36 = vmax.f32 %v5571_v1, 0.0 }
 0x20b   : > { %v6824_v20 = vpop.f32.mrb[134].mxu0  ;;  %v5445_v12 = vld [vmem:[%s7711_s21 + $0xb0] sm:$0xff]  ;;  %5637 = vst.msk [vmem:[%s7711_s21 + $0x78] sm:$0xff] %vm319_vm0, %v5605_v19 }
 0x20c   : > { %v5379_v60 = vpop.f32.mrb[135].mxu0  ;;  %v5477_v15 = vadd.f32 %v6823_v17, %v5445_v12  ;;  %v5443_v2 = vld [vmem:[%s7711_s21 + $0xa0] sm:$0xff]  ;;  %5635 = vst.msk [vmem:[%s7711_s21 + $0x68] sm:$0xff] %vm319_vm0, %v5603_v36  ;;  %v5537_v32 = vld [vmem:[%s7711_s21 + $0x90] sm:$0xff] }
 0x20d   : > { %v5475_v56 = vadd.f32 %v5443_v2, %v5376_v13  ;;  %v5446_v55 = vld [vmem:[%s7711_s21 + $0xb8] sm:$0xff]  ;;  %v5576_v48 = vadd.f32 %v8856_v54, %v5537_v32  ;;  %v5535_v47 = vld [vmem:[%s7711_s21 + $0x80] sm:$0xff]  ;;  %v4883_v17 = vld [vmem:[%s7711_s21 + $0xf0] sm:$0xff] }
 0x20e   : > { %5509 = vst.msk [vmem:[%s7711_s21 + $0xb0] sm:$0xff] %vm319_vm0, %v5477_v15  ;;  %v5478_v50 = vadd.f32 %v6824_v20, %v5446_v55  ;;  %v5444_v41 = vld [vmem:[%s7711_s21 + $0xa8] sm:$0xff]  ;;  %v5574_v40 = vadd.f32 %v8856_v54, %v5535_v47  ;;  %v5538_v6 = vld [vmem:[%s7711_s21 + $0x98] sm:$0xff]  ;;  %v4881_v20 = vld [vmem:[%s7711_s21 + $0xe0] sm:$0xff] }
 0x20f   : > { %5507 = vst.msk [vmem:[%s7711_s21 + $0xa0] sm:$0xff] %vm319_vm0, %v5475_v56  ;;  %v5476_v21 = vadd.f32 %v5444_v41, %v5379_v60  ;;  %v5608_v3 = vmax.f32 %v5576_v48, 0.0  ;;  %v5577_v46 = vadd.f32 %v8856_v54, %v5538_v6  ;;  %v5536_v5 = vld [vmem:[%s7711_s21 + $0x88] sm:$0xff]  ;;  %v4884_v60 = vld [vmem:[%s7711_s21 + $0xf8] sm:$0xff] }
 0x210   : > { %v6793_v61 = vpop.f32.mrb[136].mxu1  ;;  %5510 = vst.msk [vmem:[%s7711_s21 + $0xb8] sm:$0xff] %vm319_vm0, %v5478_v50  ;;  %v5606_v33 = vmax.f32 %v5574_v40, 0.0  ;;  %v5575_v4 = vadd.f32 %v8856_v54, %v5536_v5 }
 0x211   : > { %v4911_v0 = vadd.f32 %v6793_v61, %v4879_v24  ;;  %v4822_v45 = vpop.f32.mrb[137].mxu1  ;;  %5508 = vst.msk [vmem:[%s7711_s21 + $0xa8] sm:$0xff] %vm319_vm0, %v5476_v21  ;;  %5640 = vst.msk [vmem:[%s7711_s21 + $0x90] sm:$0xff] %vm319_vm0, %v5608_v3  ;;  %v5609_v51 = vmax.f32 %v5577_v46, 0.0  ;;  %v4882_v24 = vld [vmem:[%s7711_s21 + $0xe8] sm:$0xff] }
 0x212   : > { %v4909_v18 = vadd.f32 %v4877_v52, %v4822_v45  ;;  %v6794_v29 = vpop.f32.mrb[138].mxu1  ;;  %5638 = vst.msk [vmem:[%s7711_s21 + $0x80] sm:$0xff] %vm319_vm0, %v5606_v33  ;;  %v5607_v42 = vmax.f32 %v5575_v4, 0.0 }
 0x213   : > { %4943 = vst.msk [vmem:[%s7711_s21 + $0xd0] sm:$0xff] %vm319_vm0, %v4911_v0  ;;  %v4912_v25 = vadd.f32 %v6794_v29, %v4880_v35  ;;  %v4825_v7 = vpop.f32.mrb[139].mxu1  ;;  %5641 = vst.msk [vmem:[%s7711_s21 + $0x98] sm:$0xff] %vm319_vm0, %v5609_v51 }
 0x214   : > { %4941 = vst.msk [vmem:[%s7711_s21 + $0xc0] sm:$0xff] %vm319_vm0, %v4909_v18  ;;  %v4910_v31 = vadd.f32 %v4878_v8, %v4825_v7  ;;  %5639 = vst.msk [vmem:[%s7711_s21 + $0x88] sm:$0xff] %vm319_vm0, %v5607_v42 }
 0x215   : > { %4944 = vst.msk [vmem:[%s7711_s21 + $0xd8] sm:$0xff] %vm319_vm0, %v4912_v25  ;;  %v5541_v10 = vld [vmem:[%s7711_s21 + $0xb0] sm:$0xff] }
 0x216   : > { %4942 = vst.msk [vmem:[%s7711_s21 + $0xc8] sm:$0xff] %vm319_vm0, %v4910_v31  ;;  %v5580_v9 = vadd.f32 %v8856_v54, %v5541_v10  ;;  %v5539_v11 = vld [vmem:[%s7711_s21 + $0xa0] sm:$0xff] }
 0x217   : > { %v6827_v27 = vpop.f32.mrb[136].mxu0  ;;  %v5578_v22 = vadd.f32 %v8856_v54, %v5539_v11  ;;  %v5542_v44 = vld [vmem:[%s7711_s21 + $0xb8] sm:$0xff] }
 0x218   : > { %v5392_v30 = vpop.f32.mrb[137].mxu0  ;;  %v5612_v16 = vmax.f32 %v5580_v9, 0.0  ;;  %v5581_v37 = vadd.f32 %v8856_v54, %v5542_v44  ;;  %v5540_v39 = vld [vmem:[%s7711_s21 + $0xa8] sm:$0xff] }
 0x219   : > { %v6828_v57 = vpop.f32.mrb[138].mxu0  ;;  %v5610_v59 = vmax.f32 %v5578_v22, 0.0  ;;  %v5579_v62 = vadd.f32 %v8856_v54, %v5540_v39 }
 0x21a   : > { %v5449_v58 = vld [vmem:[%s7711_s21 + $0xd0] sm:$0xff]  ;;  %v5395_v14 = vpop.f32.mrb[139].mxu0  ;;  %5644 = vst.msk [vmem:[%s7711_s21 + $0xb0] sm:$0xff] %vm319_vm0, %v5612_v16  ;;  %v5613_v38 = vmax.f32 %v5581_v37, 0.0 }
 0x21b   : > { %v5481_v34 = vadd.f32 %v6827_v27, %v5449_v58  ;;  %v5447_v28 = vld [vmem:[%s7711_s21 + $0xc0] sm:$0xff]  ;;  %5642 = vst.msk [vmem:[%s7711_s21 + $0xa0] sm:$0xff] %vm319_vm0, %v5610_v59  ;;  %v5611_v1 = vmax.f32 %v5579_v62, 0.0 }
 0x21c   : > { %v5479_v53 = vadd.f32 %v5447_v28, %v5392_v30  ;;  %v5450_v43 = vld [vmem:[%s7711_s21 + $0xd8] sm:$0xff]  ;;  %5645 = vst.msk [vmem:[%s7711_s21 + $0xb8] sm:$0xff] %vm319_vm0, %v5613_v38 }
 0x21d   : > { %5513 = vst.msk [vmem:[%s7711_s21 + $0xd0] sm:$0xff] %vm319_vm0, %v5481_v34  ;;  %v5482_v63 = vadd.f32 %v6828_v57, %v5450_v43  ;;  %v5448_v26 = vld [vmem:[%s7711_s21 + $0xc8] sm:$0xff]  ;;  %5643 = vst.msk [vmem:[%s7711_s21 + $0xa8] sm:$0xff] %vm319_vm0, %v5611_v1 }
 0x21e   : > { %5511 = vst.msk [vmem:[%s7711_s21 + $0xc0] sm:$0xff] %vm319_vm0, %v5479_v53  ;;  %v5480_v23 = vadd.f32 %v5448_v26, %v5395_v14 }
 0x21f   : > { %v6797_v49 = vpop.f32.mrb[140].mxu1  ;;  %5514 = vst.msk [vmem:[%s7711_s21 + $0xd8] sm:$0xff] %vm319_vm0, %v5482_v63 }
 0x220   : > { %v4915_v13 = vadd.f32 %v6797_v49, %v4883_v17  ;;  %v4838_v19 = vpop.f32.mrb[141].mxu1  ;;  %5512 = vst.msk [vmem:[%s7711_s21 + $0xc8] sm:$0xff] %vm319_vm0, %v5480_v23 }
 0x221   : > { %v4913_v36 = vadd.f32 %v4881_v20, %v4838_v19  ;;  %v6798_v12 = vpop.f32.mrb[142].mxu1 }
 0x222   : > { %4947 = vst.msk [vmem:[%s7711_s21 + $0xf0] sm:$0xff] %vm319_vm0, %v4915_v13  ;;  %v4916_v15 = vadd.f32 %v6798_v12, %v4884_v60  ;;  %v4841_v61 = vpop.f32.mrb[143].mxu1  ;;  %v6831_v2 = vpop.f32.mrb[140].mxu0 }
 0x223   : > { %4945 = vst.msk [vmem:[%s7711_s21 + $0xe0] sm:$0xff] %vm319_vm0, %v4913_v36  ;;  %v4914_v32 = vadd.f32 %v4882_v24, %v4841_v61  ;;  %v5408_v0 = vpop.f32.mrb[141].mxu0 }
 0x224   : > { %4948 = vst.msk [vmem:[%s7711_s21 + $0xf8] sm:$0xff] %vm319_vm0, %v4916_v15  ;;  %v6832_v56 = vpop.f32.mrb[142].mxu0  ;;  %v5545_v45 = vld [vmem:[%s7711_s21 + $0xd0] sm:$0xff] }
 0x225   : > { %4946 = vst.msk [vmem:[%s7711_s21 + $0xe8] sm:$0xff] %vm319_vm0, %v4914_v32  ;;  %v5411_v52 = vpop.f32.mrb[143].mxu0  ;;  %v5584_v55 = vadd.f32 %v8856_v54, %v5545_v45  ;;  %v5543_v48 = vld [vmem:[%s7711_s21 + $0xc0] sm:$0xff] }
 0x226   : > { %v5582_v47 = vadd.f32 %v8856_v54, %v5543_v48  ;;  %v5546_v18 = vld [vmem:[%s7711_s21 + $0xd8] sm:$0xff] }
 0x227   : > { %v5616_v50 = vmax.f32 %v5584_v55, 0.0  ;;  %v5585_v29 = vadd.f32 %v8856_v54, %v5546_v18  ;;  %v5544_v35 = vld [vmem:[%s7711_s21 + $0xc8] sm:$0xff] }
 0x228   : > { %v5614_v41 = vmax.f32 %v5582_v47, 0.0  ;;  %v5583_v40 = vadd.f32 %v8856_v54, %v5544_v35 }
 0x229   : > { %v5453_v6 = vld [vmem:[%s7711_s21 + $0xf0] sm:$0xff]  ;;  %5648 = vst.msk [vmem:[%s7711_s21 + $0xd0] sm:$0xff] %vm319_vm0, %v5616_v50  ;;  %v5617_v25 = vmax.f32 %v5585_v29, 0.0 }
 0x22a   : > { %v5485_v21 = vadd.f32 %v6831_v2, %v5453_v6  ;;  %v5451_v7 = vld [vmem:[%s7711_s21 + $0xe0] sm:$0xff]  ;;  %5646 = vst.msk [vmem:[%s7711_s21 + $0xc0] sm:$0xff] %vm319_vm0, %v5614_v41  ;;  %v5615_v8 = vmax.f32 %v5583_v40, 0.0 }
 0x22b   : > { %v5483_v3 = vadd.f32 %v5451_v7, %v5408_v0  ;;  %v5454_v46 = vld [vmem:[%s7711_s21 + $0xf8] sm:$0xff]  ;;  %5649 = vst.msk [vmem:[%s7711_s21 + $0xd8] sm:$0xff] %vm319_vm0, %v5617_v25 }
 0x22c   : > { %5517 = vst.msk [vmem:[%s7711_s21 + $0xf0] sm:$0xff] %vm319_vm0, %v5485_v21  ;;  %v5486_v5 = vadd.f32 %v6832_v56, %v5454_v46  ;;  %v5452_v31 = vld [vmem:[%s7711_s21 + $0xe8] sm:$0xff]  ;;  %5647 = vst.msk [vmem:[%s7711_s21 + $0xc8] sm:$0xff] %vm319_vm0, %v5615_v8 }
 0x22d   : > { %5515 = vst.msk [vmem:[%s7711_s21 + $0xe0] sm:$0xff] %vm319_vm0, %v5483_v3  ;;  %v5484_v33 = vadd.f32 %v5452_v31, %v5411_v52 }
 0x22e   : > { %5518 = vst.msk [vmem:[%s7711_s21 + $0xf8] sm:$0xff] %vm319_vm0, %v5486_v5 }
 0x22f   : > { %5516 = vst.msk [vmem:[%s7711_s21 + $0xe8] sm:$0xff] %vm319_vm0, %v5484_v33 }
 0x233   : > { %v5549_v4 = vld [vmem:[%s7711_s21 + $0xf0] sm:$0xff] }
 0x234   : > { %v5588_v51 = vadd.f32 %v8856_v54, %v5549_v4  ;;  %v5547_v42 = vld [vmem:[%s7711_s21 + $0xe0] sm:$0xff] }
 0x235   : > { %v5586_v27 = vadd.f32 %v8856_v54, %v5547_v42  ;;  %v5550_v30 = vld [vmem:[%s7711_s21 + $0xf8] sm:$0xff] }
 0x236   : > { %v5620_v10 = vmax.f32 %v5588_v51, 0.0  ;;  %v5589_v57 = vadd.f32 %v8856_v54, %v5550_v30  ;;  %v5548_v9 = vld [vmem:[%s7711_s21 + $0xe8] sm:$0xff] }
 0x237   : > { %v5618_v11 = vmax.f32 %v5586_v27, 0.0  ;;  %v5587_v58 = vadd.f32 %v8856_v54, %v5548_v9 }
 0x238   : > { %5652 = vst.msk [vmem:[%s7711_s21 + $0xf0] sm:$0xff] %vm319_vm0, %v5620_v10  ;;  %v5621_v14 = vmax.f32 %v5589_v57, 0.0 }
 0x239   : > { %5650 = vst.msk [vmem:[%s7711_s21 + $0xe0] sm:$0xff] %vm319_vm0, %v5618_v11  ;;  %v5619_v22 = vmax.f32 %v5587_v58, 0.0 }
 0x23a   : > { %5653 = vst.msk [vmem:[%s7711_s21 + $0xf8] sm:$0xff] %vm319_vm0, %v5621_v14 }
 0x23b   : > { %5651 = vst.msk [vmem:[%s7711_s21 + $0xe8] sm:$0xff] %vm319_vm0, %v5619_v22 }
 0x23c PF: > { %s13_s14 = sadd.s32 1, %s6941_s14   ;;  %s9157_s12 = smov %s6937_s13 }
 0x23d   : > { %p10_p5 = scmp.ge.s32.totalorder %s13_s14, 4   ;;  %s9158_s13 = smov %s9160_s15 }
 0x23f   :  { %12 = sbr.rel (!%p10_p5) target bundleno = 2 (0x2), region = 73 }

</bundles_post_ra>
